<compile_context>
chip_gen: v5e
topology: v5e:2x2
jax: 0.10.0
libtpu: 0.0.40
codegen_flags: <defaults>
</compile_context>

<pallas_src>
import functools

import jax
import jax.numpy as jnp
from jax.experimental import pallas as pl
from jax.experimental.pallas import tpu as pltpu

NUM_HIDDEN_LAYERS = 10   # 5 res blocks x 2 linears, in execution order
NUM_WEIGHT_CHUNKS = 2    # 2 large DMAs of 5 layers each
LANE = 128
SUBLANE_BF16 = 16        # bf16 sublane tile height


# ----------------------------- kernel ---------------------------------------

def _leaky(x):
    # nn.LeakyReLU() default negative_slope = 0.01
    return jnp.where(x > 0, x, 0.01 * x)


def canonpose_kernel(
    p2d_ref, conf_ref,                    # activations (f32, VMEM)
    up_wp_ref, up_wc_ref, up_b_ref,       # upscale weight split + bias
    hw_hbm,                               # (10, H, H) bf16 weights, stay in HBM
    hb_ref,                               # (10, H) f32 biases (tile-dense, VMEM)
    p3d_w_ref, p3d_b_ref,                 # pose3d head (lane padded)
    rot_w_ref, rot_b_ref,                 # enc_rot head (lane padded)
    pose_out, rot_out,                    # outputs (lane padded)
    wbuf, sem,                            # scratch: resident weight stack + DMA sems
):
    bf16 = jnp.bfloat16
    layers_per_chunk = NUM_HIDDEN_LAYERS // NUM_WEIGHT_CHUNKS

    def chunk_copy(c):
        lo = c * layers_per_chunk
        return pltpu.make_async_copy(
            hw_hbm.at[pl.ds(lo, layers_per_chunk)],
            wbuf.at[pl.ds(lo, layers_per_chunk)],
            sem.at[c])

    # Issue all weight DMAs up front (chunk 0 first).  They stream the full
    # stack into the resident VMEM scratch while the upscale matmul (and, for
    # chunk 1, the first five hidden layers) execute.
    for c in range(NUM_WEIGHT_CHUNKS):
        chunk_copy(c).start()

    def hidden_linear(v, layer):
        """v @ W[layer] + b[layer]; waits on a weight chunk at its first use."""
        if layer % layers_per_chunk == 0:            # static (Python) condition
            chunk_copy(layer // layers_per_chunk).wait()
        y = jnp.dot(v.astype(bf16), wbuf[layer],
                    preferred_element_type=jnp.float32)
        return y + hb_ref[layer:layer + 1, :]

    def res_block(v, layer0):
        # lifter_res_block: two Linear+LeakyReLU, then residual add (f32).
        y = _leaky(hidden_linear(v, layer0))
        y = _leaky(hidden_linear(y, layer0 + 1))
        return y + v

    # upscale: concat(p2d, conf) @ W  ==  p2d @ W_top + conf @ W_bottom
    x = (jnp.dot(p2d_ref[...].astype(bf16), up_wp_ref[...],
                 preferred_element_type=jnp.float32)
         + jnp.dot(conf_ref[...].astype(bf16), up_wc_ref[...],
                   preferred_element_type=jnp.float32)
         + up_b_ref[...])

    x = _leaky(res_block(x, 0))            # res_common  (layers 0, 1)

    xp = _leaky(res_block(x, 2))           # res_pose1   (layers 2, 3)
    xp = _leaky(res_block(xp, 4))          # res_pose2   (layers 4, 5)
    pose = jnp.dot(xp.astype(bf16), p3d_w_ref[...],
                   preferred_element_type=jnp.float32) + p3d_b_ref[...]
    pose_out[...] = pose.astype(pose_out.dtype)

    xc = _leaky(res_block(x, 6))           # res_cam1    (layers 6, 7)
    xc = _leaky(res_block(xc, 8))          # res_cam2    (layers 8, 9)
    rot = jnp.dot(xc.astype(bf16), rot_w_ref[...],
                  preferred_element_type=jnp.float32) + rot_b_ref[...]
    rot_out[...] = rot.astype(rot_out.dtype)


# --------------------------- params & packing --------------------------------

def _init_linear(key, in_f, out_f):
    """Deterministic synthetic params (PyTorch Linear-style uniform init)."""
    kw, kb = jax.random.split(key)
    bound = 1.0 / jnp.sqrt(in_f)
    # Stored already transposed: (in, out), so forward is x @ W + b.
    w = jax.random.uniform(kw, (in_f, out_f), jnp.float32, -bound, bound)
    b = jax.random.uniform(kb, (1, out_f), jnp.float32, -bound, bound)
    return w, b


def init_params(key, input_fz, output_fz, hidden):
    keys = jax.random.split(key, 13)
    params = []
    params += _init_linear(keys[0], input_fz, hidden)           # upscale
    for i in range(5):                                          # 5 res blocks
        params += _init_linear(keys[1 + 2 * i], hidden, hidden)
        params += _init_linear(keys[2 + 2 * i], hidden, hidden)
    params += _init_linear(keys[11], hidden, output_fz)         # pose3d
    params += _init_linear(keys[12], hidden, 3)                 # enc_rot
    return tuple(params)


def _round_up(n, m):
    return ((n + m - 1) // m) * m


def pack_params(params, p2d_fz):
    """Convert f32 reference params into kernel-ready packed operands (once)."""
    (up_w, up_b,
     rc_w1, rc_b1, rc_w2, rc_b2,
     rp1_w1, rp1_b1, rp1_w2, rp1_b2,
     rp2_w1, rp2_b1, rp2_w2, rp2_b2,
     ca1_w1, ca1_b1, ca1_w2, ca1_b2,
     ca2_w1, ca2_b1, ca2_w2, ca2_b2,
     p3d_w, p3d_b, rot_w, rot_b) = params

    bf16 = jnp.bfloat16
    hidden = up_w.shape[1]
    output_fz = p3d_w.shape[1]

    # Split upscale weight so the concat can be done as two dots in-kernel.
    up_wp = up_w[:p2d_fz].astype(bf16)
    up_wc = up_w[p2d_fz:].astype(bf16)

    # Hidden-layer weights stacked in exact execution order (streamed from HBM
    # with two large DMAs into a resident VMEM scratch).
    hw = jnp.stack([rc_w1, rc_w2, rp1_w1, rp1_w2, rp2_w1, rp2_w2,
                    ca1_w1, ca1_w2, ca2_w1, ca2_w2]).astype(bf16)
    # Tile-dense (10, H) bias stack (f32).
    hb = jnp.concatenate([rc_b1, rc_b2, rp1_b1, rp1_b2, rp2_b1, rp2_b2,
                          ca1_b1, ca1_b2, ca2_b1, ca2_b2], axis=0)

    # Lane-dense heads: zero-pad output features to a multiple of 128 lanes.
    pose_pad = _round_up(output_fz, LANE)
    p3d_wp = jnp.zeros((hidden, pose_pad), bf16).at[:, :output_fz].set(p3d_w.astype(bf16))
    p3d_bp = jnp.zeros((1, pose_pad), jnp.float32).at[:, :output_fz].set(p3d_b)
    rot_wp = jnp.zeros((hidden, LANE), bf16).at[:, :3].set(rot_w.astype(bf16))
    rot_bp = jnp.zeros((1, LANE), jnp.float32).at[:, :3].set(rot_b)

    return (up_wp, up_wc, up_b, hw, hb, p3d_wp, p3d_bp, rot_wp, rot_bp)


# ------------------------------- wrapper --------------------------------------

@functools.partial(jax.jit, static_argnames=("output_fz",))
def canonpose_forward(p2d, conf, packed, *, output_fz):
    (up_wp, up_wc, up_b, hw, hb, p3d_wp, p3d_bp, rot_wp, rot_bp) = packed
    B = p2d.shape[0]
    hidden = up_b.shape[1]
    pose_pad = p3d_wp.shape[1]

    # Pad the batch to a full bf16 sublane tile (16 rows) with zero rows.
    B_pad = max(_round_up(B, SUBLANE_BF16), SUBLANE_BF16)
    pad_rows = B_pad - B
    p2d_p = jnp.pad(p2d.astype(jnp.float32), ((0, pad_rows), (0, 0)))
    conf_p = jnp.pad(conf.astype(jnp.float32), ((0, pad_rows), (0, 0)))

    vmem = pl.BlockSpec(memory_space=pltpu.MemorySpace.VMEM)
    hbm = pl.BlockSpec(memory_space=pl.ANY)

    # Scoped-VMEM budget: resident weight stack + headroom for activations,
    # upscale/head weights and biases.  Capped so it stays safe on v7x
    # (64 MiB physical); at hidden=1024 this is ~28 MiB (needed on v5e whose
    # default scoped limit is 16 MiB).
    weight_stack_bytes = NUM_HIDDEN_LAYERS * hidden * hidden * 2
    vmem_limit = int(min(max(weight_stack_bytes + (8 << 20), 16 << 20), 56 << 20))

    pose_p, rot_p = pl.pallas_call(
        canonpose_kernel,
        out_shape=(
            jax.ShapeDtypeStruct((B_pad, pose_pad), jnp.float32),
            jax.ShapeDtypeStruct((B_pad, LANE), jnp.float32),
        ),
        in_specs=[vmem, vmem,                 # p2d, conf (batch padded)
                  vmem, vmem, vmem,           # upscale (split) + bias
                  hbm,                        # stacked hidden weights (2 big DMAs)
                  vmem,                       # hidden biases (10, H)
                  vmem, vmem, vmem, vmem],    # heads (lane padded)
        out_specs=(vmem, vmem),
        scratch_shapes=[
            pltpu.VMEM((NUM_HIDDEN_LAYERS, hidden, hidden), jnp.bfloat16),
            pltpu.SemaphoreType.DMA((NUM_WEIGHT_CHUNKS,)),
        ],
        compiler_params=pltpu.CompilerParams(vmem_limit_bytes=vmem_limit),
    )(p2d_p, conf_p,
      up_wp, up_wc, up_b, hw, hb, p3d_wp, p3d_bp, rot_wp, rot_bp)

    return pose_p[:B, :output_fz], rot_p[:B, :3]


# --------------------------- reference (pure JAX) -----------------------------

def canonpose_reference(p2d, conf, params,
                        weight_dtype=jnp.float32, act_dtype=jnp.float32):
    """Pure-JAX module semantics. With bf16 dtypes it mirrors the kernel math."""
    def leaky(v):
        return jnp.where(v > 0, v, 0.01 * v)

    def lin(v, w, b):
        return jnp.dot(v.astype(act_dtype), w.astype(weight_dtype),
                       preferred_element_type=jnp.float32) + b

    def res(v, w1, b1, w2, b2):
        y = leaky(lin(v, w1, b1))
        y = leaky(lin(y, w2, b2))
        return y + v

    (up_w, up_b,
     rc_w1, rc_b1, rc_w2, rc_b2,
     rp1_w1, rp1_b1, rp1_w2, rp1_b2,
     rp2_w1, rp2_b1, rp2_w2, rp2_b2,
     ca1_w1, ca1_b1, ca1_w2, ca1_b2,
     ca2_w1, ca2_b1, ca2_w2, ca2_b2,
     p3d_w, p3d_b, rot_w, rot_b) = params

    x = jnp.concatenate([p2d, conf], axis=1).astype(jnp.float32)
    x = lin(x, up_w, up_b)
    x = leaky(res(x, rc_w1, rc_b1, rc_w2, rc_b2))
    xp = leaky(res(x, rp1_w1, rp1_b1, rp1_w2, rp1_b2))
    xp = leaky(res(xp, rp2_w1, rp2_b1, rp2_w2, rp2_b2))
    x_pose = lin(xp, p3d_w, p3d_b)
    xc = leaky(res(x, ca1_w1, ca1_b1, ca1_w2, ca1_b2))
    xc = leaky(res(xc, ca2_w1, ca2_b1, ca2_w2, ca2_b2))
    xc = lin(xc, rot_w, rot_b)
    return x_pose, xc


# ------------------------------- main ------------------------------------------

if __name__ == "__main__":
    # Small shapes consistent with the module: J joints, p2d = (B, 2J),
    # conf = (B, J), input_fz = output_fz = 3J, hidden scaled down from 1024.
    B, J, HIDDEN = 8, 16, 256
    INPUT_FZ = 3 * J
    OUTPUT_FZ = 3 * J

    key = jax.random.PRNGKey(0)
    k_p2d, k_conf, k_params = jax.random.split(key, 3)

    p2d = jax.random.normal(k_p2d, (B, 2 * J), jnp.float32)
    conf = jax.random.uniform(k_conf, (B, J), jnp.float32)

    params = init_params(k_params, INPUT_FZ, OUTPUT_FZ, HIDDEN)
    packed = pack_params(params, p2d_fz=2 * J)   # one-time bf16 packing

    pose, rot = canonpose_forward(p2d, conf, packed, output_fz=OUTPUT_FZ)
    pose = jax.block_until_ready(pose)
    rot = jax.block_until_ready(rot)

    assert pose.shape == (B, OUTPUT_FZ) and rot.shape == (B, 3)

    # Mirrored reference (bf16 weights + bf16 activation casts, f32 accum):
    pose_q, rot_q = canonpose_reference(p2d, conf, params,
                                        weight_dtype=jnp.bfloat16,
                                        act_dtype=jnp.bfloat16)
    assert jnp.allclose(pose, pose_q, atol=1e-2, rtol=1e-2)
    assert jnp.allclose(rot, rot_q, atol=1e-2, rtol=1e-2)

    # Full-precision module semantics (looser: bf16 weight quantization error):
    pose_f, rot_f = canonpose_reference(p2d, conf, params)
    assert jnp.allclose(pose, pose_f, atol=1e-1, rtol=1e-1)
    assert jnp.allclose(rot, rot_f, atol=1e-1, rtol=1e-1)

    print("KERNEL_OK")
</pallas_src>

<mosaic_0001>
module attributes {stable_mosaic.version = 11 : i64} {
  func.func @canonpose_kernel(%arg0: memref<16x32xf32, #tpu.memory_space<vmem>>, %arg1: memref<16x16xf32, #tpu.memory_space<vmem>>, %arg2: memref<32x256xbf16, #tpu.memory_space<vmem>>, %arg3: memref<16x256xbf16, #tpu.memory_space<vmem>>, %arg4: memref<1x256xf32, #tpu.memory_space<vmem>>, %arg5: memref<10x256x256xbf16, #tpu.memory_space<any>>, %arg6: memref<10x256xf32, #tpu.memory_space<vmem>>, %arg7: memref<256x128xbf16, #tpu.memory_space<vmem>>, %arg8: memref<1x128xf32, #tpu.memory_space<vmem>>, %arg9: memref<256x128xbf16, #tpu.memory_space<vmem>>, %arg10: memref<1x128xf32, #tpu.memory_space<vmem>>, %arg11: memref<16x128xf32, #tpu.memory_space<vmem>>, %arg12: memref<16x128xf32, #tpu.memory_space<vmem>>, %arg13: memref<10x256x256xbf16, #tpu.memory_space<vmem>>, %arg14: memref<2x!tpu.dma_semaphore, #tpu.memory_space<semaphore_mem>>) attributes {dimension_semantics = [], scalar_prefetch = 0 : i64, scratch_operands = 2 : i64, tpu.core_type = #tpu.core_type<tc>} {
    %c0_i32 = arith.constant 0 : i32
    %c0_i32_0 = arith.constant 0 : i32
    %c0_i32_1 = arith.constant 0 : i32
    %c0_i32_2 = arith.constant 0 : i32
    %0 = tpu.memref_slice %arg5[%c0_i32_0, %c0_i32_1, %c0_i32_2] : memref<10x256x256xbf16, #tpu.memory_space<any>> -> memref<5x256x256xbf16, #tpu.memory_space<any>>
    %c0_i32_3 = arith.constant 0 : i32
    %c0_i32_4 = arith.constant 0 : i32
    %c0_i32_5 = arith.constant 0 : i32
    %1 = tpu.memref_slice %arg13[%c0_i32_3, %c0_i32_4, %c0_i32_5] : memref<10x256x256xbf16, #tpu.memory_space<vmem>> -> memref<5x256x256xbf16, #tpu.memory_space<vmem>>
    %2 = tpu.memref_slice %arg14[%c0_i32] : memref<2x!tpu.dma_semaphore, #tpu.memory_space<semaphore_mem>> -> memref<1x!tpu.dma_semaphore, #tpu.memory_space<semaphore_mem>>
    %3 = tpu.memref_squeeze %2 : memref<1x!tpu.dma_semaphore, #tpu.memory_space<semaphore_mem>> -> memref<!tpu.dma_semaphore, #tpu.memory_space<semaphore_mem>>
    tpu.enqueue_dma source(%0 : memref<5x256x256xbf16, #tpu.memory_space<any>>) target(%1 : memref<5x256x256xbf16, #tpu.memory_space<vmem>>) target_semaphore(%3 : memref<!tpu.dma_semaphore, #tpu.memory_space<semaphore_mem>>)
    %c1_i32 = arith.constant 1 : i32
    %c5_i32 = arith.constant 5 : i32
    %c0_i32_6 = arith.constant 0 : i32
    %c0_i32_7 = arith.constant 0 : i32
    %4 = tpu.memref_slice %arg5[%c5_i32, %c0_i32_6, %c0_i32_7] : memref<10x256x256xbf16, #tpu.memory_space<any>> -> memref<5x256x256xbf16, #tpu.memory_space<any>>
    %c5_i32_8 = arith.constant 5 : i32
    %c0_i32_9 = arith.constant 0 : i32
    %c0_i32_10 = arith.constant 0 : i32
    %5 = tpu.memref_slice %arg13[%c5_i32_8, %c0_i32_9, %c0_i32_10] : memref<10x256x256xbf16, #tpu.memory_space<vmem>> -> memref<5x256x256xbf16, #tpu.memory_space<vmem>>
    %6 = tpu.memref_slice %arg14[%c1_i32] : memref<2x!tpu.dma_semaphore, #tpu.memory_space<semaphore_mem>> -> memref<1x!tpu.dma_semaphore, #tpu.memory_space<semaphore_mem>>
    %7 = tpu.memref_squeeze %6 : memref<1x!tpu.dma_semaphore, #tpu.memory_space<semaphore_mem>> -> memref<!tpu.dma_semaphore, #tpu.memory_space<semaphore_mem>>
    tpu.enqueue_dma source(%4 : memref<5x256x256xbf16, #tpu.memory_space<any>>) target(%5 : memref<5x256x256xbf16, #tpu.memory_space<vmem>>) target_semaphore(%7 : memref<!tpu.dma_semaphore, #tpu.memory_space<semaphore_mem>>)
    %c0 = arith.constant 0 : index
    %c0_11 = arith.constant 0 : index
    %8 = vector.load %arg0[%c0, %c0_11] : memref<16x32xf32, #tpu.memory_space<vmem>>, vector<16x32xf32>
    %9 = arith.truncf %8 : vector<16x32xf32> to vector<16x32xbf16>
    %c0_12 = arith.constant 0 : index
    %c0_13 = arith.constant 0 : index
    %10 = vector.load %arg2[%c0_12, %c0_13] : memref<32x256xbf16, #tpu.memory_space<vmem>>, vector<32x256xbf16>
    %cst = arith.constant dense<0.000000e+00> : vector<16x256xf32>
    %11 = tpu.matmul %9, %10, %cst {dimension_numbers = #tpu.dot_dimension_numbers<[1], [0], [0], [1], [0, 0, 1, 1], [], []>} : vector<16x32xbf16>, vector<32x256xbf16>, vector<16x256xf32> -> vector<16x256xf32>
    %c0_14 = arith.constant 0 : index
    %c0_15 = arith.constant 0 : index
    %12 = vector.load %arg1[%c0_14, %c0_15] : memref<16x16xf32, #tpu.memory_space<vmem>>, vector<16x16xf32>
    %13 = arith.truncf %12 : vector<16x16xf32> to vector<16x16xbf16>
    %c0_16 = arith.constant 0 : index
    %c0_17 = arith.constant 0 : index
    %14 = vector.load %arg3[%c0_16, %c0_17] : memref<16x256xbf16, #tpu.memory_space<vmem>>, vector<16x256xbf16>
    %cst_18 = arith.constant dense<0.000000e+00> : vector<16x256xf32>
    %15 = tpu.matmul %13, %14, %cst_18 {dimension_numbers = #tpu.dot_dimension_numbers<[1], [0], [0], [1], [0, 0, 1, 1], [], []>} : vector<16x16xbf16>, vector<16x256xbf16>, vector<16x256xf32> -> vector<16x256xf32>
    %16 = arith.addf %11, %15 : vector<16x256xf32>
    %c0_19 = arith.constant 0 : index
    %c0_20 = arith.constant 0 : index
    %17 = vector.load %arg4[%c0_19, %c0_20] : memref<1x256xf32, #tpu.memory_space<vmem>>, vector<1x256xf32>
    %18 = vector.broadcast %17 : vector<1x256xf32> to vector<16x256xf32>
    %19 = arith.addf %16, %18 : vector<16x256xf32>
    %c0_i32_21 = arith.constant 0 : i32
    %c0_i32_22 = arith.constant 0 : i32
    %c0_i32_23 = arith.constant 0 : i32
    %c0_i32_24 = arith.constant 0 : i32
    %20 = tpu.memref_slice %arg5[%c0_i32_22, %c0_i32_23, %c0_i32_24] : memref<10x256x256xbf16, #tpu.memory_space<any>> -> memref<5x256x256xbf16, #tpu.memory_space<any>>
    %c0_i32_25 = arith.constant 0 : i32
    %c0_i32_26 = arith.constant 0 : i32
    %c0_i32_27 = arith.constant 0 : i32
    %21 = tpu.memref_slice %arg13[%c0_i32_25, %c0_i32_26, %c0_i32_27] : memref<10x256x256xbf16, #tpu.memory_space<vmem>> -> memref<5x256x256xbf16, #tpu.memory_space<vmem>>
    %22 = tpu.memref_slice %arg14[%c0_i32_21] : memref<2x!tpu.dma_semaphore, #tpu.memory_space<semaphore_mem>> -> memref<1x!tpu.dma_semaphore, #tpu.memory_space<semaphore_mem>>
    %23 = tpu.memref_squeeze %22 : memref<1x!tpu.dma_semaphore, #tpu.memory_space<semaphore_mem>> -> memref<!tpu.dma_semaphore, #tpu.memory_space<semaphore_mem>>
    tpu.wait_dma2 semaphore(%23 : memref<!tpu.dma_semaphore, #tpu.memory_space<semaphore_mem>>) src(%20 : memref<5x256x256xbf16, #tpu.memory_space<any>>) dst(%21 : memref<5x256x256xbf16, #tpu.memory_space<vmem>>)
    %24 = arith.truncf %19 : vector<16x256xf32> to vector<16x256xbf16>
    %c0_28 = arith.constant 0 : index
    %c0_29 = arith.constant 0 : index
    %c0_30 = arith.constant 0 : index
    %25 = vector.load %arg13[%c0_28, %c0_29, %c0_30] : memref<10x256x256xbf16, #tpu.memory_space<vmem>>, vector<1x256x256xbf16>
    %26 = vector.shape_cast %25 : vector<1x256x256xbf16> to vector<256x256xbf16>
    %cst_31 = arith.constant dense<0.000000e+00> : vector<16x256xf32>
    %27 = tpu.matmul %24, %26, %cst_31 {dimension_numbers = #tpu.dot_dimension_numbers<[1], [0], [0], [1], [0, 0, 1, 1], [], []>} : vector<16x256xbf16>, vector<256x256xbf16>, vector<16x256xf32> -> vector<16x256xf32>
    %c0_32 = arith.constant 0 : index
    %c0_33 = arith.constant 0 : index
    %28 = vector.load %arg6[%c0_32, %c0_33] : memref<10x256xf32, #tpu.memory_space<vmem>>, vector<1x256xf32>
    %29 = vector.broadcast %28 : vector<1x256xf32> to vector<16x256xf32>
    %30 = arith.addf %27, %29 : vector<16x256xf32>
    %cst_34 = arith.constant 0.000000e+00 : f32
    %31 = vector.broadcast %cst_34 : f32 to vector<16x256xf32>
    %32 = arith.cmpf ogt, %30, %31 : vector<16x256xf32>
    %cst_35 = arith.constant 0.00999999977 : f32
    %33 = vector.broadcast %cst_35 : f32 to vector<16x256xf32>
    %34 = arith.mulf %33, %30 : vector<16x256xf32>
    %35 = arith.select %32, %30, %34 : vector<16x256xi1>, vector<16x256xf32>
    %36 = arith.truncf %35 : vector<16x256xf32> to vector<16x256xbf16>
    %c1 = arith.constant 1 : index
    %c0_36 = arith.constant 0 : index
    %c0_37 = arith.constant 0 : index
    %37 = vector.load %arg13[%c1, %c0_36, %c0_37] : memref<10x256x256xbf16, #tpu.memory_space<vmem>>, vector<1x256x256xbf16>
    %38 = vector.shape_cast %37 : vector<1x256x256xbf16> to vector<256x256xbf16>
    %cst_38 = arith.constant dense<0.000000e+00> : vector<16x256xf32>
    %39 = tpu.matmul %36, %38, %cst_38 {dimension_numbers = #tpu.dot_dimension_numbers<[1], [0], [0], [1], [0, 0, 1, 1], [], []>} : vector<16x256xbf16>, vector<256x256xbf16>, vector<16x256xf32> -> vector<16x256xf32>
    %c1_39 = arith.constant 1 : index
    %c0_40 = arith.constant 0 : index
    %40 = vector.load %arg6[%c1_39, %c0_40] : memref<10x256xf32, #tpu.memory_space<vmem>>, vector<1x256xf32>
    %41 = vector.broadcast %40 : vector<1x256xf32> to vector<16x256xf32>
    %42 = arith.addf %39, %41 : vector<16x256xf32>
    %cst_41 = arith.constant 0.000000e+00 : f32
    %43 = vector.broadcast %cst_41 : f32 to vector<16x256xf32>
    %44 = arith.cmpf ogt, %42, %43 : vector<16x256xf32>
    %cst_42 = arith.constant 0.00999999977 : f32
    %45 = vector.broadcast %cst_42 : f32 to vector<16x256xf32>
    %46 = arith.mulf %45, %42 : vector<16x256xf32>
    %47 = arith.select %44, %42, %46 : vector<16x256xi1>, vector<16x256xf32>
    %48 = arith.addf %47, %19 : vector<16x256xf32>
    %cst_43 = arith.constant 0.000000e+00 : f32
    %49 = vector.broadcast %cst_43 : f32 to vector<16x256xf32>
    %50 = arith.cmpf ogt, %48, %49 : vector<16x256xf32>
    %cst_44 = arith.constant 0.00999999977 : f32
    %51 = vector.broadcast %cst_44 : f32 to vector<16x256xf32>
    %52 = arith.mulf %51, %48 : vector<16x256xf32>
    %53 = arith.select %50, %48, %52 : vector<16x256xi1>, vector<16x256xf32>
    %54 = arith.truncf %53 : vector<16x256xf32> to vector<16x256xbf16>
    %c2 = arith.constant 2 : index
    %c0_45 = arith.constant 0 : index
    %c0_46 = arith.constant 0 : index
    %55 = vector.load %arg13[%c2, %c0_45, %c0_46] : memref<10x256x256xbf16, #tpu.memory_space<vmem>>, vector<1x256x256xbf16>
    %56 = vector.shape_cast %55 : vector<1x256x256xbf16> to vector<256x256xbf16>
    %cst_47 = arith.constant dense<0.000000e+00> : vector<16x256xf32>
    %57 = tpu.matmul %54, %56, %cst_47 {dimension_numbers = #tpu.dot_dimension_numbers<[1], [0], [0], [1], [0, 0, 1, 1], [], []>} : vector<16x256xbf16>, vector<256x256xbf16>, vector<16x256xf32> -> vector<16x256xf32>
    %c2_48 = arith.constant 2 : index
    %c0_49 = arith.constant 0 : index
    %58 = vector.load %arg6[%c2_48, %c0_49] : memref<10x256xf32, #tpu.memory_space<vmem>>, vector<1x256xf32>
    %59 = vector.broadcast %58 : vector<1x256xf32> to vector<16x256xf32>
    %60 = arith.addf %57, %59 : vector<16x256xf32>
    %cst_50 = arith.constant 0.000000e+00 : f32
    %61 = vector.broadcast %cst_50 : f32 to vector<16x256xf32>
    %62 = arith.cmpf ogt, %60, %61 : vector<16x256xf32>
    %cst_51 = arith.constant 0.00999999977 : f32
    %63 = vector.broadcast %cst_51 : f32 to vector<16x256xf32>
    %64 = arith.mulf %63, %60 : vector<16x256xf32>
    %65 = arith.select %62, %60, %64 : vector<16x256xi1>, vector<16x256xf32>
    %66 = arith.truncf %65 : vector<16x256xf32> to vector<16x256xbf16>
    %c3 = arith.constant 3 : index
    %c0_52 = arith.constant 0 : index
    %c0_53 = arith.constant 0 : index
    %67 = vector.load %arg13[%c3, %c0_52, %c0_53] : memref<10x256x256xbf16, #tpu.memory_space<vmem>>, vector<1x256x256xbf16>
    %68 = vector.shape_cast %67 : vector<1x256x256xbf16> to vector<256x256xbf16>
    %cst_54 = arith.constant dense<0.000000e+00> : vector<16x256xf32>
    %69 = tpu.matmul %66, %68, %cst_54 {dimension_numbers = #tpu.dot_dimension_numbers<[1], [0], [0], [1], [0, 0, 1, 1], [], []>} : vector<16x256xbf16>, vector<256x256xbf16>, vector<16x256xf32> -> vector<16x256xf32>
    %c3_55 = arith.constant 3 : index
    %c0_56 = arith.constant 0 : index
    %70 = vector.load %arg6[%c3_55, %c0_56] : memref<10x256xf32, #tpu.memory_space<vmem>>, vector<1x256xf32>
    %71 = vector.broadcast %70 : vector<1x256xf32> to vector<16x256xf32>
    %72 = arith.addf %69, %71 : vector<16x256xf32>
    %cst_57 = arith.constant 0.000000e+00 : f32
    %73 = vector.broadcast %cst_57 : f32 to vector<16x256xf32>
    %74 = arith.cmpf ogt, %72, %73 : vector<16x256xf32>
    %cst_58 = arith.constant 0.00999999977 : f32
    %75 = vector.broadcast %cst_58 : f32 to vector<16x256xf32>
    %76 = arith.mulf %75, %72 : vector<16x256xf32>
    %77 = arith.select %74, %72, %76 : vector<16x256xi1>, vector<16x256xf32>
    %78 = arith.addf %77, %53 : vector<16x256xf32>
    %cst_59 = arith.constant 0.000000e+00 : f32
    %79 = vector.broadcast %cst_59 : f32 to vector<16x256xf32>
    %80 = arith.cmpf ogt, %78, %79 : vector<16x256xf32>
    %cst_60 = arith.constant 0.00999999977 : f32
    %81 = vector.broadcast %cst_60 : f32 to vector<16x256xf32>
    %82 = arith.mulf %81, %78 : vector<16x256xf32>
    %83 = arith.select %80, %78, %82 : vector<16x256xi1>, vector<16x256xf32>
    %84 = arith.truncf %83 : vector<16x256xf32> to vector<16x256xbf16>
    %c4 = arith.constant 4 : index
    %c0_61 = arith.constant 0 : index
    %c0_62 = arith.constant 0 : index
    %85 = vector.load %arg13[%c4, %c0_61, %c0_62] : memref<10x256x256xbf16, #tpu.memory_space<vmem>>, vector<1x256x256xbf16>
    %86 = vector.shape_cast %85 : vector<1x256x256xbf16> to vector<256x256xbf16>
    %cst_63 = arith.constant dense<0.000000e+00> : vector<16x256xf32>
    %87 = tpu.matmul %84, %86, %cst_63 {dimension_numbers = #tpu.dot_dimension_numbers<[1], [0], [0], [1], [0, 0, 1, 1], [], []>} : vector<16x256xbf16>, vector<256x256xbf16>, vector<16x256xf32> -> vector<16x256xf32>
    %c4_64 = arith.constant 4 : index
    %c0_65 = arith.constant 0 : index
    %88 = vector.load %arg6[%c4_64, %c0_65] : memref<10x256xf32, #tpu.memory_space<vmem>>, vector<1x256xf32>
    %89 = vector.broadcast %88 : vector<1x256xf32> to vector<16x256xf32>
    %90 = arith.addf %87, %89 : vector<16x256xf32>
    %cst_66 = arith.constant 0.000000e+00 : f32
    %91 = vector.broadcast %cst_66 : f32 to vector<16x256xf32>
    %92 = arith.cmpf ogt, %90, %91 : vector<16x256xf32>
    %cst_67 = arith.constant 0.00999999977 : f32
    %93 = vector.broadcast %cst_67 : f32 to vector<16x256xf32>
    %94 = arith.mulf %93, %90 : vector<16x256xf32>
    %95 = arith.select %92, %90, %94 : vector<16x256xi1>, vector<16x256xf32>
    %c1_i32_68 = arith.constant 1 : i32
    %c5_i32_69 = arith.constant 5 : i32
    %c0_i32_70 = arith.constant 0 : i32
    %c0_i32_71 = arith.constant 0 : i32
    %96 = tpu.memref_slice %arg5[%c5_i32_69, %c0_i32_70, %c0_i32_71] : memref<10x256x256xbf16, #tpu.memory_space<any>> -> memref<5x256x256xbf16, #tpu.memory_space<any>>
    %c5_i32_72 = arith.constant 5 : i32
    %c0_i32_73 = arith.constant 0 : i32
    %c0_i32_74 = arith.constant 0 : i32
    %97 = tpu.memref_slice %arg13[%c5_i32_72, %c0_i32_73, %c0_i32_74] : memref<10x256x256xbf16, #tpu.memory_space<vmem>> -> memref<5x256x256xbf16, #tpu.memory_space<vmem>>
    %98 = tpu.memref_slice %arg14[%c1_i32_68] : memref<2x!tpu.dma_semaphore, #tpu.memory_space<semaphore_mem>> -> memref<1x!tpu.dma_semaphore, #tpu.memory_space<semaphore_mem>>
    %99 = tpu.memref_squeeze %98 : memref<1x!tpu.dma_semaphore, #tpu.memory_space<semaphore_mem>> -> memref<!tpu.dma_semaphore, #tpu.memory_space<semaphore_mem>>
    tpu.wait_dma2 semaphore(%99 : memref<!tpu.dma_semaphore, #tpu.memory_space<semaphore_mem>>) src(%96 : memref<5x256x256xbf16, #tpu.memory_space<any>>) dst(%97 : memref<5x256x256xbf16, #tpu.memory_space<vmem>>)
    %100 = arith.truncf %95 : vector<16x256xf32> to vector<16x256xbf16>
    %c5 = arith.constant 5 : index
    %c0_75 = arith.constant 0 : index
    %c0_76 = arith.constant 0 : index
    %101 = vector.load %arg13[%c5, %c0_75, %c0_76] : memref<10x256x256xbf16, #tpu.memory_space<vmem>>, vector<1x256x256xbf16>
    %102 = vector.shape_cast %101 : vector<1x256x256xbf16> to vector<256x256xbf16>
    %cst_77 = arith.constant dense<0.000000e+00> : vector<16x256xf32>
    %103 = tpu.matmul %100, %102, %cst_77 {dimension_numbers = #tpu.dot_dimension_numbers<[1], [0], [0], [1], [0, 0, 1, 1], [], []>} : vector<16x256xbf16>, vector<256x256xbf16>, vector<16x256xf32> -> vector<16x256xf32>
    %c5_78 = arith.constant 5 : index
    %c0_79 = arith.constant 0 : index
    %104 = vector.load %arg6[%c5_78, %c0_79] : memref<10x256xf32, #tpu.memory_space<vmem>>, vector<1x256xf32>
    %105 = vector.broadcast %104 : vector<1x256xf32> to vector<16x256xf32>
    %106 = arith.addf %103, %105 : vector<16x256xf32>
    %cst_80 = arith.constant 0.000000e+00 : f32
    %107 = vector.broadcast %cst_80 : f32 to vector<16x256xf32>
    %108 = arith.cmpf ogt, %106, %107 : vector<16x256xf32>
    %cst_81 = arith.constant 0.00999999977 : f32
    %109 = vector.broadcast %cst_81 : f32 to vector<16x256xf32>
    %110 = arith.mulf %109, %106 : vector<16x256xf32>
    %111 = arith.select %108, %106, %110 : vector<16x256xi1>, vector<16x256xf32>
    %112 = arith.addf %111, %83 : vector<16x256xf32>
    %cst_82 = arith.constant 0.000000e+00 : f32
    %113 = vector.broadcast %cst_82 : f32 to vector<16x256xf32>
    %114 = arith.cmpf ogt, %112, %113 : vector<16x256xf32>
    %cst_83 = arith.constant 0.00999999977 : f32
    %115 = vector.broadcast %cst_83 : f32 to vector<16x256xf32>
    %116 = arith.mulf %115, %112 : vector<16x256xf32>
    %117 = arith.select %114, %112, %116 : vector<16x256xi1>, vector<16x256xf32>
    %118 = arith.truncf %117 : vector<16x256xf32> to vector<16x256xbf16>
    %c0_84 = arith.constant 0 : index
    %c0_85 = arith.constant 0 : index
    %119 = vector.load %arg7[%c0_84, %c0_85] : memref<256x128xbf16, #tpu.memory_space<vmem>>, vector<256x128xbf16>
    %cst_86 = arith.constant dense<0.000000e+00> : vector<16x128xf32>
    %120 = tpu.matmul %118, %119, %cst_86 {dimension_numbers = #tpu.dot_dimension_numbers<[1], [0], [0], [1], [0, 0, 1, 1], [], []>} : vector<16x256xbf16>, vector<256x128xbf16>, vector<16x128xf32> -> vector<16x128xf32>
    %c0_87 = arith.constant 0 : index
    %c0_88 = arith.constant 0 : index
    %121 = vector.load %arg8[%c0_87, %c0_88] : memref<1x128xf32, #tpu.memory_space<vmem>>, vector<1x128xf32>
    %122 = vector.broadcast %121 : vector<1x128xf32> to vector<16x128xf32>
    %123 = arith.addf %120, %122 : vector<16x128xf32>
    %c0_89 = arith.constant 0 : index
    %c0_90 = arith.constant 0 : index
    %124 = vector.load %arg11[%c0_89, %c0_90] : memref<16x128xf32, #tpu.memory_space<vmem>>, vector<16x128xf32>
    tpu.vector_store %arg11[%c0_89, %c0_90], %123 {strides = array<i32>} : memref<16x128xf32, #tpu.memory_space<vmem>>, vector<16x128xf32>,
    %125 = arith.truncf %53 : vector<16x256xf32> to vector<16x256xbf16>
    %c6 = arith.constant 6 : index
    %c0_91 = arith.constant 0 : index
    %c0_92 = arith.constant 0 : index
    %126 = vector.load %arg13[%c6, %c0_91, %c0_92] : memref<10x256x256xbf16, #tpu.memory_space<vmem>>, vector<1x256x256xbf16>
    %127 = vector.shape_cast %126 : vector<1x256x256xbf16> to vector<256x256xbf16>
    %cst_93 = arith.constant dense<0.000000e+00> : vector<16x256xf32>
    %128 = tpu.matmul %125, %127, %cst_93 {dimension_numbers = #tpu.dot_dimension_numbers<[1], [0], [0], [1], [0, 0, 1, 1], [], []>} : vector<16x256xbf16>, vector<256x256xbf16>, vector<16x256xf32> -> vector<16x256xf32>
    %c6_94 = arith.constant 6 : index
    %c0_95 = arith.constant 0 : index
    %129 = vector.load %arg6[%c6_94, %c0_95] : memref<10x256xf32, #tpu.memory_space<vmem>>, vector<1x256xf32>
    %130 = vector.broadcast %129 : vector<1x256xf32> to vector<16x256xf32>
    %131 = arith.addf %128, %130 : vector<16x256xf32>
    %cst_96 = arith.constant 0.000000e+00 : f32
    %132 = vector.broadcast %cst_96 : f32 to vector<16x256xf32>
    %133 = arith.cmpf ogt, %131, %132 : vector<16x256xf32>
    %cst_97 = arith.constant 0.00999999977 : f32
    %134 = vector.broadcast %cst_97 : f32 to vector<16x256xf32>
    %135 = arith.mulf %134, %131 : vector<16x256xf32>
    %136 = arith.select %133, %131, %135 : vector<16x256xi1>, vector<16x256xf32>
    %137 = arith.truncf %136 : vector<16x256xf32> to vector<16x256xbf16>
    %c7 = arith.constant 7 : index
    %c0_98 = arith.constant 0 : index
    %c0_99 = arith.constant 0 : index
    %138 = vector.load %arg13[%c7, %c0_98, %c0_99] : memref<10x256x256xbf16, #tpu.memory_space<vmem>>, vector<1x256x256xbf16>
    %139 = vector.shape_cast %138 : vector<1x256x256xbf16> to vector<256x256xbf16>
    %cst_100 = arith.constant dense<0.000000e+00> : vector<16x256xf32>
    %140 = tpu.matmul %137, %139, %cst_100 {dimension_numbers = #tpu.dot_dimension_numbers<[1], [0], [0], [1], [0, 0, 1, 1], [], []>} : vector<16x256xbf16>, vector<256x256xbf16>, vector<16x256xf32> -> vector<16x256xf32>
    %c7_101 = arith.constant 7 : index
    %c0_102 = arith.constant 0 : index
    %141 = vector.load %arg6[%c7_101, %c0_102] : memref<10x256xf32, #tpu.memory_space<vmem>>, vector<1x256xf32>
    %142 = vector.broadcast %141 : vector<1x256xf32> to vector<16x256xf32>
    %143 = arith.addf %140, %142 : vector<16x256xf32>
    %cst_103 = arith.constant 0.000000e+00 : f32
    %144 = vector.broadcast %cst_103 : f32 to vector<16x256xf32>
    %145 = arith.cmpf ogt, %143, %144 : vector<16x256xf32>
    %cst_104 = arith.constant 0.00999999977 : f32
    %146 = vector.broadcast %cst_104 : f32 to vector<16x256xf32>
    %147 = arith.mulf %146, %143 : vector<16x256xf32>
    %148 = arith.select %145, %143, %147 : vector<16x256xi1>, vector<16x256xf32>
    %149 = arith.addf %148, %53 : vector<16x256xf32>
    %cst_105 = arith.constant 0.000000e+00 : f32
    %150 = vector.broadcast %cst_105 : f32 to vector<16x256xf32>
    %151 = arith.cmpf ogt, %149, %150 : vector<16x256xf32>
    %cst_106 = arith.constant 0.00999999977 : f32
    %152 = vector.broadcast %cst_106 : f32 to vector<16x256xf32>
    %153 = arith.mulf %152, %149 : vector<16x256xf32>
    %154 = arith.select %151, %149, %153 : vector<16x256xi1>, vector<16x256xf32>
    %155 = arith.truncf %154 : vector<16x256xf32> to vector<16x256xbf16>
    %c8 = arith.constant 8 : index
    %c0_107 = arith.constant 0 : index
    %c0_108 = arith.constant 0 : index
    %156 = vector.load %arg13[%c8, %c0_107, %c0_108] : memref<10x256x256xbf16, #tpu.memory_space<vmem>>, vector<1x256x256xbf16>
    %157 = vector.shape_cast %156 : vector<1x256x256xbf16> to vector<256x256xbf16>
    %cst_109 = arith.constant dense<0.000000e+00> : vector<16x256xf32>
    %158 = tpu.matmul %155, %157, %cst_109 {dimension_numbers = #tpu.dot_dimension_numbers<[1], [0], [0], [1], [0, 0, 1, 1], [], []>} : vector<16x256xbf16>, vector<256x256xbf16>, vector<16x256xf32> -> vector<16x256xf32>
    %c8_110 = arith.constant 8 : index
    %c0_111 = arith.constant 0 : index
    %159 = vector.load %arg6[%c8_110, %c0_111] : memref<10x256xf32, #tpu.memory_space<vmem>>, vector<1x256xf32>
    %160 = vector.broadcast %159 : vector<1x256xf32> to vector<16x256xf32>
    %161 = arith.addf %158, %160 : vector<16x256xf32>
    %cst_112 = arith.constant 0.000000e+00 : f32
    %162 = vector.broadcast %cst_112 : f32 to vector<16x256xf32>
    %163 = arith.cmpf ogt, %161, %162 : vector<16x256xf32>
    %cst_113 = arith.constant 0.00999999977 : f32
    %164 = vector.broadcast %cst_113 : f32 to vector<16x256xf32>
    %165 = arith.mulf %164, %161 : vector<16x256xf32>
    %166 = arith.select %163, %161, %165 : vector<16x256xi1>, vector<16x256xf32>
    %167 = arith.truncf %166 : vector<16x256xf32> to vector<16x256xbf16>
    %c9 = arith.constant 9 : index
    %c0_114 = arith.constant 0 : index
    %c0_115 = arith.constant 0 : index
    %168 = vector.load %arg13[%c9, %c0_114, %c0_115] : memref<10x256x256xbf16, #tpu.memory_space<vmem>>, vector<1x256x256xbf16>
    %169 = vector.shape_cast %168 : vector<1x256x256xbf16> to vector<256x256xbf16>
    %cst_116 = arith.constant dense<0.000000e+00> : vector<16x256xf32>
    %170 = tpu.matmul %167, %169, %cst_116 {dimension_numbers = #tpu.dot_dimension_numbers<[1], [0], [0], [1], [0, 0, 1, 1], [], []>} : vector<16x256xbf16>, vector<256x256xbf16>, vector<16x256xf32> -> vector<16x256xf32>
    %c9_117 = arith.constant 9 : index
    %c0_118 = arith.constant 0 : index
    %171 = vector.load %arg6[%c9_117, %c0_118] : memref<10x256xf32, #tpu.memory_space<vmem>>, vector<1x256xf32>
    %172 = vector.broadcast %171 : vector<1x256xf32> to vector<16x256xf32>
    %173 = arith.addf %170, %172 : vector<16x256xf32>
    %cst_119 = arith.constant 0.000000e+00 : f32
    %174 = vector.broadcast %cst_119 : f32 to vector<16x256xf32>
    %175 = arith.cmpf ogt, %173, %174 : vector<16x256xf32>
    %cst_120 = arith.constant 0.00999999977 : f32
    %176 = vector.broadcast %cst_120 : f32 to vector<16x256xf32>
    %177 = arith.mulf %176, %173 : vector<16x256xf32>
    %178 = arith.select %175, %173, %177 : vector<16x256xi1>, vector<16x256xf32>
    %179 = arith.addf %178, %154 : vector<16x256xf32>
    %cst_121 = arith.constant 0.000000e+00 : f32
    %180 = vector.broadcast %cst_121 : f32 to vector<16x256xf32>
    %181 = arith.cmpf ogt, %179, %180 : vector<16x256xf32>
    %cst_122 = arith.constant 0.00999999977 : f32
    %182 = vector.broadcast %cst_122 : f32 to vector<16x256xf32>
    %183 = arith.mulf %182, %179 : vector<16x256xf32>
    %184 = arith.select %181, %179, %183 : vector<16x256xi1>, vector<16x256xf32>
    %185 = arith.truncf %184 : vector<16x256xf32> to vector<16x256xbf16>
    %c0_123 = arith.constant 0 : index
    %c0_124 = arith.constant 0 : index
    %186 = vector.load %arg9[%c0_123, %c0_124] : memref<256x128xbf16, #tpu.memory_space<vmem>>, vector<256x128xbf16>
    %cst_125 = arith.constant dense<0.000000e+00> : vector<16x128xf32>
    %187 = tpu.matmul %185, %186, %cst_125 {dimension_numbers = #tpu.dot_dimension_numbers<[1], [0], [0], [1], [0, 0, 1, 1], [], []>} : vector<16x256xbf16>, vector<256x128xbf16>, vector<16x128xf32> -> vector<16x128xf32>
    %c0_126 = arith.constant 0 : index
    %c0_127 = arith.constant 0 : index
    %188 = vector.load %arg10[%c0_126, %c0_127] : memref<1x128xf32, #tpu.memory_space<vmem>>, vector<1x128xf32>
    %189 = vector.broadcast %188 : vector<1x128xf32> to vector<16x128xf32>
    %190 = arith.addf %187, %189 : vector<16x128xf32>
    %c0_128 = arith.constant 0 : index
    %c0_129 = arith.constant 0 : index
    %191 = vector.load %arg12[%c0_128, %c0_129] : memref<16x128xf32, #tpu.memory_space<vmem>>, vector<16x128xf32>
    tpu.vector_store %arg12[%c0_128, %c0_129], %190 {strides = array<i32>} : memref<16x128xf32, #tpu.memory_space<vmem>>, vector<16x128xf32>,
    return
  }
}

</mosaic_0001>

<bundles_post_ra>
// kernel: canonpose_forward.1
= control target key start
LH: loop header
LB: loop body
LE: loop exit
PB: predicated region body
PF: predicated region fallthrough
CT: control target
= control target key end

     0   :  { %18 = vsyncpa [#allocation5], 0  ;;  %s5742_s0 = inlined_call_operand.vmem [shape: f32[16,32], index: 0, kind: input, shape index: {}]   ;;  %s5743_s1 = inlined_call_operand.vmem [shape: f32[16,16], index: 1, kind: input, shape index: {}]   ;;  %s5744_s2 = inlined_call_operand.hbm [shape: bf16[32,256], index: 2, kind: input, shape index: {}]   ;;  %s5745_s3 = inlined_call_operand.hbm [shape: bf16[16,256], index: 3, kind: input, shape index: {}]   ;;  %s5746_s4 = inlined_call_operand.hbm [shape: f32[1,256], index: 4, kind: input, shape index: {}]   ;;  %s5747_s5 = inlined_call_operand.hbm [shape: bf16[10,256,256], index: 5, kind: input, shape index: {}]   ;;  %s5748_s6 = inlined_call_operand.hbm [shape: f32[10,256], index: 6, kind: input, shape index: {}]   ;;  %s5749_s7 = inlined_call_operand.hbm [shape: bf16[256,128], index: 7, kind: input, shape index: {}]   ;;  %s5750_s8 = inlined_call_operand.hbm [shape: f32[1,128], index: 8, kind: input, shape index: {}]   ;;  %s5751_s9 = inlined_call_operand.hbm [shape: bf16[256,128], index: 9, kind: input, shape index: {}]   ;;  %s5752_s10 = inlined_call_operand.hbm [shape: f32[1,128], index: 10, kind: input, shape index: {}]   ;;  %s5753_s11 = inlined_call_operand.vmem [shape: f32[16,128], index: 11, kind: output, shape index: {0}]   ;;  %s5754_s12 = inlined_call_operand.vmem [shape: f32[16,128], index: 12, kind: output, shape index: {1}]  }
   0x1   :  { %19 = vsyncpa [#allocation7], 0 }
   0x2   :  { %20 = vsyncpa [#allocation10], 0 }
   0x3   :  { %21 = vsyncpa [#allocation13], 0 }
   0x4   :  { %22 = vsyncpa [#allocation16], 0  ;;  %s44_s23 = sshll.u32 %s5745_s3, 4  ;;  %s5507_s24 = smov [#allocation6]   ;;  %s45_s23 = int_to_ptr.hbm [resolvable:$true] %s44_s23 }
   0x5   :  { %s46_s25 = sshll.u32 %s5507_s24, 4  ;;  %s68_s28 = sshll.u32 %s5748_s6, 4  ;;  %s47_s25 = int_to_ptr.vmem [resolvable:$true] %s46_s25  ;;  %s69_s28 = int_to_ptr.hbm [resolvable:$true] %s68_s28 }
   0x6   :  { %s5508_s29 = smov 128   ;;  %s5509_s30 = smov 8  }
   0x7   :  { %52 = dma.hbm_to_vmem [thread:$0]  %s45_s23, 256, %s47_s25, [#allocation7], %s5508_s29, %s5508_s29, %s5509_s30  }
   0x8   :  { %s5510_s13 = smov [#allocation9]   ;;  %s5511_s15 = smov 256  }
   0x9   :  { %s70_s14 = sshll.u32 %s5510_s13, 4  ;;  %s5512_s16 = smov 16   ;;  %s71_s14 = int_to_ptr.vmem [resolvable:$true] %s70_s14 }
   0xa   :  { %76 = dma.hbm_to_vmem [thread:$0]  %s69_s28, 512, %s71_s14, [#allocation10], %s5511_s15, %s5511_s15, %s5512_s16  }
   0xb   :  { %s95_s18 = sshll.u32 %s5750_s8, 4  ;;  %s5513_s19 = smov [#allocation12]   ;;  %s96_s18 = int_to_ptr.hbm [resolvable:$true] %s95_s18 }
   0xc   :  { %s97_s20 = sshll.u32 %s5513_s19, 4  ;;  %s31_s22 = sshll.u32 %s5744_s2, 4  ;;  %s98_s20 = int_to_ptr.vmem [resolvable:$true] %s97_s20  ;;  %s32_s22 = int_to_ptr.hbm [resolvable:$true] %s31_s22 }
   0xd   :  { %100 = dma.hbm_to_vmem [thread:$0]  %s96_s18, 16, %s98_s20, [#allocation13]  }
   0xe   :  { %s5514_s23 = smov [#allocation4]   ;;  %s58_s27 = sshll.u32 %s5746_s4, 4  ;;  %s59_s27 = int_to_ptr.hbm [resolvable:$true] %s58_s27 }
   0xf   :  { %s33_s24 = sshll.u32 %s5514_s23, 4  ;;  %s81_s13 = sshll.u32 %s5749_s7, 4  ;;  %s34_s24 = int_to_ptr.vmem [resolvable:$true] %s33_s24  ;;  %s82_s13 = int_to_ptr.hbm [resolvable:$true] %s81_s13 }
  0x10   :  { %39 = dma.hbm_to_vmem [thread:$0]  %s32_s22, 512, %s34_s24, [#allocation5], %s5508_s29, %s5508_s29, %s5509_s30  }
  0x11   :  { %s5515_s14 = smov [#allocation8]   ;;  %s5516_s2 = smov [#allocation11]  }
  0x12   :  { %s60_s15 = sshll.u32 %s5515_s14, 4  ;;  %s83_s16 = sshll.u32 %s5516_s2, 4  ;;  %s61_s15 = int_to_ptr.vmem [resolvable:$true] %s60_s15  ;;  %s84_s16 = int_to_ptr.vmem [resolvable:$true] %s83_s16 }
  0x13   :  { %63 = dma.hbm_to_vmem [thread:$0]  %s59_s27, 32, %s61_s15, [#allocation7]  }
  0x14   :  { %s5517_s17 = smov 64   ;;  %s5518_s3 = smov 4  }
  0x15   :  { %89 = dma.hbm_to_vmem [thread:$0]  %s82_s13, 2048, %s84_s16, [#allocation10], %s5517_s17, %s5517_s17, %s5518_s3  }
  0x16   :  { %s105_s19 = sshll.u32 %s5751_s9, 4  ;;  %s5519_s29 = smov [#allocation14]   ;;  %s106_s19 = int_to_ptr.hbm [resolvable:$true] %s105_s19 }
  0x17   :  { %s107_s30 = sshll.u32 %s5519_s29, 4  ;;  %s119_s21 = sshll.u32 %s5752_s10, 4  ;;  %s108_s30 = int_to_ptr.vmem [resolvable:$true] %s107_s30  ;;  %s120_s21 = int_to_ptr.hbm [resolvable:$true] %s119_s21 }
  0x18   :  { %113 = dma.hbm_to_vmem [thread:$0]  %s106_s19, 2048, %s108_s30, [#allocation13], %s5517_s17, %s5517_s17, %s5518_s3  }
  0x19   :  { %s5520_s6 = smov [#allocation15]  }
  0x1a   :  { %s121_s22 = sshll.u32 %s5520_s6, 4  ;;  %s122_s22 = int_to_ptr.vmem [resolvable:$true] %s121_s22 }
  0x1b   :  { %124 = dma.hbm_to_vmem [thread:$0]  %s120_s21, 16, %s122_s22, [#allocation16]  }
  0x1c   :  { %5493 = dma.done.wait [#allocation5], 512  }
  0x1d   :  { %5494 = vsyncadd [#allocation5], 4294966784 }
  0x1e   :  { %5495 = dma.done.wait [#allocation7], 288  }
  0x1f   :  { %5496 = vsyncadd [#allocation7], 4294967008 }
  0x20   :  { %5497 = dma.done.wait [#allocation10], 2560  }
  0x21   :  { %5498 = vsyncadd [#allocation10], 4294964736 }
  0x22   :  { %5499 = dma.done.wait [#allocation13], 2064  }
  0x23   :  { %5500 = vsyncadd [#allocation13], 4294965232 }
  0x24   :  { %5501 = dma.done.wait [#allocation16], 16  }
  0x25   :  { %5502 = vsyncadd [#allocation16], 4294967280  ;;  %v3459_v0 = vld [vmem:[#allocation4 + $0x10] sm:$0xf]  ;;  %v4880_v1 = vld [vmem:[#allocation4 + $0x14] sm:$0xf0] }
  0x26   :  { %v4879_v2 = vld [vmem:[#allocation4 + $0x14] sm:$0xf]  ;;  %v3460_v3 = vor.u32 %v4880_v1, %v3459_v0  ;;  %v3461_v4 = vld [vmem:[#allocation4 + $0x18] sm:$0xf0]  ;;  %v3441_v5 = vld [vmem:[#allocation6] sm:$0xf] }
  0x27   :  { %v4882_v6 = vld [vmem:[#allocation6 + $0x4] sm:$0xf0]  ;;  %v3464_v7 = vor.u32 %v4879_v2, %v3461_v4  ;;  %v4881_v9 = vld [vmem:[#allocation6 + $0x4] sm:$0xf]  ;;  %v3443_v10 = vld [vmem:[#allocation6 + $0x8] sm:$0xf0] }
  0x28   :  { %v3442_v8 = vor.u32 %v4882_v6, %v3441_v5  ;;  %v3451_v11 = vld [vmem:[#allocation4] sm:$0xf]  ;;  %271 = vmatpush.bf16.msra.mxu2 %v3460_v3  ;;  %v3446_v12 = vor.u32 %v4881_v9, %v3443_v10  ;;  %v4878_v13 = vld [vmem:[#allocation4 + $0x4] sm:$0xf0]  ;;  %v4877_v14 = vld [vmem:[#allocation4 + $0x4] sm:$0xf] }
  0x29   :  { %v3453_v15 = vld [vmem:[#allocation4 + $0x8] sm:$0xf0]  ;;  %285 = vmatpush.bf16.msra.mxu3 %v3464_v7  ;;  %v3452_v16 = vor.u32 %v4878_v13, %v3451_v11  ;;  %v194_v18 = vld [vmem:[%s5743_s1] sm:$0xff]  ;;  %vm209_vm0 = vcmask 130048   ;;  %vm261_vm1 = vcmask 261120   ;;  %s165_s13 = sshll.u32 %s5747_s5, 4  ;;  %s166_s13 = int_to_ptr.hbm [resolvable:$true] %s165_s13 }
  0x2a   :  { %220 = vmatpush.bf16.msra.mxu0 %v3442_v8  ;;  %v3456_v17 = vor.u32 %v4877_v14, %v3453_v15  ;;  %v195_v19 = vld [vmem:[%s5743_s1 + $0x8] sm:$0xff]  ;;  %v187_v20 = vld [vmem:[%s5742_s0] sm:$0xff]  ;;  %234 = vmatpush.bf16.msra.mxu1 %v3446_v12  ;;  %s5521_s14 = smov [#allocation2]   ;;  %s5522_s3 = smov [#allocation2 + $0x500]   ;;  %v293_v24 = vld [vmem:[#allocation8] sm:$0x3] }
  0x2b   :  { %v196_v21 = vpack.c.bf16 %v195_v19, %v194_v18  ;;  %v188_v22 = vld [vmem:[%s5742_s0 + $0x8] sm:$0xff]  ;;  %s167_s15 = sshll.u32 %s5521_s14, 4  ;;  %s171_s0 = scalar_lea.hbm %s5747_s5, 1280  ;;  %v295_v27 = vperm.slane %v293_v24, 0  ;;  %v296_v29 = vperm.slane %v293_v24, 1  ;;  %s168_s15 = int_to_ptr.vmem [resolvable:$true] %s167_s15 }
  0x2c   :  { %v189_v23 = vpack.c.bf16 %v188_v22, %v187_v20  ;;  %272 = vmatpush.bf16.msra.mxu2 %v3452_v16  ;;  %170 = dma.hbm_to_vmem [thread:$0]  %s166_s13, 20480, %s168_s15, [#allocation3] }
  0x2d   :  { %3447 = vmatmul.msk.bf16.vlgmr.msra.gmra.mxu0 %vm209_vm0, %v196_v21  ;;  %286 = vmatpush.bf16.msra.mxu3 %v3456_v17  ;;  %s181_s17 = sshll.u32 %s171_s0, 4  ;;  %s183_s18 = sshll.u32 %s5522_s3, 4  ;;  %s182_s17 = int_to_ptr.hbm [resolvable:$true] %s181_s17  ;;  %s184_s18 = int_to_ptr.vmem [resolvable:$true] %s183_s18 }
  0x2e   :  { %3448 = vmatmul.msk.bf16.vlgmr.msra.gmra.mxu1 %vm209_vm0, %v196_v21  ;;  %186 = dma.hbm_to_vmem [thread:$0]  %s182_s17, 20480, %s184_s18, [#allocation3 + $0x1] }
  0x2f   :  { %3465 = vmatmul.msk.bf16.vlgmr.msra.gmra.mxu2 %vm261_vm1, %v189_v23 }
  0x30   :  { %3466 = vmatmul.msk.bf16.vlgmr.msra.gmra.mxu3 %vm261_vm1, %v189_v23 }
  0xaa   :  { %v222_v25 = vpop.f32.mrf.mxu0 }
  0xab   :  { %v236_v26 = vpop.f32.mrf.mxu1 }
  0xb2   :  { %v274_v28 = vpop.f32.mrf.mxu2  ;;  %v224_v35 = vpop.f32.mrf.mxu0 }
  0xb3   :  { %v275_v30 = vadd.f32 %v274_v28, %v222_v25  ;;  %v288_v31 = vpop.f32.mrf.mxu3  ;;  %v238_v37 = vpop.f32.mrf.mxu1 }
  0xb4   :  { %v289_v32 = vadd.f32 %v288_v31, %v236_v26 }
  0xb5   :  { %v5630_v33 = vadd.f32 %v295_v27, %v275_v30 }
  0xb6   :  { %v5632_v34 = vadd.f32 %v296_v29, %v289_v32 }
  0xba   :  { %v276_v36 = vpop.f32.mrf.mxu2 }
  0xbb   :  { %v277_v38 = vadd.f32 %v276_v36, %v224_v35  ;;  %v290_v39 = vpop.f32.mrf.mxu3 }
  0xbc   :  { %v291_v40 = vadd.f32 %v290_v39, %v238_v37 }
  0xbd   :  { %v5634_v41 = vadd.f32 %v295_v27, %v277_v38 }
  0xbe   :  { %v5636_v42 = vadd.f32 %v296_v29, %v291_v40 }
  0xbf   :  { %5503 = dma.done.wait [#allocation3], 20480 }
  0xc0   :  { %5504 = vsyncadd [#allocation3], 4294946816  ;;  %v3525_v43 = vld [vmem:[#allocation2 + $0x70] sm:$0xf]  ;;  %v4898_v44 = vld [vmem:[#allocation2 + $0x74] sm:$0xf0] }
  0xc1   :  { %v3589_v45 = vld [vmem:[#allocation2 + $0xf0] sm:$0xf]  ;;  %v3526_v46 = vor.u32 %v4898_v44, %v3525_v43  ;;  %v4914_v47 = vld [vmem:[#allocation2 + $0xf4] sm:$0xf0]  ;;  %v4897_v48 = vld [vmem:[#allocation2 + $0x74] sm:$0xf] }
  0xc2   :  { %v3527_v49 = vld [vmem:[#allocation2 + $0x78] sm:$0xf0]  ;;  %v3590_v50 = vor.u32 %v4914_v47, %v3589_v45  ;;  %v4913_v52 = vld [vmem:[#allocation2 + $0xf4] sm:$0xf]  ;;  %v3517_v54 = vld [vmem:[#allocation2 + $0x60] sm:$0xf] }
  0xc3   :  { %v3530_v51 = vor.u32 %v4897_v48, %v3527_v49  ;;  %v3591_v53 = vld [vmem:[#allocation2 + $0xf8] sm:$0xf0]  ;;  %508 = vmatpush.bf16.msrb.mxu0 %v3526_v46  ;;  %v4896_v56 = vld [vmem:[#allocation2 + $0x64] sm:$0xf0]  ;;  %v3581_v57 = vld [vmem:[#allocation2 + $0xe0] sm:$0xf] }
  0xc4   :  { %v3594_v55 = vor.u32 %v4913_v52, %v3591_v53  ;;  %v4912_v58 = vld [vmem:[#allocation2 + $0xe4] sm:$0xf0]  ;;  %522 = vmatpush.bf16.msrb.mxu1 %v3590_v50  ;;  %v3518_v59 = vor.u32 %v4896_v56, %v3517_v54  ;;  %v4895_v61 = vld [vmem:[#allocation2 + $0x64] sm:$0xf]  ;;  %v3519_v62 = vld [vmem:[#allocation2 + $0x68] sm:$0xf0] }
  0xc5   :  { %536 = vmatpush.bf16.msrb.mxu2 %v3530_v51  ;;  %v3582_v60 = vor.u32 %v4912_v58, %v3581_v57  ;;  %v4911_v63 = vld [vmem:[#allocation2 + $0xe4] sm:$0xf]  ;;  %v3522_v0 = vor.u32 %v4895_v61, %v3519_v62  ;;  %v3583_v1 = vld [vmem:[#allocation2 + $0xe8] sm:$0xf0]  ;;  %v3509_v2 = vld [vmem:[#allocation2 + $0x50] sm:$0xf] }
  0xc6   :  { %550 = vmatpush.bf16.msrb.mxu3 %v3594_v55  ;;  %v4894_v3 = vld [vmem:[#allocation2 + $0x54] sm:$0xf0]  ;;  %v3586_v4 = vor.u32 %v4911_v63, %v3583_v1  ;;  %v3573_v5 = vld [vmem:[#allocation2 + $0xd0] sm:$0xf]  ;;  %v4893_v7 = vld [vmem:[#allocation2 + $0x54] sm:$0xf] }
  0xc7   :  { %v4910_v6 = vld [vmem:[#allocation2 + $0xd4] sm:$0xf0]  ;;  %509 = vmatpush.bf16.msrb.mxu0 %v3518_v59  ;;  %v3510_v8 = vor.u32 %v4894_v3, %v3509_v2  ;;  %v3511_v9 = vld [vmem:[#allocation2 + $0x58] sm:$0xf0]  ;;  %v4909_v10 = vld [vmem:[#allocation2 + $0xd4] sm:$0xf] }
  0xc8   :  { %v3575_v11 = vld [vmem:[#allocation2 + $0xd8] sm:$0xf0]  ;;  %523 = vmatpush.bf16.msrb.mxu1 %v3582_v60  ;;  %v3574_v12 = vor.u32 %v4910_v6, %v3573_v5  ;;  %v3514_v13 = vor.u32 %v4893_v7, %v3511_v9  ;;  %v3501_v14 = vld [vmem:[#allocation2 + $0x40] sm:$0xf]  ;;  %v4892_v15 = vld [vmem:[#allocation2 + $0x44] sm:$0xf0] }
  0xc9   :  { %537 = vmatpush.bf16.msrb.mxu2 %v3522_v0  ;;  %v3565_v16 = vld [vmem:[#allocation2 + $0xc0] sm:$0xf]  ;;  %v3578_v17 = vor.u32 %v4909_v10, %v3575_v11  ;;  %v4908_v18 = vld [vmem:[#allocation2 + $0xc4] sm:$0xf0]  ;;  %v4891_v19 = vld [vmem:[#allocation2 + $0x44] sm:$0xf]  ;;  %v3502_v23 = vor.u32 %v4892_v15, %v3501_v14 }
  0xca   :  { %551 = vmatpush.bf16.msrb.mxu3 %v3586_v4  ;;  %v3503_v20 = vld [vmem:[#allocation2 + $0x48] sm:$0xf0]  ;;  %v4907_v21 = vld [vmem:[#allocation2 + $0xc4] sm:$0xf]  ;;  %v3566_v24 = vor.u32 %v4908_v18, %v3565_v16  ;;  %v3493_v26 = vld [vmem:[#allocation2 + $0x30] sm:$0xf] }
  0xcb   :  { %v3567_v22 = vld [vmem:[#allocation2 + $0xc8] sm:$0xf0]  ;;  %510 = vmatpush.bf16.msrb.mxu0 %v3510_v8  ;;  %v3506_v25 = vor.u32 %v4891_v19, %v3503_v20  ;;  %v4890_v27 = vld [vmem:[#allocation2 + $0x34] sm:$0xf0]  ;;  %v3557_v28 = vld [vmem:[#allocation2 + $0xb0] sm:$0xf] }
  0xcc   :  { %524 = vmatpush.bf16.msrb.mxu1 %v3574_v12  ;;  %v3570_v29 = vor.u32 %v4907_v21, %v3567_v22  ;;  %v4906_v30 = vld [vmem:[#allocation2 + $0xb4] sm:$0xf0]  ;;  %v4889_v31 = vld [vmem:[#allocation2 + $0x34] sm:$0xf]  ;;  %v3495_v32 = vld [vmem:[#allocation2 + $0x38] sm:$0xf0]  ;;  %v3494_v37 = vor.u32 %v4890_v27, %v3493_v26 }
  0xcd   :  { %538 = vmatpush.bf16.msrb.mxu2 %v3514_v13  ;;  %v4905_v35 = vld [vmem:[#allocation2 + $0xb4] sm:$0xf]  ;;  %v3559_v36 = vld [vmem:[#allocation2 + $0xb8] sm:$0xf0]  ;;  %v3558_v38 = vor.u32 %v4906_v30, %v3557_v28  ;;  %v3498_v39 = vor.u32 %v4889_v31, %v3495_v32  ;;  %v3485_v40 = vld [vmem:[#allocation2 + $0x20] sm:$0xf]  ;;  %v309_v28 = vpack.c.bf16 %v5636_v42, %v5632_v34 }
  0xce   :  { %552 = vmatpush.bf16.msrb.mxu3 %v3578_v17  ;;  %v4888_v43 = vld [vmem:[#allocation2 + $0x24] sm:$0xf0]  ;;  %v3549_v44 = vld [vmem:[#allocation2 + $0xa0] sm:$0xf]  ;;  %v3562_v45 = vor.u32 %v4905_v35, %v3559_v36  ;;  %v4887_v47 = vld [vmem:[#allocation2 + $0x24] sm:$0xf] }
  0xcf   :  { %511 = vmatpush.bf16.msrb.mxu0 %v3502_v23  ;;  %v4904_v46 = vld [vmem:[#allocation2 + $0xa4] sm:$0xf0]  ;;  %v3487_v48 = vld [vmem:[#allocation2 + $0x28] sm:$0xf0]  ;;  %v4903_v49 = vld [vmem:[#allocation2 + $0xa4] sm:$0xf]  ;;  %v3486_v51 = vor.u32 %v4888_v43, %v3485_v40  ;;  %v308_v23 = vpack.c.bf16 %v5634_v41, %v5630_v33 }
  0xd0   :  { %525 = vmatpush.bf16.msrb.mxu1 %v3566_v24  ;;  %v3551_v50 = vld [vmem:[#allocation2 + $0xa8] sm:$0xf0]  ;;  %v3550_v52 = vor.u32 %v4904_v46, %v3549_v44  ;;  %v3490_v53 = vor.u32 %v4887_v47, %v3487_v48  ;;  %v3477_v54 = vld [vmem:[#allocation2 + $0x10] sm:$0xf]  ;;  %v4886_v55 = vld [vmem:[#allocation2 + $0x14] sm:$0xf0] }
  0xd1   :  { %539 = vmatpush.bf16.msrb.mxu2 %v3506_v25  ;;  %v3541_v56 = vld [vmem:[#allocation2 + $0x90] sm:$0xf]  ;;  %v3554_v57 = vor.u32 %v4903_v49, %v3551_v50  ;;  %v4902_v58 = vld [vmem:[#allocation2 + $0x94] sm:$0xf0]  ;;  %v4885_v59 = vld [vmem:[#allocation2 + $0x14] sm:$0xf]  ;;  %v3478_v63 = vor.u32 %v4886_v55, %v3477_v54 }
  0xd2   :  { %553 = vmatpush.bf16.msrb.mxu3 %v3570_v29  ;;  %v3479_v60 = vld [vmem:[#allocation2 + $0x18] sm:$0xf0]  ;;  %v4901_v61 = vld [vmem:[#allocation2 + $0x94] sm:$0xf]  ;;  %v3469_v0 = vld [vmem:[#allocation2] sm:$0xf]  ;;  %v3542_v1 = vor.u32 %v4902_v58, %v3541_v56 }
  0xd3   :  { %512 = vmatpush.bf16.msrb.mxu0 %v3494_v37  ;;  %v3543_v62 = vld [vmem:[#allocation2 + $0x98] sm:$0xf0]  ;;  %v3482_v2 = vor.u32 %v4885_v59, %v3479_v60  ;;  %v4884_v3 = vld [vmem:[#allocation2 + $0x4] sm:$0xf0]  ;;  %v3533_v4 = vld [vmem:[#allocation2 + $0x80] sm:$0xf] }
  0xd4   :  { %526 = vmatpush.bf16.msrb.mxu1 %v3558_v38  ;;  %v4900_v5 = vld [vmem:[#allocation2 + $0x84] sm:$0xf0]  ;;  %v3546_v6 = vor.u32 %v4901_v61, %v3543_v62  ;;  %v4883_v7 = vld [vmem:[#allocation2 + $0x4] sm:$0xf]  ;;  %v3471_v8 = vld [vmem:[#allocation2 + $0x8] sm:$0xf0]  ;;  %v3470_v13 = vor.u32 %v4884_v3, %v3469_v0 }
  0xd5   :  { %540 = vmatpush.bf16.msrb.mxu2 %v3498_v39  ;;  %v4899_v9 = vld [vmem:[#allocation2 + $0x84] sm:$0xf]  ;;  %v3535_v10 = vld [vmem:[#allocation2 + $0x88] sm:$0xf0]  ;;  %v3653_v11 = vld [vmem:[#allocation2 + $0x170] sm:$0xf]  ;;  %v3534_v16 = vor.u32 %v4900_v5, %v3533_v4  ;;  %v3474_v17 = vor.u32 %v4883_v7, %v3471_v8 }
  0xd6   :  { %554 = vmatpush.bf16.msrb.mxu3 %v3562_v45  ;;  %v4930_v12 = vld [vmem:[#allocation2 + $0x174] sm:$0xf0]  ;;  %v4929_v14 = vld [vmem:[#allocation2 + $0x174] sm:$0xf]  ;;  %v3655_v15 = vld [vmem:[#allocation2 + $0x178] sm:$0xf0]  ;;  %v3538_v18 = vor.u32 %v4899_v9, %v3535_v10 }
  0xd7   :  { %513 = vmatpush.bf16.msrb.mxu0 %v3486_v51  ;;  %v3654_v19 = vor.u32 %v4930_v12, %v3653_v11  ;;  %v3645_v20 = vld [vmem:[#allocation2 + $0x160] sm:$0xf]  ;;  %v3717_v21 = vld [vmem:[#allocation2 + $0x1f0] sm:$0xf]  ;;  %v4946_v22 = vld [vmem:[#allocation2 + $0x1f4] sm:$0xf0]  ;;  %v3658_v24 = vor.u32 %v4929_v14, %v3655_v15 }
  0xd8   :  { %527 = vmatpush.bf16.msrb.mxu1 %v3550_v52  ;;  %v4928_v25 = vld [vmem:[#allocation2 + $0x164] sm:$0xf0]  ;;  %v4945_v26 = vld [vmem:[#allocation2 + $0x1f4] sm:$0xf]  ;;  %v3719_v27 = vld [vmem:[#allocation2 + $0x1f8] sm:$0xf0]  ;;  %v3718_v31 = vor.u32 %v4946_v22, %v3717_v21 }
  0xd9   :  { %541 = vmatpush.bf16.msrb.mxu2 %v3490_v53  ;;  %v4927_v29 = vld [vmem:[#allocation2 + $0x164] sm:$0xf]  ;;  %v3647_v30 = vld [vmem:[#allocation2 + $0x168] sm:$0xf0]  ;;  %v3646_v32 = vor.u32 %v4928_v25, %v3645_v20  ;;  %v3722_v35 = vor.u32 %v4945_v26, %v3719_v27  ;;  %v3637_v36 = vld [vmem:[#allocation2 + $0x150] sm:$0xf] }
  0xda   :  { %555 = vmatpush.bf16.msrb.mxu3 %v3554_v57  ;;  %v3709_v37 = vld [vmem:[#allocation2 + $0x1e0] sm:$0xf]  ;;  %v4944_v38 = vld [vmem:[#allocation2 + $0x1e4] sm:$0xf0]  ;;  %v3650_v39 = vor.u32 %v4927_v29, %v3647_v30  ;;  %v4926_v40 = vld [vmem:[#allocation2 + $0x154] sm:$0xf0] }
  0xdb   :  { %514 = vmatpush.bf16.msrb.mxu0 %v3478_v63  ;;  %v4943_v43 = vld [vmem:[#allocation2 + $0x1e4] sm:$0xf]  ;;  %v3711_v44 = vld [vmem:[#allocation2 + $0x1e8] sm:$0xf0]  ;;  %v4925_v45 = vld [vmem:[#allocation2 + $0x154] sm:$0xf]  ;;  %v3710_v47 = vor.u32 %v4944_v38, %v3709_v37  ;;  %v3638_v48 = vor.u32 %v4926_v40, %v3637_v36 }
  0xdc   :  { %528 = vmatpush.bf16.msrb.mxu1 %v3542_v1  ;;  %v3639_v46 = vld [vmem:[#allocation2 + $0x158] sm:$0xf0]  ;;  %v3714_v49 = vor.u32 %v4943_v43, %v3711_v44  ;;  %v3629_v51 = vld [vmem:[#allocation2 + $0x140] sm:$0xf]  ;;  %v4924_v52 = vld [vmem:[#allocation2 + $0x144] sm:$0xf0] }
  0xdd   :  { %542 = vmatpush.bf16.msrb.mxu2 %v3482_v2  ;;  %v3642_v50 = vor.u32 %v4925_v45, %v3639_v46  ;;  %v4923_v53 = vld [vmem:[#allocation2 + $0x144] sm:$0xf]  ;;  %v3631_v54 = vld [vmem:[#allocation2 + $0x148] sm:$0xf0]  ;;  %v3630_v55 = vor.u32 %v4924_v52, %v3629_v51  ;;  %v3701_v57 = vld [vmem:[#allocation2 + $0x1d0] sm:$0xf] }
  0xde   :  { %556 = vmatpush.bf16.msrb.mxu3 %v3546_v6  ;;  %v3634_v56 = vor.u32 %v4923_v53, %v3631_v54  ;;  %v4942_v58 = vld [vmem:[#allocation2 + $0x1d4] sm:$0xf0]  ;;  %v4941_v59 = vld [vmem:[#allocation2 + $0x1d4] sm:$0xf]  ;;  %v3703_v61 = vld [vmem:[#allocation2 + $0x1d8] sm:$0xf0] }
  0xdf   :  { %515 = vmatpush.bf16.msrb.mxu0 %v3470_v13  ;;  %v3702_v60 = vor.u32 %v4942_v58, %v3701_v57  ;;  %v3706_v62 = vor.u32 %v4941_v59, %v3703_v61  ;;  %v3621_v63 = vld [vmem:[#allocation2 + $0x130] sm:$0xf]  ;;  %v4922_v0 = vld [vmem:[#allocation2 + $0x134] sm:$0xf0]  ;;  %v4921_v1 = vld [vmem:[#allocation2 + $0x134] sm:$0xf] }
  0xe0   :  { %529 = vmatpush.bf16.msrb.mxu1 %v3534_v16  ;;  %v3622_v2 = vor.u32 %v4922_v0, %v3621_v63  ;;  %v3623_v3 = vld [vmem:[#allocation2 + $0x138] sm:$0xf0]  ;;  %v3693_v5 = vld [vmem:[#allocation2 + $0x1c0] sm:$0xf]  ;;  %v4940_v6 = vld [vmem:[#allocation2 + $0x1c4] sm:$0xf0] }
  0xe1   :  { %543 = vmatpush.bf16.msrb.mxu2 %v3474_v17  ;;  %v3626_v4 = vor.u32 %v4921_v1, %v3623_v3  ;;  %v4939_v7 = vld [vmem:[#allocation2 + $0x1c4] sm:$0xf]  ;;  %v3694_v8 = vor.u32 %v4940_v6, %v3693_v5  ;;  %v3695_v9 = vld [vmem:[#allocation2 + $0x1c8] sm:$0xf0]  ;;  %v3613_v11 = vld [vmem:[#allocation2 + $0x120] sm:$0xf] }
  0xe2   :  { %557 = vmatpush.bf16.msrb.mxu3 %v3538_v18  ;;  %516 = vmatmul.bf16.vlgmr.msrb.gmra.mxu0 %v308_v23  ;;  %v3698_v10 = vor.u32 %v4939_v7, %v3695_v9  ;;  %v4920_v12 = vld [vmem:[#allocation2 + $0x124] sm:$0xf0]  ;;  %v4919_v13 = vld [vmem:[#allocation2 + $0x124] sm:$0xf]  ;;  %v3615_v15 = vld [vmem:[#allocation2 + $0x128] sm:$0xf0] }
  0xe3   :  { %778 = vmatpush.bf16.msra.mxu0 %v3654_v19  ;;  %530 = vmatmul.bf16.vlgmr.msrb.gmra.mxu1 %v309_v28  ;;  %v3614_v14 = vor.u32 %v4920_v12, %v3613_v11  ;;  %v3618_v16 = vor.u32 %v4919_v13, %v3615_v15  ;;  %v3685_v17 = vld [vmem:[#allocation2 + $0x1b0] sm:$0xf]  ;;  %v4938_v18 = vld [vmem:[#allocation2 + $0x1b4] sm:$0xf0]  ;;  %v4937_v19 = vld [vmem:[#allocation2 + $0x1b4] sm:$0xf] }
  0xe4   :  { %544 = vmatmul.bf16.vlgmr.msrb.gmra.mxu2 %v308_v23  ;;  %792 = vmatpush.bf16.msra.mxu1 %v3718_v31  ;;  %v3686_v20 = vor.u32 %v4938_v18, %v3685_v17  ;;  %v3687_v21 = vld [vmem:[#allocation2 + $0x1b8] sm:$0xf0]  ;;  %v3605_v23 = vld [vmem:[#allocation2 + $0x110] sm:$0xf]  ;;  %v4917_v25 = vld [vmem:[#allocation2 + $0x114] sm:$0xf] }
  0xe5   :  { %806 = vmatpush.bf16.msra.mxu2 %v3658_v24  ;;  %558 = vmatmul.bf16.vlgmr.msrb.gmra.mxu3 %v309_v28  ;;  %v3690_v22 = vor.u32 %v4937_v19, %v3687_v21  ;;  %v4918_v24 = vld [vmem:[#allocation2 + $0x114] sm:$0xf0]  ;;  %v3607_v27 = vld [vmem:[#allocation2 + $0x118] sm:$0xf0]  ;;  %v3677_v29 = vld [vmem:[#allocation2 + $0x1a0] sm:$0xf] }
  0xe6   :  { %820 = vmatpush.bf16.msra.mxu3 %v3722_v35  ;;  %v3606_v26 = vor.u32 %v4918_v24, %v3605_v23  ;;  %v3610_v28 = vor.u32 %v4917_v25, %v3607_v27  ;;  %v4936_v30 = vld [vmem:[#allocation2 + $0x1a4] sm:$0xf0]  ;;  %v4935_v31 = vld [vmem:[#allocation2 + $0x1a4] sm:$0xf]  ;;  %v3679_v35 = vld [vmem:[#allocation2 + $0x1a8] sm:$0xf0] }
  0xe7   :  { %779 = vmatpush.bf16.msra.mxu0 %v3646_v32  ;;  %v3678_v32 = vor.u32 %v4936_v30, %v3677_v29  ;;  %v3682_v36 = vor.u32 %v4935_v31, %v3679_v35  ;;  %v3597_v37 = vld [vmem:[#allocation2 + $0x100] sm:$0xf]  ;;  %v4916_v38 = vld [vmem:[#allocation2 + $0x104] sm:$0xf0]  ;;  %v3599_v43 = vld [vmem:[#allocation2 + $0x108] sm:$0xf0] }
  0xe8   :  { %793 = vmatpush.bf16.msra.mxu1 %v3710_v47  ;;  %v3598_v40 = vor.u32 %v4916_v38, %v3597_v37  ;;  %v3669_v45 = vld [vmem:[#allocation2 + $0x190] sm:$0xf]  ;;  %v4934_v46 = vld [vmem:[#allocation2 + $0x194] sm:$0xf0]  ;;  %v4933_v47 = vld [vmem:[#allocation2 + $0x194] sm:$0xf] }
  0xe9   :  { %807 = vmatpush.bf16.msra.mxu2 %v3650_v39  ;;  %v4915_v39 = vld [vmem:[#allocation2 + $0x104] sm:$0xf]  ;;  %v3661_v51 = vld [vmem:[#allocation2 + $0x180] sm:$0xf]  ;;  %v4932_v52 = vld [vmem:[#allocation2 + $0x184] sm:$0xf0] }
  0xea   :  { %821 = vmatpush.bf16.msra.mxu3 %v3714_v49  ;;  %v3602_v44 = vor.u32 %v4915_v39, %v3599_v43  ;;  %v3671_v49 = vld [vmem:[#allocation2 + $0x198] sm:$0xf0]  ;;  %v4931_v53 = vld [vmem:[#allocation2 + $0x184] sm:$0xf]  ;;  %v3662_v54 = vor.u32 %v4932_v52, %v3661_v51  ;;  %v3781_v57 = vld [vmem:[#allocation2 + $0x270] sm:$0xf] }
  0xeb   :  { %780 = vmatpush.bf16.msra.mxu0 %v3638_v48  ;;  %v3670_v48 = vor.u32 %v4934_v46, %v3669_v45  ;;  %v4962_v58 = vld [vmem:[#allocation2 + $0x274] sm:$0xf0]  ;;  %v4961_v59 = vld [vmem:[#allocation2 + $0x274] sm:$0xf]  ;;  %v3783_v61 = vld [vmem:[#allocation2 + $0x278] sm:$0xf0] }
  0xec   :  { %794 = vmatpush.bf16.msra.mxu1 %v3702_v60  ;;  %v3782_v60 = vor.u32 %v4962_v58, %v3781_v57  ;;  %v342_v63 = vld [vmem:[#allocation9] ss:$8 sm:$0x3]  ;;  %v4960_v29 = vld [vmem:[#allocation2 + $0x264] sm:$0xf0] }
  0xed   :  { %808 = vmatpush.bf16.msra.mxu2 %v3642_v50  ;;  %v3674_v50 = vor.u32 %v4933_v47, %v3671_v49  ;;  %v344_v0 = vperm.slane %v342_v63, 0  ;;  %v4959_v30 = vld [vmem:[#allocation2 + $0x264] sm:$0xf]  ;;  %v4978_v37 = vld [vmem:[#allocation2 + $0x2f4] sm:$0xf0] }
  0xee   :  { %822 = vmatpush.bf16.msra.mxu3 %v3706_v62  ;;  %v3786_v62 = vor.u32 %v4961_v59, %v3783_v61  ;;  %v4977_v38 = vld [vmem:[#allocation2 + $0x2f4] sm:$0xf]  ;;  %v3765_v43 = vld [vmem:[#allocation2 + $0x250] sm:$0xf]  ;;  %v4976_v51 = vld [vmem:[#allocation2 + $0x2e4] sm:$0xf0] }
  0xef   :  { %781 = vmatpush.bf16.msra.mxu0 %v3630_v55  ;;  %v3663_v55 = vld [vmem:[#allocation2 + $0x188] sm:$0xf0]  ;;  %v4957_v47 = vld [vmem:[#allocation2 + $0x254] sm:$0xf]  ;;  %v4975_v52 = vld [vmem:[#allocation2 + $0x2e4] sm:$0xf] }
  0xf0   :  { %795 = vmatpush.bf16.msra.mxu1 %v3694_v8  ;;  %v4956_v57 = vld [vmem:[#allocation2 + $0x244] sm:$0xf0]  ;;  %v4955_v59 = vld [vmem:[#allocation2 + $0x244] sm:$0xf] }
  0xf1   :  { %809 = vmatpush.bf16.msra.mxu2 %v3634_v56  ;;  %v3666_v56 = vor.u32 %v4931_v53, %v3663_v55 }
  0xf2   :  { %823 = vmatpush.bf16.msra.mxu3 %v3698_v10 }
  0xf3   :  { %782 = vmatpush.bf16.msra.mxu0 %v3622_v2 }
  0xf4   :  { %796 = vmatpush.bf16.msra.mxu1 %v3686_v20 }
  0xf5   :  { %810 = vmatpush.bf16.msra.mxu2 %v3626_v4  ;;  %v345_v4 = vperm.slane %v342_v63, 1  ;;  %v4974_v63 = vld [vmem:[#allocation2 + $0x2d4] sm:$0xf0] }
  0xf6   :  { %824 = vmatpush.bf16.msra.mxu3 %v3690_v22 }
  0xf7   :  { %783 = vmatpush.bf16.msra.mxu0 %v3614_v14 }
  0xf8   :  { %797 = vmatpush.bf16.msra.mxu1 %v3678_v32  ;;  %v3775_v32 = vld [vmem:[#allocation2 + $0x268] sm:$0xf0] }
  0xf9   :  { %811 = vmatpush.bf16.msra.mxu2 %v3618_v16  ;;  %v3778_v35 = vor.u32 %v4959_v30, %v3775_v32  ;;  %v4949_v30 = vld [vmem:[#allocation2 + $0x214] sm:$0xf]  ;;  %v3735_v32 = vld [vmem:[#allocation2 + $0x218] sm:$0xf0] }
  0xfa   :  { %825 = vmatpush.bf16.msra.mxu3 %v3682_v36  ;;  %v3845_v36 = vld [vmem:[#allocation2 + $0x2f0] sm:$0xf] }
  0xfb   :  { %784 = vmatpush.bf16.msra.mxu0 %v3606_v26  ;;  %v3846_v39 = vor.u32 %v4978_v37, %v3845_v36  ;;  %v3805_v36 = vld [vmem:[#allocation2 + $0x2a0] sm:$0xf]  ;;  %v4968_v37 = vld [vmem:[#allocation2 + $0x2a4] sm:$0xf0] }
  0xfc   :  { %798 = vmatpush.bf16.msra.mxu1 %v3670_v48  ;;  %v3767_v48 = vld [vmem:[#allocation2 + $0x258] sm:$0xf0] }
  0xfd   :  { %812 = vmatpush.bf16.msra.mxu2 %v3610_v28  ;;  %v3773_v28 = vld [vmem:[#allocation2 + $0x260] sm:$0xf]  ;;  %v3770_v49 = vor.u32 %v4957_v47, %v3767_v48  ;;  %v3727_v48 = vld [vmem:[#allocation2 + $0x208] sm:$0xf0] }
  0xfe   :  { %826 = vmatpush.bf16.msra.mxu3 %v3674_v50  ;;  %v3774_v31 = vor.u32 %v4960_v29, %v3773_v28  ;;  %v3837_v50 = vld [vmem:[#allocation2 + $0x2e0] sm:$0xf]  ;;  %v3733_v28 = vld [vmem:[#allocation2 + $0x210] sm:$0xf]  ;;  %v4950_v29 = vld [vmem:[#allocation2 + $0x214] sm:$0xf0] }
  0xff   :  { %785 = vmatpush.bf16.msra.mxu0 %v3598_v40  ;;  %v3847_v40 = vld [vmem:[#allocation2 + $0x2f8] sm:$0xf0]  ;;  %v3838_v53 = vor.u32 %v4976_v51, %v3837_v50  ;;  %v3797_v50 = vld [vmem:[#allocation2 + $0x290] sm:$0xf]  ;;  %v4966_v51 = vld [vmem:[#allocation2 + $0x294] sm:$0xf0] }
 0x100   :  { %799 = vmatpush.bf16.msra.mxu1 %v3662_v54  ;;  %v3850_v45 = vor.u32 %v4977_v38, %v3847_v40  ;;  %v3839_v54 = vld [vmem:[#allocation2 + $0x2e8] sm:$0xf0]  ;;  %v4967_v38 = vld [vmem:[#allocation2 + $0x2a4] sm:$0xf] }
 0x101   :  { %813 = vmatpush.bf16.msra.mxu2 %v3602_v44  ;;  %v4958_v44 = vld [vmem:[#allocation2 + $0x254] sm:$0xf0]  ;;  %v3842_v55 = vor.u32 %v4975_v52, %v3839_v54  ;;  %v3807_v40 = vld [vmem:[#allocation2 + $0x2a8] sm:$0xf0]  ;;  %v4965_v52 = vld [vmem:[#allocation2 + $0x294] sm:$0xf] }
 0x102   :  { %827 = vmatpush.bf16.msra.mxu3 %v3666_v56  ;;  %v3766_v46 = vor.u32 %v4958_v44, %v3765_v43  ;;  %v3757_v56 = vld [vmem:[#allocation2 + $0x240] sm:$0xf]  ;;  %v3810_v43 = vor.u32 %v4967_v38, %v3807_v40  ;;  %v3799_v54 = vld [vmem:[#allocation2 + $0x298] sm:$0xf0] }
 0x103   :  { %1064 = vmatpush.bf16.msrb.mxu0 %v3782_v60  ;;  %v3758_v58 = vor.u32 %v4956_v57, %v3757_v56  ;;  %v3759_v60 = vld [vmem:[#allocation2 + $0x248] sm:$0xf0]  ;;  %v3725_v44 = vld [vmem:[#allocation2 + $0x200] sm:$0xf]  ;;  %v4964_v57 = vld [vmem:[#allocation2 + $0x284] sm:$0xf0] }
 0x104   :  { %1078 = vmatpush.bf16.msrb.mxu1 %v3846_v39  ;;  %v3762_v61 = vor.u32 %v4955_v59, %v3759_v60  ;;  %v3806_v39 = vor.u32 %v4968_v37, %v3805_v36  ;;  %v3789_v56 = vld [vmem:[#allocation2 + $0x280] sm:$0xf]  ;;  %v5642_v59 = vld [vmem:[#allocation9 + $0x1] ss:$8 sm:$0x3] }
 0x105   :  { %1092 = vmatpush.bf16.msrb.mxu2 %v3786_v62  ;;  %v3829_v62 = vld [vmem:[#allocation2 + $0x2d0] sm:$0xf]  ;;  %v3790_v60 = vor.u32 %v4964_v57, %v3789_v56 }
 0x106   :  { %1106 = vmatpush.bf16.msrb.mxu3 %v3850_v45  ;;  %v4948_v45 = vld [vmem:[#allocation2 + $0x204] sm:$0xf0] }
 0x107   :  { %1065 = vmatpush.bf16.msrb.mxu0 %v3774_v31  ;;  %v3734_v31 = vor.u32 %v4950_v29, %v3733_v28  ;;  %v3726_v47 = vor.u32 %v4948_v45, %v3725_v44 }
 0x108   :  { %1079 = vmatpush.bf16.msrb.mxu1 %v3838_v53  ;;  %v3798_v53 = vor.u32 %v4966_v51, %v3797_v50 }
 0x109   :  { %1093 = vmatpush.bf16.msrb.mxu2 %v3778_v35  ;;  %v3738_v35 = vor.u32 %v4949_v30, %v3735_v32 }
 0x10a   :  { %1107 = vmatpush.bf16.msrb.mxu3 %v3842_v55  ;;  %v3802_v55 = vor.u32 %v4965_v52, %v3799_v54 }
 0x10b   :  { %1066 = vmatpush.bf16.msrb.mxu0 %v3766_v46  ;;  %v4947_v46 = vld [vmem:[#allocation2 + $0x204] sm:$0xf] }
 0x10d   :  { %1094 = vmatpush.bf16.msrb.mxu2 %v3770_v49  ;;  %v3730_v49 = vor.u32 %v4947_v46, %v3727_v48 }
 0x10f   :  { %1067 = vmatpush.bf16.msrb.mxu0 %v3758_v58  ;;  %v4963_v58 = vld [vmem:[#allocation2 + $0x284] sm:$0xf] }
 0x111   :  { %1095 = vmatpush.bf16.msrb.mxu2 %v3762_v61  ;;  %v3791_v61 = vld [vmem:[#allocation2 + $0x288] sm:$0xf0] }
 0x15f   :  { %v517_v1 = vpop.f32.mrf.mxu0 }
 0x160   :  { %v531_v2 = vpop.f32.mrf.mxu1  ;;  %v518_v3 = vadd.f32 %v517_v1, %v344_v0  ;;  %v3830_v1 = vor.u32 %v4974_v63, %v3829_v62  ;;  %v3794_v62 = vor.u32 %v4963_v58, %v3791_v61  ;;  %v614_v63 = vperm.slane %v5642_v59, 0 }
 0x162   :  { %v532_v5 = vadd.f32 %v531_v2, %v518_v3  ;;  %v3831_v2 = vld [vmem:[#allocation2 + $0x2d8] sm:$0xf0]  ;;  %1080 = vmatpush.bf16.msrb.mxu1 %v3830_v1  ;;  %v3909_v1 = vld [vmem:[#allocation2 + $0x370] sm:$0xf] }
 0x164   :  { %v568_v12 = vmul.f32 0.01, %v532_v5  ;;  %vm564_vm2 = vcmp.gt.f32.partialorder %v532_v5, 0.0 }
 0x166   :  { %v572_v17 = vsel %vm564_vm2, %v532_v5, %v568_v12  ;;  %v4954_v5 = vld [vmem:[#allocation2 + $0x234] sm:$0xf0]  ;;  %v4971_v12 = vld [vmem:[#allocation2 + $0x2c4] sm:$0xf] }
 0x167   :  { %v545_v6 = vpop.f32.mrf.mxu2  ;;  %v519_v8 = vpop.f32.mrf.mxu0 }
 0x168   :  { %v559_v7 = vpop.f32.mrf.mxu3  ;;  %v520_v9 = vadd.f32 %v519_v8, %v344_v0  ;;  %v546_v10 = vadd.f32 %v545_v6, %v345_v4  ;;  %v533_v11 = vpop.f32.mrf.mxu1  ;;  %v4973_v0 = vld [vmem:[#allocation2 + $0x2d4] sm:$0xf]  ;;  %v3751_v8 = vld [vmem:[#allocation2 + $0x238] sm:$0xf0] }
 0x169   :  { %v3834_v3 = vor.u32 %v4973_v0, %v3831_v2  ;;  %v4953_v6 = vld [vmem:[#allocation2 + $0x234] sm:$0xf]  ;;  %v4994_v2 = vld [vmem:[#allocation2 + $0x374] sm:$0xf0] }
 0x16a   :  { %v534_v13 = vadd.f32 %v533_v11, %v520_v9  ;;  %v560_v15 = vadd.f32 %v559_v7, %v546_v10  ;;  %v3754_v9 = vor.u32 %v4953_v6, %v3751_v8  ;;  %v3821_v10 = vld [vmem:[#allocation2 + $0x2c0] sm:$0xf]  ;;  %v4972_v11 = vld [vmem:[#allocation2 + $0x2c4] sm:$0xf0] }
 0x16b   :  { %1108 = vmatpush.bf16.msrb.mxu3 %v3834_v3  ;;  %v4993_v3 = vld [vmem:[#allocation2 + $0x374] sm:$0xf]  ;;  %v3901_v6 = vld [vmem:[#allocation2 + $0x360] sm:$0xf] }
 0x16c   :  { %vm566_vm3 = vcmp.gt.f32.partialorder %v534_v13, 0.0  ;;  %v570_v14 = vmul.f32 0.01, %v534_v13  ;;  %v569_v22 = vmul.f32 0.01, %v560_v15  ;;  %vm565_vm4 = vcmp.gt.f32.partialorder %v560_v15, 0.0  ;;  %1096 = vmatpush.bf16.msrb.mxu2 %v3754_v9 }
 0x16d   :  { %v4991_v9 = vld [vmem:[#allocation2 + $0x364] sm:$0xf] }
 0x16e   :  { %v574_v18 = vsel %vm566_vm3, %v534_v13, %v570_v14  ;;  %v573_v25 = vsel %vm565_vm4, %v560_v15, %v569_v22  ;;  %v3822_v13 = vor.u32 %v4972_v11, %v3821_v10  ;;  %v3823_v14 = vld [vmem:[#allocation2 + $0x2c8] sm:$0xf0]  ;;  %v3813_v22 = vld [vmem:[#allocation2 + $0x2b0] sm:$0xf] }
 0x16f   :  { %v547_v16 = vpop.f32.mrf.mxu2  ;;  %v576_v20 = vpack.c.bf16 %v574_v18, %v572_v17  ;;  %v3826_v15 = vor.u32 %v4971_v12, %v3823_v14  ;;  %v4952_v17 = vld [vmem:[#allocation2 + $0x224] sm:$0xf0]  ;;  %v4951_v18 = vld [vmem:[#allocation2 + $0x224] sm:$0xf]  ;;  %v3903_v10 = vld [vmem:[#allocation2 + $0x368] sm:$0xf0] }
 0x170   :  { %v548_v19 = vadd.f32 %v547_v16, %v345_v4  ;;  %v561_v21 = vpop.f32.mrf.mxu3  ;;  %v3749_v4 = vld [vmem:[#allocation2 + $0x230] sm:$0xf]  ;;  %v3741_v16 = vld [vmem:[#allocation2 + $0x220] sm:$0xf]  ;;  %1081 = vmatpush.bf16.msrb.mxu1 %v3822_v13  ;;  %v5010_v13 = vld [vmem:[#allocation2 + $0x3f4] sm:$0xf0] }
 0x171   :  { %786 = vmatmul.bf16.vlgmr.msra.gmra.mxu0 %v576_v20  ;;  %814 = vmatmul.bf16.vlgmr.msra.gmra.mxu2 %v576_v20  ;;  %v3750_v7 = vor.u32 %v4954_v5, %v3749_v4  ;;  %v3743_v20 = vld [vmem:[#allocation2 + $0x228] sm:$0xf0]  ;;  %v3910_v4 = vor.u32 %v4994_v2, %v3909_v1  ;;  %v3911_v5 = vld [vmem:[#allocation2 + $0x378] sm:$0xf0]  ;;  %v3973_v11 = vld [vmem:[#allocation2 + $0x3f0] sm:$0xf] }
 0x172   :  { %v562_v23 = vadd.f32 %v561_v21, %v548_v19  ;;  %v3742_v19 = vor.u32 %v4952_v17, %v3741_v16  ;;  %1109 = vmatpush.bf16.msrb.mxu3 %v3826_v15  ;;  %v3746_v21 = vor.u32 %v4951_v18, %v3743_v20  ;;  %v3914_v8 = vor.u32 %v4993_v3, %v3911_v5  ;;  %v5009_v14 = vld [vmem:[#allocation2 + $0x3f4] sm:$0xf]  ;;  %v3975_v15 = vld [vmem:[#allocation2 + $0x3f8] sm:$0xf0]  ;;  %v3893_v20 = vld [vmem:[#allocation2 + $0x350] sm:$0xf] }
 0x173   :  { %1068 = vmatpush.bf16.msrb.mxu0 %v3750_v7  ;;  %v4992_v7 = vld [vmem:[#allocation2 + $0x364] sm:$0xf0]  ;;  %v3906_v17 = vor.u32 %v4991_v9, %v3903_v10  ;;  %v3974_v18 = vor.u32 %v5010_v13, %v3973_v11  ;;  %v5007_v1 = vld [vmem:[#allocation2 + $0x3e4] sm:$0xf]  ;;  %v3967_v3 = vld [vmem:[#allocation2 + $0x3e8] sm:$0xf0] }
 0x174   :  { %vm567_vm5 = vcmp.gt.f32.partialorder %v562_v23, 0.0  ;;  %v571_v24 = vmul.f32 0.01, %v562_v23  ;;  %1097 = vmatpush.bf16.msrb.mxu2 %v3746_v21  ;;  %v3902_v12 = vor.u32 %v4992_v7, %v3901_v6  ;;  %v4990_v21 = vld [vmem:[#allocation2 + $0x354] sm:$0xf0] }
 0x175   :  { %v3894_v28 = vor.u32 %v4990_v21, %v3893_v20  ;;  %v3885_v5 = vld [vmem:[#allocation2 + $0x340] sm:$0xf]  ;;  %v4988_v6 = vld [vmem:[#allocation2 + $0x344] sm:$0xf0]  ;;  %v4987_v7 = vld [vmem:[#allocation2 + $0x344] sm:$0xf] }
 0x176   :  { %v575_v26 = vsel %vm567_vm5, %v562_v23, %v571_v24  ;;  %v4970_v23 = vld [vmem:[#allocation2 + $0x2b4] sm:$0xf0]  ;;  %v4969_v24 = vld [vmem:[#allocation2 + $0x2b4] sm:$0xf]  ;;  %v3887_v9 = vld [vmem:[#allocation2 + $0x348] sm:$0xf0] }
 0x177   :  { %v577_v27 = vpack.c.bf16 %v575_v26, %v573_v25  ;;  %1069 = vmatpush.bf16.msrb.mxu0 %v3742_v19  ;;  %v3814_v25 = vor.u32 %v4970_v23, %v3813_v22  ;;  %v3815_v26 = vld [vmem:[#allocation2 + $0x2b8] sm:$0xf0]  ;;  %v3978_v19 = vor.u32 %v5009_v14, %v3975_v15  ;;  %v3957_v10 = vld [vmem:[#allocation2 + $0x3d0] sm:$0xf]  ;;  %v5006_v11 = vld [vmem:[#allocation2 + $0x3d4] sm:$0xf0] }
 0x178   :  { %1098 = vmatpush.bf16.msrb.mxu2 %v3738_v35  ;;  %v3958_v13 = vor.u32 %v5006_v11, %v3957_v10  ;;  %v5005_v14 = vld [vmem:[#allocation2 + $0x3d4] sm:$0xf]  ;;  %v3959_v15 = vld [vmem:[#allocation2 + $0x3d8] sm:$0xf0]  ;;  %v3919_v11 = vld [vmem:[#allocation2 + $0x388] sm:$0xf0] }
 0x179   :  { %800 = vmatmul.bf16.vlgmr.msra.gmra.mxu1 %v577_v27  ;;  %828 = vmatmul.bf16.vlgmr.msra.gmra.mxu3 %v577_v27  ;;  %v3818_v27 = vor.u32 %v4969_v24, %v3815_v26  ;;  %v4989_v24 = vld [vmem:[#allocation2 + $0x354] sm:$0xf]  ;;  %v3879_v21 = vld [vmem:[#allocation2 + $0x338] sm:$0xf0] }
 0x17a   :  { %1082 = vmatpush.bf16.msrb.mxu1 %v3814_v25  ;;  %v3895_v25 = vld [vmem:[#allocation2 + $0x358] sm:$0xf0] }
 0x17b   :  { %1110 = vmatpush.bf16.msrb.mxu3 %v3818_v27  ;;  %1070 = vmatpush.bf16.msrb.mxu0 %v3734_v31  ;;  %v615_v27 = vperm.slane %v5642_v59, 1  ;;  %v3898_v30 = vor.u32 %v4989_v24, %v3895_v25  ;;  %v5004_v24 = vld [vmem:[#allocation2 + $0x3c4] sm:$0xf0]  ;;  %v5003_v25 = vld [vmem:[#allocation2 + $0x3c4] sm:$0xf] }
 0x17c   :  { %1099 = vmatpush.bf16.msrb.mxu2 %v3730_v49 }
 0x17e   :  { %1083 = vmatpush.bf16.msrb.mxu1 %v3806_v39 }
 0x17f   :  { %1111 = vmatpush.bf16.msrb.mxu3 %v3810_v43  ;;  %1071 = vmatpush.bf16.msrb.mxu0 %v3726_v47 }
 0x180   :  { %1362 = vmatpush.bf16.msra.mxu2 %v3914_v8  ;;  %v3886_v8 = vor.u32 %v4988_v6, %v3885_v5  ;;  %v3927_v5 = vld [vmem:[#allocation2 + $0x398] sm:$0xf0] }
 0x182   :  { %1084 = vmatpush.bf16.msrb.mxu1 %v3798_v53 }
 0x183   :  { %1112 = vmatpush.bf16.msrb.mxu3 %v3802_v55  ;;  %1334 = vmatpush.bf16.msra.mxu0 %v3910_v4  ;;  %v3970_v4 = vor.u32 %v5007_v1, %v3967_v3  ;;  %v3925_v1 = vld [vmem:[#allocation2 + $0x390] sm:$0xf]  ;;  %v4997_v3 = vld [vmem:[#allocation2 + $0x394] sm:$0xf] }
 0x184   :  { %1363 = vmatpush.bf16.msra.mxu2 %v3906_v17  ;;  %v3877_v17 = vld [vmem:[#allocation2 + $0x330] sm:$0xf]  ;;  %v3930_v6 = vor.u32 %v4997_v3, %v3927_v5  ;;  %v5021_v5 = vld [vmem:[#allocation2 + $0x454] sm:$0xf] }
 0x186   :  { %1085 = vmatpush.bf16.msrb.mxu1 %v3790_v60 }
 0x187   :  { %1113 = vmatpush.bf16.msrb.mxu3 %v3794_v62  ;;  %1335 = vmatpush.bf16.msra.mxu0 %v3902_v12  ;;  %v3890_v12 = vor.u32 %v4987_v7, %v3887_v9  ;;  %v3917_v7 = vld [vmem:[#allocation2 + $0x380] sm:$0xf]  ;;  %v4995_v9 = vld [vmem:[#allocation2 + $0x384] sm:$0xf] }
 0x188   :  { %1364 = vmatpush.bf16.msra.mxu2 %v3898_v30  ;;  %v4984_v30 = vld [vmem:[#allocation2 + $0x324] sm:$0xf0] }
 0x18a   :  { %1348 = vmatpush.bf16.msra.mxu1 %v3974_v18  ;;  %v4986_v18 = vld [vmem:[#allocation2 + $0x334] sm:$0xf0] }
 0x18b   :  { %1376 = vmatpush.bf16.msra.mxu3 %v3978_v19  ;;  %1336 = vmatpush.bf16.msra.mxu0 %v3894_v28  ;;  %v4985_v19 = vld [vmem:[#allocation2 + $0x334] sm:$0xf]  ;;  %v3878_v20 = vor.u32 %v4986_v18, %v3877_v17  ;;  %v4039_v17 = vld [vmem:[#allocation2 + $0x478] sm:$0xf0] }
 0x18c   :  { %1365 = vmatpush.bf16.msra.mxu2 %v3890_v12  ;;  %v3922_v12 = vor.u32 %v4995_v9, %v3919_v11  ;;  %v5040_v9 = vld [vmem:[#allocation2 + $0x4e4] sm:$0xf0] }
 0x18f   :  { %1377 = vmatpush.bf16.msra.mxu3 %v3970_v4  ;;  %1337 = vmatpush.bf16.msra.mxu0 %v3886_v8  ;;  %v4996_v8 = vld [vmem:[#allocation2 + $0x384] sm:$0xf0] }
 0x190   :  { %v3918_v10 = vor.u32 %v4996_v8, %v3917_v7  ;;  %v4093_v8 = vld [vmem:[#allocation2 + $0x4e0] sm:$0xf] }
 0x191   :  { %v4094_v11 = vor.u32 %v5040_v9, %v4093_v8  ;;  %v3983_v8 = vld [vmem:[#allocation2 + $0x408] sm:$0xf0] }
 0x193   :  { %1338 = vmatpush.bf16.msra.mxu0 %v3878_v20  ;;  %v898_v20 = vld [vmem:[#allocation9 + $0x2] ss:$8 sm:$0x3] }
 0x1ee   :  { %v787_v0 = vpop.f32.mrf.mxu0 }
 0x1ef   :  { %v788_v16 = vadd.f32 %v787_v0, %v614_v63  ;;  %v5008_v0 = vld [vmem:[#allocation2 + $0x3e4] sm:$0xf0] }
 0x1f4   :  { %v815_v23 = vpop.f32.mrf.mxu2 }
 0x1f5   :  { %v816_v32 = vadd.f32 %v815_v23, %v615_v27  ;;  %v3949_v23 = vld [vmem:[#allocation2 + $0x3c0] sm:$0xf] }
 0x1f6   :  { %v801_v22 = vpop.f32.mrf.mxu1  ;;  %v789_v31 = vpop.f32.mrf.mxu0 }
 0x1f7   :  { %v802_v26 = vadd.f32 %v801_v22, %v788_v16  ;;  %v790_v37 = vadd.f32 %v789_v31, %v614_v63  ;;  %v3962_v16 = vor.u32 %v5005_v14, %v3959_v15  ;;  %v3882_v22 = vor.u32 %v4985_v19, %v3879_v21  ;;  %v4983_v31 = vld [vmem:[#allocation2 + $0x324] sm:$0xf]  ;;  %v5026_v14 = vld [vmem:[#allocation2 + $0x474] sm:$0xf0]  ;;  %v5025_v15 = vld [vmem:[#allocation2 + $0x474] sm:$0xf] }
 0x1f8   :  { %v4042_v18 = vor.u32 %v5025_v15, %v4039_v17  ;;  %v900_v21 = vperm.slane %v898_v20, 0  ;;  %v5020_v15 = vld [vmem:[#allocation2 + $0x444] sm:$0xf0]  ;;  %v5019_v17 = vld [vmem:[#allocation2 + $0x444] sm:$0xf] }
 0x1f9   :  { %v838_v29 = vmul.f32 0.01, %v802_v26  ;;  %vm834_vm6 = vcmp.gt.f32.partialorder %v802_v26, 0.0  ;;  %1378 = vmatpush.bf16.msra.mxu3 %v3962_v16  ;;  %1366 = vmatpush.bf16.msra.mxu2 %v3882_v22 }
 0x1fb   :  { %v842_v36 = vsel %vm834_vm6, %v802_v26, %v838_v29  ;;  %v3950_v26 = vor.u32 %v5004_v24, %v3949_v23  ;;  %v3869_v29 = vld [vmem:[#allocation2 + $0x320] sm:$0xf] }
 0x1fc   :  { %v829_v35 = vpop.f32.mrf.mxu3  ;;  %v846_v44 = vadd.f32 %v842_v36, %v5630_v33  ;;  %v817_v45 = vpop.f32.mrf.mxu2 }
 0x1fd   :  { %v830_v38 = vadd.f32 %v829_v35, %v816_v32  ;;  %v818_v49 = vadd.f32 %v817_v45, %v615_v27  ;;  %v3951_v27 = vld [vmem:[#allocation2 + $0x3c8] sm:$0xf0]  ;;  %v3870_v32 = vor.u32 %v4984_v30, %v3869_v29  ;;  %v3861_v45 = vld [vmem:[#allocation2 + $0x310] sm:$0xf] }
 0x1fe   :  { %v803_v39 = vpop.f32.mrf.mxu1  ;;  %v854_v50 = vmul.f32 0.01, %v846_v44  ;;  %vm850_vm9 = vcmp.gt.f32.partialorder %v846_v44, 0.0  ;;  %v3954_v28 = vor.u32 %v5003_v25, %v3951_v27  ;;  %v3871_v35 = vld [vmem:[#allocation2 + $0x328] sm:$0xf0]  ;;  %v901_v27 = vperm.slane %v898_v20, 1 }
 0x1ff   :  { %v839_v40 = vmul.f32 0.01, %v830_v38  ;;  %v804_v43 = vadd.f32 %v803_v39, %v790_v37  ;;  %vm835_vm7 = vcmp.gt.f32.partialorder %v830_v38, 0.0  ;;  %v3874_v36 = vor.u32 %v4983_v31, %v3871_v35  ;;  %v3941_v37 = vld [vmem:[#allocation2 + $0x3b0] sm:$0xf]  ;;  %1339 = vmatpush.bf16.msra.mxu0 %v3870_v32 }
 0x200   :  { %v5649_v33 = vsel %vm850_vm9, %v846_v44, %v854_v50  ;;  %1379 = vmatpush.bf16.msra.mxu3 %v3954_v28  ;;  %v5001_v39 = vld [vmem:[#allocation2 + $0x3b4] sm:$0xf]  ;;  %v4085_v20 = vld [vmem:[#allocation2 + $0x4d0] sm:$0xf] }
 0x201   :  { %vm836_vm8 = vcmp.gt.f32.partialorder %v804_v43, 0.0  ;;  %v840_v46 = vmul.f32 0.01, %v804_v43  ;;  %v843_v47 = vsel %vm835_vm7, %v830_v38, %v839_v40  ;;  %v5002_v38 = vld [vmem:[#allocation2 + $0x3b4] sm:$0xf0]  ;;  %1367 = vmatpush.bf16.msra.mxu2 %v3874_v36 }
 0x202   :  { %v847_v54 = vadd.f32 %v843_v47, %v5632_v34  ;;  %v3942_v40 = vor.u32 %v5002_v38, %v3941_v37  ;;  %v4981_v47 = vld [vmem:[#allocation2 + $0x314] sm:$0xf] }
 0x203   :  { %v844_v48 = vsel %vm836_vm8, %v804_v43, %v840_v46  ;;  %v3943_v43 = vld [vmem:[#allocation2 + $0x3b8] sm:$0xf0]  ;;  %v4982_v46 = vld [vmem:[#allocation2 + $0x314] sm:$0xf0] }
 0x204   :  { %v848_v51 = vadd.f32 %v844_v48, %v5634_v41  ;;  %v831_v52 = vpop.f32.mrf.mxu3  ;;  %v855_v60 = vmul.f32 0.01, %v847_v54  ;;  %vm851_vm12 = vcmp.gt.f32.partialorder %v847_v54, 0.0  ;;  %v3946_v44 = vor.u32 %v5001_v39, %v3943_v43 }
 0x205   :  { %v832_v53 = vadd.f32 %v831_v52, %v818_v49  ;;  %v3862_v48 = vor.u32 %v4982_v46, %v3861_v45  ;;  %v3863_v49 = vld [vmem:[#allocation2 + $0x318] sm:$0xf0]  ;;  %v5000_v52 = vld [vmem:[#allocation2 + $0x3a4] sm:$0xf0] }
 0x206   :  { %vm852_vm10 = vcmp.gt.f32.partialorder %v848_v51, 0.0  ;;  %v856_v55 = vmul.f32 0.01, %v848_v51  ;;  %v5660_v61 = vsel %vm851_vm12, %v847_v54, %v855_v60  ;;  %1380 = vmatpush.bf16.msra.mxu3 %v3946_v44  ;;  %v3866_v50 = vor.u32 %v4981_v47, %v3863_v49  ;;  %v4980_v60 = vld [vmem:[#allocation2 + $0x304] sm:$0xf0] }
 0x207   :  { %vm837_vm11 = vcmp.gt.f32.partialorder %v832_v53, 0.0  ;;  %v841_v56 = vmul.f32 0.01, %v832_v53  ;;  %1340 = vmatpush.bf16.msra.mxu0 %v3862_v48 }
 0x208   :  { %v5651_v57 = vsel %vm852_vm10, %v848_v51, %v856_v55  ;;  %v3933_v51 = vld [vmem:[#allocation2 + $0x3a0] sm:$0xf]  ;;  %v3935_v55 = vld [vmem:[#allocation2 + $0x3a8] sm:$0xf0]  ;;  %1368 = vmatpush.bf16.msra.mxu2 %v3866_v50 }
 0x209   :  { %v845_v58 = vsel %vm837_vm11, %v832_v53, %v841_v56  ;;  %v5655_v59 = vpack.c.bf16 %v5651_v57, %v5649_v33  ;;  %v4999_v53 = vld [vmem:[#allocation2 + $0x3a4] sm:$0xf]  ;;  %v3934_v54 = vor.u32 %v5000_v52, %v3933_v51  ;;  %v4029_v52 = vld [vmem:[#allocation2 + $0x460] sm:$0xf] }
 0x20a   :  { %v849_v41 = vadd.f32 %v845_v58, %v5636_v42  ;;  %v3965_v42 = vld [vmem:[#allocation2 + $0x3e0] sm:$0xf]  ;;  %v3938_v56 = vor.u32 %v4999_v53, %v3935_v55  ;;  %v5024_v53 = vld [vmem:[#allocation2 + $0x464] sm:$0xf0] }
 0x20b   :  { %1072 = vmatmul.bf16.vlgmr.msrb.gmra.mxu0 %v5655_v59  ;;  %1100 = vmatmul.bf16.vlgmr.msrb.gmra.mxu2 %v5655_v59  ;;  %v3966_v2 = vor.u32 %v5008_v0, %v3965_v42  ;;  %v3853_v58 = vld [vmem:[#allocation2 + $0x300] sm:$0xf]  ;;  %v3855_v42 = vld [vmem:[#allocation2 + $0x308] sm:$0xf0]  ;;  %v4030_v55 = vor.u32 %v5024_v53, %v4029_v52  ;;  %v4071_v52 = vld [vmem:[#allocation2 + $0x4b8] sm:$0xf0] }
 0x20c   :  { %vm853_vm13 = vcmp.gt.f32.partialorder %v849_v41, 0.0  ;;  %v857_v34 = vmul.f32 0.01, %v849_v41  ;;  %1381 = vmatpush.bf16.msra.mxu3 %v3938_v56  ;;  %v4031_v56 = vld [vmem:[#allocation2 + $0x468] sm:$0xf0] }
 0x20d   :  { %1349 = vmatpush.bf16.msra.mxu1 %v3966_v2  ;;  %v4998_v2 = vld [vmem:[#allocation2 + $0x394] sm:$0xf0] }
 0x20e   :  { %v5662_v62 = vsel %vm853_vm13, %v849_v41, %v857_v34  ;;  %v4979_v41 = vld [vmem:[#allocation2 + $0x304] sm:$0xf]  ;;  %v3854_v34 = vor.u32 %v4980_v60, %v3853_v58  ;;  %v3926_v4 = vor.u32 %v4998_v2, %v3925_v1  ;;  %v4101_v60 = vld [vmem:[#allocation2 + $0x4f0] sm:$0xf]  ;;  %v5022_v2 = vld [vmem:[#allocation2 + $0x454] sm:$0xf0] }
 0x20f   :  { %v5666_v63 = vpack.c.bf16 %v5662_v62, %v5660_v61  ;;  %v3858_v0 = vor.u32 %v4979_v41, %v3855_v42  ;;  %v5042_v41 = vld [vmem:[#allocation2 + $0x4f4] sm:$0xf0]  ;;  %v4021_v1 = vld [vmem:[#allocation2 + $0x450] sm:$0xf] }
 0x210   :  { %1341 = vmatpush.bf16.msra.mxu0 %v3854_v34  ;;  %1382 = vmatpush.bf16.msra.mxu3 %v3930_v6  ;;  %v5041_v34 = vld [vmem:[#allocation2 + $0x4f4] sm:$0xf]  ;;  %v4102_v42 = vor.u32 %v5042_v41, %v4101_v60  ;;  %v4023_v6 = vld [vmem:[#allocation2 + $0x458] sm:$0xf0] }
 0x211   :  { %1086 = vmatmul.bf16.vlgmr.msrb.gmra.mxu1 %v5666_v63  ;;  %1114 = vmatmul.bf16.vlgmr.msrb.gmra.mxu3 %v5666_v63  ;;  %v4026_v7 = vor.u32 %v5021_v5, %v4023_v6  ;;  %v3991_v60 = vld [vmem:[#allocation2 + $0x418] sm:$0xf0]  ;;  %v5012_v5 = vld [vmem:[#allocation2 + $0x404] sm:$0xf0]  ;;  %v5011_v6 = vld [vmem:[#allocation2 + $0x404] sm:$0xf] }
 0x212   :  { %1350 = vmatpush.bf16.msra.mxu1 %v3958_v13  ;;  %1369 = vmatpush.bf16.msra.mxu2 %v3858_v0  ;;  %v4037_v13 = vld [vmem:[#allocation2 + $0x470] sm:$0xf]  ;;  %v4103_v0 = vld [vmem:[#allocation2 + $0x4f8] sm:$0xf0]  ;;  %v3986_v9 = vor.u32 %v5011_v6, %v3983_v8 }
 0x213   :  { %v4038_v16 = vor.u32 %v5026_v14, %v4037_v13  ;;  %v4106_v3 = vor.u32 %v5041_v34, %v4103_v0  ;;  %v4013_v14 = vld [vmem:[#allocation2 + $0x440] sm:$0xf]  ;;  %v5031_v0 = vld [vmem:[#allocation2 + $0x4a4] sm:$0xf] }
 0x214   :  { %1383 = vmatpush.bf16.msra.mxu3 %v3922_v12  ;;  %v4095_v12 = vld [vmem:[#allocation2 + $0x4e8] sm:$0xf0]  ;;  %v4061_v34 = vld [vmem:[#allocation2 + $0x4a0] sm:$0xf] }
 0x215   :  { %1620 = vmatpush.bf16.msrb.mxu0 %v4038_v16  ;;  %v4014_v16 = vor.u32 %v5020_v15, %v4013_v14  ;;  %v4055_v14 = vld [vmem:[#allocation2 + $0x498] sm:$0xf0] }
 0x216   :  { %1351 = vmatpush.bf16.msra.mxu1 %v3950_v26  ;;  %1648 = vmatpush.bf16.msrb.mxu2 %v4042_v18  ;;  %v4015_v18 = vld [vmem:[#allocation2 + $0x448] sm:$0xf0] }
 0x218   :  { %1662 = vmatpush.bf16.msrb.mxu3 %v4106_v3 }
 0x219   :  { %1621 = vmatpush.bf16.msrb.mxu0 %v4030_v55  ;;  %v5014_v55 = vld [vmem:[#allocation2 + $0x414] sm:$0xf0] }
 0x21a   :  { %1352 = vmatpush.bf16.msra.mxu1 %v3942_v40 }
 0x21e   :  { %1353 = vmatpush.bf16.msra.mxu1 %v3934_v54  ;;  %v5023_v54 = vld [vmem:[#allocation2 + $0x464] sm:$0xf] }
 0x21f   :  { %v4034_v58 = vor.u32 %v5023_v54, %v4031_v56  ;;  %v3989_v54 = vld [vmem:[#allocation2 + $0x410] sm:$0xf]  ;;  %v5013_v56 = vld [vmem:[#allocation2 + $0x414] sm:$0xf] }
 0x220   :  { %v3994_v41 = vor.u32 %v5013_v56, %v3991_v60 }
 0x221   :  { %1649 = vmatpush.bf16.msrb.mxu2 %v4034_v58  ;;  %v3990_v58 = vor.u32 %v5014_v55, %v3989_v54 }
 0x222   :  { %1354 = vmatpush.bf16.msra.mxu1 %v3926_v4  ;;  %v4022_v4 = vor.u32 %v5022_v2, %v4021_v1  ;;  %v4063_v2 = vld [vmem:[#allocation2 + $0x4a8] sm:$0xf0] }
 0x223   :  { %v4066_v3 = vor.u32 %v5031_v0, %v4063_v2 }
 0x224   :  { %1622 = vmatpush.bf16.msrb.mxu0 %v4022_v4  ;;  %v3981_v4 = vld [vmem:[#allocation2 + $0x400] sm:$0xf] }
 0x225   :  { %1650 = vmatpush.bf16.msrb.mxu2 %v4026_v7  ;;  %v3982_v7 = vor.u32 %v5012_v5, %v3981_v4  ;;  %v1454_v5 = vld [vmem:[#allocation9 + $0x4] ss:$8 sm:$0x3] }
 0x226   :  { %1355 = vmatpush.bf16.msra.mxu1 %v3918_v10  ;;  %v5039_v10 = vld [vmem:[#allocation2 + $0x4e4] sm:$0xf] }
 0x227   :  { %v4098_v13 = vor.u32 %v5039_v10, %v4095_v12  ;;  %v4053_v10 = vld [vmem:[#allocation2 + $0x490] sm:$0xf]  ;;  %v5029_v12 = vld [vmem:[#allocation2 + $0x494] sm:$0xf] }
 0x228   :  { %1623 = vmatpush.bf16.msrb.mxu0 %v4014_v16  ;;  %v4058_v15 = vor.u32 %v5029_v12, %v4055_v14  ;;  %v4045_v16 = vld [vmem:[#allocation2 + $0x480] sm:$0xf]  ;;  %v1457_v12 = vperm.slane %v1454_v5, 1 }
 0x229   :  { %1663 = vmatpush.bf16.msrb.mxu3 %v4098_v13 }
 0x22a   :  { %1634 = vmatpush.bf16.msrb.mxu1 %v4102_v42  ;;  %v5032_v42 = vld [vmem:[#allocation2 + $0x4a4] sm:$0xf0] }
 0x22b   :  { %v4062_v1 = vor.u32 %v5032_v42, %v4061_v34 }
 0x22e   :  { %1635 = vmatpush.bf16.msrb.mxu1 %v4094_v11  ;;  %v5030_v11 = vld [vmem:[#allocation2 + $0x494] sm:$0xf0] }
 0x22f   :  { %v4054_v13 = vor.u32 %v5030_v11, %v4053_v10 }
 0x288   :  { %v1073_v19 = vpop.f32.mrf.mxu0 }
 0x289   :  { %v1074_v24 = vadd.f32 %v1073_v19, %v900_v21  ;;  %v4018_v19 = vor.u32 %v5019_v17, %v4015_v18  ;;  %v5028_v17 = vld [vmem:[#allocation2 + $0x484] sm:$0xf0]  ;;  %v5027_v18 = vld [vmem:[#allocation2 + $0x484] sm:$0xf] }
 0x28b   :  { %1651 = vmatpush.bf16.msrb.mxu2 %v4018_v19  ;;  %v4046_v19 = vor.u32 %v5028_v17, %v4045_v16 }
 0x28e   :  { %v1087_v22 = vpop.f32.mrf.mxu1  ;;  %v1101_v23 = vpop.f32.mrf.mxu2 }
 0x28f   :  { %v1088_v26 = vadd.f32 %v1087_v22, %v1074_v24  ;;  %v1102_v32 = vadd.f32 %v1101_v23, %v901_v27  ;;  %v5037_v22 = vld [vmem:[#allocation2 + $0x4d4] sm:$0xf]  ;;  %v4087_v24 = vld [vmem:[#allocation2 + $0x4d8] sm:$0xf0] }
 0x290   :  { %v1075_v25 = vpop.f32.mrf.mxu0 }
 0x291   :  { %v1076_v29 = vadd.f32 %v1075_v25, %v900_v21  ;;  %v1124_v31 = vmul.f32 0.01, %v1088_v26  ;;  %vm1120_vm14 = vcmp.gt.f32.partialorder %v1088_v26, 0.0  ;;  %v5038_v21 = vld [vmem:[#allocation2 + $0x4d4] sm:$0xf0]  ;;  %v4090_v25 = vor.u32 %v5037_v22, %v4087_v24 }
 0x292   :  { %v4086_v23 = vor.u32 %v5038_v21, %v4085_v20  ;;  %v4047_v20 = vld [vmem:[#allocation2 + $0x488] sm:$0xf0]  ;;  %v1168_v21 = vld [vmem:[#allocation9 + $0x3] ss:$8 sm:$0x3] }
 0x293   :  { %v1128_v39 = vsel %vm1120_vm14, %v1088_v26, %v1124_v31  ;;  %v4005_v26 = vld [vmem:[#allocation2 + $0x430] sm:$0xf]  ;;  %1664 = vmatpush.bf16.msrb.mxu3 %v4090_v25  ;;  %v4050_v22 = vor.u32 %v5027_v18, %v4047_v20  ;;  %v1170_v24 = vperm.slane %v1168_v21, 0 }
 0x294   :  { %v1115_v28 = vpop.f32.mrf.mxu3  ;;  %1636 = vmatpush.bf16.msrb.mxu1 %v4086_v23 }
 0x295   :  { %v1116_v37 = vadd.f32 %v1115_v28, %v1102_v32  ;;  %v5017_v28 = vld [vmem:[#allocation2 + $0x434] sm:$0xf]  ;;  %v4077_v32 = vld [vmem:[#allocation2 + $0x4c0] sm:$0xf] }
 0x296   :  { %v1089_v30 = vpop.f32.mrf.mxu1  ;;  %v1103_v36 = vpop.f32.mrf.mxu2 }
 0x297   :  { %v1090_v35 = vadd.f32 %v1089_v30, %v1076_v29  ;;  %v1104_v43 = vadd.f32 %v1103_v36, %v901_v27  ;;  %v1125_v46 = vmul.f32 0.01, %v1116_v37  ;;  %vm1121_vm0 = vcmp.gt.f32.partialorder %v1116_v37, 0.0  ;;  %v5018_v27 = vld [vmem:[#allocation2 + $0x434] sm:$0xf0] }
 0x298   :  { %v4006_v29 = vor.u32 %v5018_v27, %v4005_v26  ;;  %v4007_v30 = vld [vmem:[#allocation2 + $0x438] sm:$0xf0]  ;;  %v5035_v36 = vld [vmem:[#allocation2 + $0x4c4] sm:$0xf] }
 0x299   :  { %vm1122_vm15 = vcmp.gt.f32.partialorder %v1090_v35, 0.0  ;;  %v1126_v38 = vmul.f32 0.01, %v1090_v35  ;;  %v1129_v49 = vsel %vm1121_vm0, %v1116_v37, %v1125_v46  ;;  %v4010_v31 = vor.u32 %v5017_v28, %v4007_v30  ;;  %v3999_v46 = vld [vmem:[#allocation2 + $0x428] sm:$0xf0] }
 0x29a   :  { %1624 = vmatpush.bf16.msrb.mxu0 %v4006_v29  ;;  %v1171_v29 = vperm.slane %v1168_v21, 1 }
 0x29b   :  { %v1130_v40 = vsel %vm1122_vm15, %v1090_v35, %v1126_v38  ;;  %v5036_v35 = vld [vmem:[#allocation2 + $0x4c4] sm:$0xf0]  ;;  %v4079_v38 = vld [vmem:[#allocation2 + $0x4c8] sm:$0xf0]  ;;  %1652 = vmatpush.bf16.msrb.mxu2 %v4010_v31 }
 0x29c   :  { %v1132_v44 = vpack.c.bf16 %v1130_v40, %v1128_v39  ;;  %v1117_v45 = vpop.f32.mrf.mxu3  ;;  %v4078_v37 = vor.u32 %v5036_v35, %v4077_v32  ;;  %v4082_v39 = vor.u32 %v5035_v36, %v4079_v38  ;;  %v3997_v40 = vld [vmem:[#allocation2 + $0x420] sm:$0xf] }
 0x29d   :  { %v1118_v47 = vadd.f32 %v1117_v45, %v1104_v43  ;;  %v5016_v43 = vld [vmem:[#allocation2 + $0x424] sm:$0xf0] }
 0x29e   :  { %1342 = vmatmul.bf16.vlgmr.msra.gmra.mxu0 %v1132_v44  ;;  %1370 = vmatmul.bf16.vlgmr.msra.gmra.mxu2 %v1132_v44  ;;  %v5015_v44 = vld [vmem:[#allocation2 + $0x424] sm:$0xf]  ;;  %v3998_v45 = vor.u32 %v5016_v43, %v3997_v40 }
 0x29f   :  { %vm1123_vm1 = vcmp.gt.f32.partialorder %v1118_v47, 0.0  ;;  %v1127_v48 = vmul.f32 0.01, %v1118_v47  ;;  %1637 = vmatpush.bf16.msrb.mxu1 %v4078_v37  ;;  %1665 = vmatpush.bf16.msrb.mxu3 %v4082_v39 }
 0x2a0   :  { %1625 = vmatpush.bf16.msrb.mxu0 %v3998_v45 }
 0x2a1   :  { %v1131_v50 = vsel %vm1123_vm1, %v1118_v47, %v1127_v48  ;;  %v4002_v47 = vor.u32 %v5015_v44, %v3999_v46  ;;  %v4069_v48 = vld [vmem:[#allocation2 + $0x4b0] sm:$0xf] }
 0x2a2   :  { %v1133_v51 = vpack.c.bf16 %v1131_v50, %v1129_v49  ;;  %v5034_v49 = vld [vmem:[#allocation2 + $0x4b4] sm:$0xf0]  ;;  %v5033_v50 = vld [vmem:[#allocation2 + $0x4b4] sm:$0xf] }
 0x2a3   :  { %1653 = vmatpush.bf16.msrb.mxu2 %v4002_v47  ;;  %v4074_v53 = vor.u32 %v5033_v50, %v4071_v52 }
 0x2a4   :  { %1356 = vmatmul.bf16.vlgmr.msra.gmra.mxu1 %v1133_v51  ;;  %1384 = vmatmul.bf16.vlgmr.msra.gmra.mxu3 %v1133_v51  ;;  %v4070_v51 = vor.u32 %v5034_v49, %v4069_v48 }
 0x2a5   :  { %1666 = vmatpush.bf16.msrb.mxu3 %v4074_v53  ;;  %1626 = vmatpush.bf16.msrb.mxu0 %v3990_v58 }
 0x2a6   :  { %1638 = vmatpush.bf16.msrb.mxu1 %v4070_v51 }
 0x2a7   :  { %1654 = vmatpush.bf16.msrb.mxu2 %v3994_v41 }
 0x2a9   :  { %1667 = vmatpush.bf16.msrb.mxu3 %v4066_v3  ;;  %1627 = vmatpush.bf16.msrb.mxu0 %v3982_v7  ;;  %v1456_v7 = vperm.slane %v1454_v5, 0 }
 0x2aa   :  { %1639 = vmatpush.bf16.msrb.mxu1 %v4062_v1 }
 0x2ab   :  { %1655 = vmatpush.bf16.msrb.mxu2 %v3986_v9 }
 0x2ad   :  { %1668 = vmatpush.bf16.msrb.mxu3 %v4058_v15 }
 0x2ae   :  { %1640 = vmatpush.bf16.msrb.mxu1 %v4054_v13 }
 0x2b1   :  { %1669 = vmatpush.bf16.msrb.mxu3 %v4050_v22 }
 0x2b2   :  { %1641 = vmatpush.bf16.msrb.mxu1 %v4046_v19 }
 0x31b   :  { %v1343_v23 = vpop.f32.mrf.mxu0 }
 0x31c   :  { %v1344_v25 = vadd.f32 %v1343_v23, %v1170_v24 }
 0x321   :  { %v1357_v26 = vpop.f32.mrf.mxu1  ;;  %v1371_v27 = vpop.f32.mrf.mxu2 }
 0x322   :  { %v1358_v28 = vadd.f32 %v1357_v26, %v1344_v25  ;;  %v1372_v32 = vadd.f32 %v1371_v27, %v1171_v29 }
 0x323   :  { %v1345_v31 = vpop.f32.mrf.mxu0 }
 0x324   :  { %v1394_v30 = vmul.f32 0.01, %v1358_v28  ;;  %vm1390_vm2 = vcmp.gt.f32.partialorder %v1358_v28, 0.0  ;;  %v1346_v37 = vadd.f32 %v1345_v31, %v1170_v24 }
 0x326   :  { %v1398_v36 = vsel %vm1390_vm2, %v1358_v28, %v1394_v30 }
 0x327   :  { %v1385_v35 = vpop.f32.mrf.mxu3  ;;  %v1402_v44 = vadd.f32 %v1398_v36, %v5649_v33 }
 0x328   :  { %v1386_v38 = vadd.f32 %v1385_v35, %v1372_v32 }
 0x329   :  { %v1359_v39 = vpop.f32.mrf.mxu1  ;;  %v1373_v45 = vpop.f32.mrf.mxu2  ;;  %v1410_v50 = vmul.f32 0.01, %v1402_v44  ;;  %vm1406_vm5 = vcmp.gt.f32.partialorder %v1402_v44, 0.0 }
 0x32a   :  { %v1395_v40 = vmul.f32 0.01, %v1386_v38  ;;  %v1360_v43 = vadd.f32 %v1359_v39, %v1346_v37  ;;  %vm1391_vm3 = vcmp.gt.f32.partialorder %v1386_v38, 0.0  ;;  %v1374_v49 = vadd.f32 %v1373_v45, %v1171_v29 }
 0x32b   :  { %v5673_v58 = vsel %vm1406_vm5, %v1402_v44, %v1410_v50 }
 0x32c   :  { %vm1392_vm4 = vcmp.gt.f32.partialorder %v1360_v43, 0.0  ;;  %v1396_v46 = vmul.f32 0.01, %v1360_v43  ;;  %v1399_v47 = vsel %vm1391_vm3, %v1386_v38, %v1395_v40 }
 0x32d   :  { %v1403_v54 = vadd.f32 %v1399_v47, %v5660_v61 }
 0x32e   :  { %v1400_v48 = vsel %vm1392_vm4, %v1360_v43, %v1396_v46 }
 0x32f   :  { %v1404_v51 = vadd.f32 %v1400_v48, %v5651_v57  ;;  %v1387_v52 = vpop.f32.mrf.mxu3  ;;  %v1411_v42 = vmul.f32 0.01, %v1403_v54  ;;  %vm1407_vm8 = vcmp.gt.f32.partialorder %v1403_v54, 0.0 }
 0x330   :  { %v1388_v53 = vadd.f32 %v1387_v52, %v1374_v49 }
 0x331   :  { %vm1408_vm6 = vcmp.gt.f32.partialorder %v1404_v51, 0.0  ;;  %v1412_v55 = vmul.f32 0.01, %v1404_v51  ;;  %v5680_v2 = vsel %vm1407_vm8, %v1403_v54, %v1411_v42 }
 0x332   :  { %vm1393_vm7 = vcmp.gt.f32.partialorder %v1388_v53, 0.0  ;;  %v1397_v56 = vmul.f32 0.01, %v1388_v53 }
 0x333   :  { %v5675_v60 = vsel %vm1408_vm6, %v1404_v51, %v1412_v55 }
 0x334   :  { %v1401_v41 = vsel %vm1393_vm7, %v1388_v53, %v1397_v56  ;;  %v1418_v34 = vpack.c.bf16 %v5675_v60, %v5673_v58 }
 0x335   :  { %v1405_v0 = vadd.f32 %v1401_v41, %v5662_v62 }
 0x336   :  { %1628 = vmatmul.bf16.vlgmr.msrb.gmra.mxu0 %v1418_v34  ;;  %1656 = vmatmul.bf16.vlgmr.msrb.gmra.mxu2 %v1418_v34 }
 0x337   :  { %vm1409_vm9 = vcmp.gt.f32.partialorder %v1405_v0, 0.0  ;;  %v1413_v1 = vmul.f32 0.01, %v1405_v0 }
 0x339   :  { %v5682_v3 = vsel %vm1409_vm9, %v1405_v0, %v1413_v1 }
 0x33a   :  { %v1419_v4 = vpack.c.bf16 %v5682_v3, %v5680_v2 }
 0x33c   :  { %1642 = vmatmul.bf16.vlgmr.msrb.gmra.mxu1 %v1419_v4  ;;  %1670 = vmatmul.bf16.vlgmr.msrb.gmra.mxu3 %v1419_v4 }
 0x3b3   :  { %v1629_v6 = vpop.f32.mrf.mxu0 }
 0x3b4   :  { %v1630_v8 = vadd.f32 %v1629_v6, %v1456_v7 }
 0x3b9   :  { %v1643_v9 = vpop.f32.mrf.mxu1  ;;  %v1657_v10 = vpop.f32.mrf.mxu2 }
 0x3ba   :  { %v1644_v11 = vadd.f32 %v1643_v9, %v1630_v8  ;;  %v1658_v16 = vadd.f32 %v1657_v10, %v1457_v12 }
 0x3bb   :  { %v1631_v14 = vpop.f32.mrf.mxu0 }
 0x3bc   :  { %vm1676_vm10 = vcmp.gt.f32.partialorder %v1644_v11, 0.0  ;;  %v1680_v13 = vmul.f32 0.01, %v1644_v11  ;;  %v1632_v18 = vadd.f32 %v1631_v14, %v1456_v7 }
 0x3be   :  { %v5686_v15 = vsel %vm1676_vm10, %v1644_v11, %v1680_v13 }
 0x3bf   :  { %v1671_v17 = vpop.f32.mrf.mxu3 }
 0x3c0   :  { %v1672_v19 = vadd.f32 %v1671_v17, %v1658_v16 }
 0x3c1   :  { %v1645_v20 = vpop.f32.mrf.mxu1  ;;  %v1659_v23 = vpop.f32.mrf.mxu2 }
 0x3c2   :  { %vm1677_vm11 = vcmp.gt.f32.partialorder %v1672_v19, 0.0  ;;  %v1681_v21 = vmul.f32 0.01, %v1672_v19  ;;  %v1646_v22 = vadd.f32 %v1645_v20, %v1632_v18  ;;  %v1660_v27 = vadd.f32 %v1659_v23, %v1457_v12 }
 0x3c4   :  { %v5688_v24 = vsel %vm1677_vm11, %v1672_v19, %v1681_v21  ;;  %vm1678_vm12 = vcmp.gt.f32.partialorder %v1646_v22, 0.0  ;;  %v1682_v25 = vmul.f32 0.01, %v1646_v22 }
 0x3c6   :  { %v5690_v26 = vsel %vm1678_vm12, %v1646_v22, %v1682_v25 }
 0x3c7   :  { %v1673_v28 = vpop.f32.mrf.mxu3 }
 0x3c8   :  { %v1674_v29 = vadd.f32 %v1673_v28, %v1660_v27 }
 0x3ca   :  { %vm1679_vm13 = vcmp.gt.f32.partialorder %v1674_v29, 0.0  ;;  %v1683_v30 = vmul.f32 0.01, %v1674_v29 }
 0x3cc   :  { %v5692_v31 = vsel %vm1679_vm13, %v1674_v29, %v1683_v30 }
 0x3cd   :  { %5505 = dma.done.wait [#allocation3 + $0x1], 20480 }
 0x3ce   :  { %5506 = vsyncadd [#allocation3 + $0x1], 4294946816  ;;  %v4165_v32 = vld [vmem:[#allocation2 + $0x570] sm:$0xf]  ;;  %v5058_v35 = vld [vmem:[#allocation2 + $0x574] sm:$0xf0] }
 0x3cf   :  { %v4229_v36 = vld [vmem:[#allocation2 + $0x5f0] sm:$0xf]  ;;  %v4166_v37 = vor.u32 %v5058_v35, %v4165_v32  ;;  %v5074_v38 = vld [vmem:[#allocation2 + $0x5f4] sm:$0xf0]  ;;  %v5057_v39 = vld [vmem:[#allocation2 + $0x574] sm:$0xf] }
 0x3d0   :  { %v4167_v40 = vld [vmem:[#allocation2 + $0x578] sm:$0xf0]  ;;  %v4230_v43 = vor.u32 %v5074_v38, %v4229_v36  ;;  %v5073_v45 = vld [vmem:[#allocation2 + $0x5f4] sm:$0xf]  ;;  %v4157_v47 = vld [vmem:[#allocation2 + $0x560] sm:$0xf] }
 0x3d1   :  { %v4170_v44 = vor.u32 %v5057_v39, %v4167_v40  ;;  %v4231_v46 = vld [vmem:[#allocation2 + $0x5f8] sm:$0xf0]  ;;  %1891 = vmatpush.bf16.msra.mxu0 %v4166_v37  ;;  %v5056_v49 = vld [vmem:[#allocation2 + $0x564] sm:$0xf0]  ;;  %v4221_v50 = vld [vmem:[#allocation2 + $0x5e0] sm:$0xf] }
 0x3d2   :  { %v4234_v48 = vor.u32 %v5073_v45, %v4231_v46  ;;  %v5072_v51 = vld [vmem:[#allocation2 + $0x5e4] sm:$0xf0]  ;;  %1905 = vmatpush.bf16.msra.mxu1 %v4230_v43  ;;  %v4158_v52 = vor.u32 %v5056_v49, %v4157_v47  ;;  %v5055_v54 = vld [vmem:[#allocation2 + $0x564] sm:$0xf]  ;;  %v4159_v55 = vld [vmem:[#allocation2 + $0x568] sm:$0xf0] }
 0x3d3   :  { %1919 = vmatpush.bf16.msra.mxu2 %v4170_v44  ;;  %v4222_v53 = vor.u32 %v5072_v51, %v4221_v50  ;;  %v5071_v56 = vld [vmem:[#allocation2 + $0x5e4] sm:$0xf]  ;;  %v4162_v41 = vor.u32 %v5055_v54, %v4159_v55  ;;  %v4223_v34 = vld [vmem:[#allocation2 + $0x5e8] sm:$0xf0]  ;;  %v4149_v42 = vld [vmem:[#allocation2 + $0x550] sm:$0xf] }
 0x3d4   :  { %1933 = vmatpush.bf16.msra.mxu3 %v4234_v48  ;;  %v5054_v0 = vld [vmem:[#allocation2 + $0x554] sm:$0xf0]  ;;  %v4226_v1 = vor.u32 %v5071_v56, %v4223_v34  ;;  %v4213_v4 = vld [vmem:[#allocation2 + $0x5d0] sm:$0xf]  ;;  %v5053_v6 = vld [vmem:[#allocation2 + $0x554] sm:$0xf] }
 0x3d5   :  { %v5070_v5 = vld [vmem:[#allocation2 + $0x5d4] sm:$0xf0]  ;;  %1892 = vmatpush.bf16.msra.mxu0 %v4158_v52  ;;  %v4150_v7 = vor.u32 %v5054_v0, %v4149_v42  ;;  %v4151_v8 = vld [vmem:[#allocation2 + $0x558] sm:$0xf0]  ;;  %v5069_v9 = vld [vmem:[#allocation2 + $0x5d4] sm:$0xf] }
 0x3d6   :  { %v4215_v10 = vld [vmem:[#allocation2 + $0x5d8] sm:$0xf0]  ;;  %1906 = vmatpush.bf16.msra.mxu1 %v4222_v53  ;;  %v4214_v11 = vor.u32 %v5070_v5, %v4213_v4  ;;  %v4154_v12 = vor.u32 %v5053_v6, %v4151_v8  ;;  %v4141_v13 = vld [vmem:[#allocation2 + $0x540] sm:$0xf]  ;;  %v5052_v14 = vld [vmem:[#allocation2 + $0x544] sm:$0xf0] }
 0x3d7   :  { %1920 = vmatpush.bf16.msra.mxu2 %v4162_v41  ;;  %v4205_v16 = vld [vmem:[#allocation2 + $0x5c0] sm:$0xf]  ;;  %v4218_v17 = vor.u32 %v5069_v9, %v4215_v10  ;;  %v5068_v18 = vld [vmem:[#allocation2 + $0x5c4] sm:$0xf0]  ;;  %v5051_v19 = vld [vmem:[#allocation2 + $0x544] sm:$0xf]  ;;  %v4142_v23 = vor.u32 %v5052_v14, %v4141_v13 }
 0x3d8   :  { %1934 = vmatpush.bf16.msra.mxu3 %v4226_v1  ;;  %v4143_v20 = vld [vmem:[#allocation2 + $0x548] sm:$0xf0]  ;;  %v5067_v21 = vld [vmem:[#allocation2 + $0x5c4] sm:$0xf]  ;;  %v4206_v25 = vor.u32 %v5068_v18, %v4205_v16  ;;  %v4133_v28 = vld [vmem:[#allocation2 + $0x530] sm:$0xf] }
 0x3d9   :  { %v4207_v22 = vld [vmem:[#allocation2 + $0x5c8] sm:$0xf0]  ;;  %1893 = vmatpush.bf16.msra.mxu0 %v4150_v7  ;;  %v4146_v27 = vor.u32 %v5051_v19, %v4143_v20  ;;  %v5050_v29 = vld [vmem:[#allocation2 + $0x534] sm:$0xf0]  ;;  %v4197_v30 = vld [vmem:[#allocation2 + $0x5b0] sm:$0xf] }
 0x3da   :  { %1907 = vmatpush.bf16.msra.mxu1 %v4214_v11  ;;  %v4210_v32 = vor.u32 %v5067_v21, %v4207_v22  ;;  %v5066_v35 = vld [vmem:[#allocation2 + $0x5b4] sm:$0xf0]  ;;  %v5049_v36 = vld [vmem:[#allocation2 + $0x534] sm:$0xf]  ;;  %v4135_v37 = vld [vmem:[#allocation2 + $0x538] sm:$0xf0]  ;;  %v4134_v40 = vor.u32 %v5050_v29, %v4133_v28 }
 0x3db   :  { %1921 = vmatpush.bf16.msra.mxu2 %v4154_v12  ;;  %v5065_v38 = vld [vmem:[#allocation2 + $0x5b4] sm:$0xf]  ;;  %v4199_v39 = vld [vmem:[#allocation2 + $0x5b8] sm:$0xf0]  ;;  %v4198_v43 = vor.u32 %v5066_v35, %v4197_v30  ;;  %v4138_v44 = vor.u32 %v5049_v36, %v4135_v37  ;;  %v4125_v45 = vld [vmem:[#allocation2 + $0x520] sm:$0xf]  ;;  %v1691_v37 = vpack.c.bf16 %v5692_v31, %v5688_v24 }
 0x3dc   :  { %1935 = vmatpush.bf16.msra.mxu3 %v4218_v17  ;;  %v5048_v46 = vld [vmem:[#allocation2 + $0x524] sm:$0xf0]  ;;  %v4189_v47 = vld [vmem:[#allocation2 + $0x5a0] sm:$0xf]  ;;  %v4202_v48 = vor.u32 %v5065_v38, %v4199_v39  ;;  %v5047_v50 = vld [vmem:[#allocation2 + $0x524] sm:$0xf] }
 0x3dd   :  { %1894 = vmatpush.bf16.msra.mxu0 %v4142_v23  ;;  %v5064_v49 = vld [vmem:[#allocation2 + $0x5a4] sm:$0xf0]  ;;  %v4127_v51 = vld [vmem:[#allocation2 + $0x528] sm:$0xf0]  ;;  %v5063_v52 = vld [vmem:[#allocation2 + $0x5a4] sm:$0xf]  ;;  %v4126_v54 = vor.u32 %v5048_v46, %v4125_v45 }
 0x3de   :  { %1908 = vmatpush.bf16.msra.mxu1 %v4206_v25  ;;  %v4191_v53 = vld [vmem:[#allocation2 + $0x5a8] sm:$0xf0]  ;;  %v4190_v55 = vor.u32 %v5064_v49, %v4189_v47  ;;  %v4130_v56 = vor.u32 %v5047_v50, %v4127_v51  ;;  %v4117_v41 = vld [vmem:[#allocation2 + $0x510] sm:$0xf]  ;;  %v5046_v34 = vld [vmem:[#allocation2 + $0x514] sm:$0xf0] }
 0x3df   :  { %1922 = vmatpush.bf16.msra.mxu2 %v4146_v27  ;;  %v4181_v42 = vld [vmem:[#allocation2 + $0x590] sm:$0xf]  ;;  %v4194_v0 = vor.u32 %v5063_v52, %v4191_v53  ;;  %v5062_v1 = vld [vmem:[#allocation2 + $0x594] sm:$0xf0]  ;;  %v5045_v4 = vld [vmem:[#allocation2 + $0x514] sm:$0xf]  ;;  %v4118_v8 = vor.u32 %v5046_v34, %v4117_v41 }
 0x3e0   :  { %1936 = vmatpush.bf16.msra.mxu3 %v4210_v32  ;;  %v4119_v5 = vld [vmem:[#allocation2 + $0x518] sm:$0xf0]  ;;  %v5061_v6 = vld [vmem:[#allocation2 + $0x594] sm:$0xf]  ;;  %v4182_v9 = vor.u32 %v5062_v1, %v4181_v42  ;;  %v4109_v11 = vld [vmem:[#allocation2 + $0x500] sm:$0xf]  ;;  %v1690_v32 = vpack.c.bf16 %v5690_v26, %v5686_v15 }
 0x3e1   :  { %1895 = vmatpush.bf16.msra.mxu0 %v4134_v40  ;;  %v4183_v7 = vld [vmem:[#allocation2 + $0x598] sm:$0xf0]  ;;  %v4122_v10 = vor.u32 %v5045_v4, %v4119_v5  ;;  %v5044_v12 = vld [vmem:[#allocation2 + $0x504] sm:$0xf0]  ;;  %v4173_v13 = vld [vmem:[#allocation2 + $0x580] sm:$0xf] }
 0x3e2   :  { %1909 = vmatpush.bf16.msra.mxu1 %v4198_v43  ;;  %v4186_v14 = vor.u32 %v5061_v6, %v4183_v7  ;;  %v5060_v16 = vld [vmem:[#allocation2 + $0x584] sm:$0xf0]  ;;  %v5043_v17 = vld [vmem:[#allocation2 + $0x504] sm:$0xf]  ;;  %v4111_v18 = vld [vmem:[#allocation2 + $0x508] sm:$0xf0]  ;;  %v4110_v21 = vor.u32 %v5044_v12, %v4109_v11 }
 0x3e3   :  { %1923 = vmatpush.bf16.msra.mxu2 %v4138_v44  ;;  %v5059_v19 = vld [vmem:[#allocation2 + $0x584] sm:$0xf]  ;;  %v4175_v20 = vld [vmem:[#allocation2 + $0x588] sm:$0xf0]  ;;  %v4174_v22 = vor.u32 %v5060_v16, %v4173_v13  ;;  %v4114_v23 = vor.u32 %v5043_v17, %v4111_v18  ;;  %v4357_v29 = vld [vmem:[#allocation2 + $0x670] sm:$0xf] }
 0x3e4   :  { %1937 = vmatpush.bf16.msra.mxu3 %v4202_v48  ;;  %v5082_v25 = vld [vmem:[#allocation11 + $0x38] sm:$0xff]  ;;  %v4178_v28 = vor.u32 %v5059_v19, %v4175_v20  ;;  %v5106_v30 = vld [vmem:[#allocation2 + $0x674] sm:$0xf0]  ;;  %v5081_v39 = vld [vmem:[#allocation11 + $0x30] sm:$0xff] }
 0x3e5   :  { %1896 = vmatpush.bf16.msra.mxu0 %v4126_v54  ;;  %v5090_v27 = vld [vmem:[#allocation11 + $0x78] sm:$0xff]  ;;  %v5122_v36 = vld [vmem:[#allocation2 + $0x6f4] sm:$0xf0]  ;;  %v4358_v38 = vor.u32 %v5106_v30, %v4357_v29  ;;  %v4349_v43 = vld [vmem:[#allocation2 + $0x660] sm:$0xf] }
 0x3e6   :  { %1910 = vmatpush.bf16.msra.mxu1 %v4190_v55  ;;  %v4421_v35 = vld [vmem:[#allocation2 + $0x6f0] sm:$0xf]  ;;  %v5104_v44 = vld [vmem:[#allocation2 + $0x664] sm:$0xf0]  ;;  %v4413_v46 = vld [vmem:[#allocation2 + $0x6e0] sm:$0xf] }
 0x3e7   :  { %1924 = vmatpush.bf16.msra.mxu2 %v4130_v56  ;;  %v4422_v40 = vor.u32 %v5122_v36, %v4421_v35  ;;  %v5089_v45 = vld [vmem:[#allocation11 + $0x70] sm:$0xff]  ;;  %v4350_v26 = vor.u32 %v5104_v44, %v4349_v43  ;;  %v5080_v24 = vld [vmem:[#allocation11 + $0x28] sm:$0xff]  ;;  %v4341_v47 = vld [vmem:[#allocation2 + $0x650] sm:$0xf] }
 0x3e8   :  { %1938 = vmatpush.bf16.msra.mxu3 %v4194_v0  ;;  %v5120_v15 = vld [vmem:[#allocation2 + $0x6e4] sm:$0xf0]  ;;  %v5102_v48 = vld [vmem:[#allocation2 + $0x654] sm:$0xf0]  ;;  %v4405_v50 = vld [vmem:[#allocation2 + $0x6d0] sm:$0xf] }
 0x3e9   :  { %1897 = vmatpush.bf16.msra.mxu0 %v4118_v8  ;;  %v4414_v31 = vor.u32 %v5120_v15, %v4413_v46  ;;  %v5088_v49 = vld [vmem:[#allocation11 + $0x68] sm:$0xff]  ;;  %v4342_v52 = vor.u32 %v5102_v48, %v4341_v47  ;;  %v5079_v53 = vld [vmem:[#allocation11 + $0x20] sm:$0xff]  ;;  %v5100_v56 = vld [vmem:[#allocation2 + $0x644] sm:$0xf0] }
 0x3ea   :  { %1911 = vmatpush.bf16.msra.mxu1 %v4182_v9  ;;  %v5118_v51 = vld [vmem:[#allocation2 + $0x6d4] sm:$0xf0]  ;;  %v4333_v55 = vld [vmem:[#allocation2 + $0x640] sm:$0xf]  ;;  %v5078_v42 = vld [vmem:[#allocation11 + $0x18] sm:$0xff] }
 0x3eb   :  { %1925 = vmatpush.bf16.msra.mxu2 %v4122_v10  ;;  %v4406_v54 = vor.u32 %v5118_v51, %v4405_v50  ;;  %v5087_v41 = vld [vmem:[#allocation11 + $0x60] sm:$0xff]  ;;  %v4334_v34 = vor.u32 %v5100_v56, %v4333_v55  ;;  %v5077_v0 = vld [vmem:[#allocation11 + $0x10] sm:$0xff]  ;;  %v5086_v6 = vld [vmem:[#allocation11 + $0x58] sm:$0xff] }
 0x3ec   :  { %1939 = vmatpush.bf16.msra.mxu3 %v4186_v14  ;;  %v4397_v1 = vld [vmem:[#allocation2 + $0x6c0] sm:$0xf]  ;;  %v5116_v4 = vld [vmem:[#allocation2 + $0x6c4] sm:$0xf0]  ;;  %v4325_v7 = vld [vmem:[#allocation2 + $0x630] sm:$0xf] }
 0x3ed   :  { %1898 = vmatpush.bf16.msra.mxu0 %v4110_v21  ;;  %v4398_v5 = vor.u32 %v5116_v4, %v4397_v1  ;;  %v5098_v8 = vld [vmem:[#allocation2 + $0x634] sm:$0xf0]  ;;  %v4389_v11 = vld [vmem:[#allocation2 + $0x6b0] sm:$0xf]  ;;  %v5085_v14 = vld [vmem:[#allocation11 + $0x50] sm:$0xff] }
 0x3ee   :  { %1912 = vmatpush.bf16.msra.mxu1 %v4174_v22  ;;  %v4326_v9 = vor.u32 %v5098_v8, %v4325_v7  ;;  %v5076_v10 = vld [vmem:[#allocation11 + $0x8] sm:$0xff]  ;;  %v5096_v17 = vld [vmem:[#allocation2 + $0x624] sm:$0xf0]  ;;  %v5075_v19 = vld [vmem:[#allocation11] sm:$0xff] }
 0x3ef   :  { %1926 = vmatpush.bf16.msra.mxu2 %v4114_v23  ;;  %v5114_v12 = vld [vmem:[#allocation2 + $0x6b4] sm:$0xf0]  ;;  %v4317_v16 = vld [vmem:[#allocation2 + $0x620] sm:$0xf]  ;;  %v5112_v21 = vld [vmem:[#allocation2 + $0x6a4] sm:$0xf0] }
 0x3f0   :  { %1940 = vmatpush.bf16.msra.mxu3 %v4178_v28  ;;  %1899 = vmatmul.bf16.vlgmr.msra.gmra.mxu0 %v1690_v32  ;;  %v4390_v13 = vor.u32 %v5114_v12, %v4389_v11  ;;  %v4318_v18 = vor.u32 %v5096_v17, %v4317_v16  ;;  %v4381_v20 = vld [vmem:[#allocation2 + $0x6a0] sm:$0xf]  ;;  %v5105_v23 = vld [vmem:[#allocation2 + $0x674] sm:$0xf]  ;;  %v4309_v29 = vld [vmem:[#allocation2 + $0x610] sm:$0xf] }
 0x3f1   :  { %2109 = vmatpush.bf16.msrb.mxu0 %v5082_v25  ;;  %1913 = vmatmul.bf16.vlgmr.msra.gmra.mxu1 %v1691_v37  ;;  %v4382_v22 = vor.u32 %v5112_v21, %v4381_v20  ;;  %v4359_v25 = vld [vmem:[#allocation2 + $0x678] sm:$0xf0]  ;;  %v5094_v30 = vld [vmem:[#allocation2 + $0x614] sm:$0xf0]  ;;  %v4373_v35 = vld [vmem:[#allocation2 + $0x690] sm:$0xf] }
 0x3f2   :  { %2123 = vmatpush.bf16.msrb.mxu1 %v5090_v27  ;;  %1927 = vmatmul.bf16.vlgmr.msra.gmra.mxu2 %v1690_v32  ;;  %v4362_v27 = vor.u32 %v5105_v23, %v4359_v25  ;;  %v5084_v28 = vld [vmem:[#allocation11 + $0x48] sm:$0xff]  ;;  %v4310_v32 = vor.u32 %v5094_v30, %v4309_v29  ;;  %v5083_v43 = vld [vmem:[#allocation11 + $0x40] sm:$0xff]  ;;  %v5108_v47 = vld [vmem:[#allocation2 + $0x684] sm:$0xf0] }
 0x3f3   :  { %1941 = vmatmul.bf16.vlgmr.msra.gmra.mxu3 %v1691_v37  ;;  %2339 = vmatpush.bf16.msrb.mxu2 %v4358_v38  ;;  %v5110_v36 = vld [vmem:[#allocation2 + $0x694] sm:$0xf0]  ;;  %v5103_v37 = vld [vmem:[#allocation2 + $0x664] sm:$0xf]  ;;  %v4301_v44 = vld [vmem:[#allocation2 + $0x600] sm:$0xf] }
 0x3f4   :  { %2353 = vmatpush.bf16.msrb.mxu3 %v4422_v40  ;;  %v4374_v38 = vor.u32 %v5110_v36, %v4373_v35  ;;  %v5121_v15 = vld [vmem:[#allocation2 + $0x6f4] sm:$0xf]  ;;  %v4343_v50 = vld [vmem:[#allocation2 + $0x658] sm:$0xf0]  ;;  %v5099_v55 = vld [vmem:[#allocation2 + $0x644] sm:$0xf] }
 0x3f5   :  { %2110 = vmatpush.bf16.msrb.mxu0 %v5081_v39  ;;  %v4351_v39 = vld [vmem:[#allocation2 + $0x668] sm:$0xf0]  ;;  %v5101_v48 = vld [vmem:[#allocation2 + $0x654] sm:$0xf]  ;;  %v4327_v4 = vld [vmem:[#allocation2 + $0x638] sm:$0xf0] }
 0x3f6   :  { %2124 = vmatpush.bf16.msrb.mxu1 %v5089_v45  ;;  %v4354_v40 = vor.u32 %v5103_v37, %v4351_v39  ;;  %v5092_v45 = vld [vmem:[#allocation2 + $0x604] sm:$0xf0]  ;;  %v4346_v51 = vor.u32 %v5101_v48, %v4343_v50  ;;  %v4335_v56 = vld [vmem:[#allocation2 + $0x648] sm:$0xf0]  ;;  %v5097_v1 = vld [vmem:[#allocation2 + $0x634] sm:$0xf] }
 0x3f7   :  { %2340 = vmatpush.bf16.msrb.mxu2 %v4350_v26  ;;  %v4302_v46 = vor.u32 %v5092_v45, %v4301_v44  ;;  %v4423_v26 = vld [vmem:[#allocation2 + $0x6f8] sm:$0xf0]  ;;  %v4399_v7 = vld [vmem:[#allocation2 + $0x6c8] sm:$0xf0]  ;;  %v5095_v8 = vld [vmem:[#allocation2 + $0x624] sm:$0xf] }
 0x3f8   :  { %2354 = vmatpush.bf16.msrb.mxu3 %v4414_v31  ;;  %v4365_v31 = vld [vmem:[#allocation2 + $0x680] sm:$0xf]  ;;  %v1725_v11 = vld [vmem:[#allocation9 + $0x5] ss:$8 sm:$0x3] }
 0x3f9   :  { %2111 = vmatpush.bf16.msrb.mxu0 %v5080_v24  ;;  %v4426_v24 = vor.u32 %v5121_v15, %v4423_v26  ;;  %v4391_v16 = vld [vmem:[#allocation2 + $0x6b8] sm:$0xf0]  ;;  %v5111_v20 = vld [vmem:[#allocation2 + $0x6a4] sm:$0xf]  ;;  %v4367_v45 = vld [vmem:[#allocation2 + $0x688] sm:$0xf0] }
 0x3fa   :  { %2125 = vmatpush.bf16.msrb.mxu1 %v5088_v49  ;;  %v4366_v49 = vor.u32 %v5108_v47, %v4365_v31  ;;  %v5091_v25 = vld [vmem:[#allocation2 + $0x604] sm:$0xf]  ;;  %v4375_v35 = vld [vmem:[#allocation2 + $0x698] sm:$0xf0] }
 0x3fb   :  { %2341 = vmatpush.bf16.msrb.mxu2 %v4342_v52  ;;  %v5119_v52 = vld [vmem:[#allocation2 + $0x6e4] sm:$0xf] }
 0x3fc   :  { %2355 = vmatpush.bf16.msrb.mxu3 %v4406_v54  ;;  %v5107_v44 = vld [vmem:[#allocation2 + $0x684] sm:$0xf] }
 0x3fd   :  { %2112 = vmatpush.bf16.msrb.mxu0 %v5079_v53  ;;  %v4415_v53 = vld [vmem:[#allocation2 + $0x6e8] sm:$0xf0]  ;;  %v4370_v47 = vor.u32 %v5107_v44, %v4367_v45  ;;  %v5706_v45 = vld [vmem:[#allocation9 + $0x6] ss:$8 sm:$0x3] }
 0x3fe   :  { %2126 = vmatpush.bf16.msrb.mxu1 %v5087_v41  ;;  %v4418_v54 = vor.u32 %v5119_v52, %v4415_v53  ;;  %v4338_v41 = vor.u32 %v5099_v55, %v4335_v56  ;;  %v5138_v55 = vld [vmem:[#allocation2 + $0x774] sm:$0xf0]  ;;  %v4463_v44 = vld [vmem:[#allocation2 + $0x748] sm:$0xf0] }
 0x3ff   :  { %2342 = vmatpush.bf16.msrb.mxu2 %v4334_v34  ;;  %v5117_v34 = vld [vmem:[#allocation2 + $0x6d4] sm:$0xf] }
 0x400   :  { %2356 = vmatpush.bf16.msrb.mxu3 %v4398_v5  ;;  %v5115_v5 = vld [vmem:[#allocation2 + $0x6c4] sm:$0xf] }
 0x401   :  { %2113 = vmatpush.bf16.msrb.mxu0 %v5078_v42  ;;  %v4407_v42 = vld [vmem:[#allocation2 + $0x6d8] sm:$0xf0] }
 0x402   :  { %2127 = vmatpush.bf16.msrb.mxu1 %v5086_v6  ;;  %v4330_v6 = vor.u32 %v5097_v1, %v4327_v4  ;;  %v5136_v1 = vld [vmem:[#allocation2 + $0x764] sm:$0xf0] }
 0x403   :  { %2343 = vmatpush.bf16.msrb.mxu2 %v4326_v9  ;;  %v4319_v9 = vld [vmem:[#allocation2 + $0x628] sm:$0xf0] }
 0x404   :  { %2357 = vmatpush.bf16.msrb.mxu3 %v4390_v13  ;;  %v4322_v12 = vor.u32 %v5095_v8, %v4319_v9  ;;  %v1727_v13 = vperm.slane %v1725_v11, 0  ;;  %v4487_v8 = vld [vmem:[#allocation2 + $0x778] sm:$0xf0] }
 0x405   :  { %2114 = vmatpush.bf16.msrb.mxu0 %v5077_v0  ;;  %v4410_v0 = vor.u32 %v5117_v34, %v4407_v42 }
 0x406   :  { %2128 = vmatpush.bf16.msrb.mxu1 %v5085_v14  ;;  %v5113_v14 = vld [vmem:[#allocation2 + $0x6b4] sm:$0xf] }
 0x407   :  { %2344 = vmatpush.bf16.msrb.mxu2 %v4318_v18  ;;  %v4394_v17 = vor.u32 %v5113_v14, %v4391_v16  ;;  %v5093_v18 = vld [vmem:[#allocation2 + $0x614] sm:$0xf] }
 0x408   :  { %2358 = vmatpush.bf16.msrb.mxu3 %v4382_v22  ;;  %v4383_v22 = vld [vmem:[#allocation2 + $0x6a8] sm:$0xf0] }
 0x409   :  { %2115 = vmatpush.bf16.msrb.mxu0 %v5076_v10  ;;  %v4402_v10 = vor.u32 %v5115_v5, %v4399_v7  ;;  %v4386_v30 = vor.u32 %v5111_v20, %v4383_v22  ;;  %v5137_v7 = vld [vmem:[#allocation2 + $0x774] sm:$0xf]  ;;  %v5135_v20 = vld [vmem:[#allocation2 + $0x764] sm:$0xf] }
 0x40a   :  { %2129 = vmatpush.bf16.msrb.mxu1 %v5084_v28 }
 0x40b   :  { %2345 = vmatpush.bf16.msrb.mxu2 %v4310_v32  ;;  %v5109_v32 = vld [vmem:[#allocation2 + $0x694] sm:$0xf] }
 0x40c   :  { %2359 = vmatpush.bf16.msrb.mxu3 %v4374_v38  ;;  %v1728_v38 = vperm.slane %v1725_v11, 1 }
 0x40d   :  { %2116 = vmatpush.bf16.msrb.mxu0 %v5075_v19  ;;  %v4311_v19 = vld [vmem:[#allocation2 + $0x618] sm:$0xf0] }
 0x40e   :  { %2130 = vmatpush.bf16.msrb.mxu1 %v5083_v43  ;;  %v4314_v21 = vor.u32 %v5093_v18, %v4311_v19  ;;  %v4490_v19 = vor.u32 %v5137_v7, %v4487_v8  ;;  %v5126_v7 = vld [vmem:[#allocation2 + $0x714] sm:$0xf0]  ;;  %v4541_v8 = vld [vmem:[#allocation2 + $0x7e0] sm:$0xf] }
 0x40f   :  { %2346 = vmatpush.bf16.msrb.mxu2 %v4302_v46 }
 0x410   :  { %2360 = vmatpush.bf16.msrb.mxu3 %v4366_v49 }
 0x411   :  { %2367 = vmatpush.bf16.msra.mxu0 %v4362_v27  ;;  %v4303_v27 = vld [vmem:[#allocation2 + $0x608] sm:$0xf0] }
 0x412   :  { %2381 = vmatpush.bf16.msra.mxu1 %v4426_v24  ;;  %2347 = vmatmul.bf16.vlgmr.msrb.gmra.mxu2 %v5655_v59  ;;  %v4306_v37 = vor.u32 %v5091_v25, %v4303_v27  ;;  %v4461_v25 = vld [vmem:[#allocation2 + $0x740] sm:$0xf]  ;;  %v5132_v27 = vld [vmem:[#allocation2 + $0x744] sm:$0xf0] }
 0x413   :  { %2361 = vmatmul.bf16.vlgmr.msrb.gmra.mxu3 %v5666_v63 }
 0x415   :  { %2368 = vmatpush.bf16.msra.mxu0 %v4354_v40  ;;  %v4378_v40 = vor.u32 %v5109_v32, %v4375_v35  ;;  %v4471_v35 = vld [vmem:[#allocation2 + $0x758] sm:$0xf0] }
 0x416   :  { %2382 = vmatpush.bf16.msra.mxu1 %v4418_v54  ;;  %v4485_v54 = vld [vmem:[#allocation2 + $0x770] sm:$0xf] }
 0x417   :  { %v4486_v42 = vor.u32 %v5138_v55, %v4485_v54  ;;  %v4549_v54 = vld [vmem:[#allocation2 + $0x7f0] sm:$0xf]  ;;  %v5154_v55 = vld [vmem:[#allocation2 + $0x7f4] sm:$0xf0] }
 0x419   :  { %2369 = vmatpush.bf16.msra.mxu0 %v4346_v51  ;;  %2609 = vmatpush.bf16.msra.mxu2 %v4486_v42 }
 0x41a   :  { %2383 = vmatpush.bf16.msra.mxu1 %v4410_v0  ;;  %v4477_v0 = vld [vmem:[#allocation2 + $0x760] sm:$0xf] }
 0x41b   :  { %v4478_v9 = vor.u32 %v5136_v1, %v4477_v0  ;;  %v5153_v0 = vld [vmem:[#allocation2 + $0x7f4] sm:$0xf] }
 0x41d   :  { %2370 = vmatpush.bf16.msra.mxu0 %v4338_v41  ;;  %2610 = vmatpush.bf16.msra.mxu2 %v4478_v9 }
 0x41e   :  { %2384 = vmatpush.bf16.msra.mxu1 %v4402_v10  ;;  %v4469_v10 = vld [vmem:[#allocation2 + $0x750] sm:$0xf] }
 0x421   :  { %2371 = vmatpush.bf16.msra.mxu0 %v4330_v6 }
 0x422   :  { %2385 = vmatpush.bf16.msra.mxu1 %v4394_v17 }
 0x425   :  { %2372 = vmatpush.bf16.msra.mxu0 %v4322_v12 }
 0x426   :  { %2386 = vmatpush.bf16.msra.mxu1 %v4386_v30  ;;  %v5133_v30 = vld [vmem:[#allocation2 + $0x754] sm:$0xf] }
 0x429   :  { %2373 = vmatpush.bf16.msra.mxu0 %v4314_v21  ;;  %v4479_v21 = vld [vmem:[#allocation2 + $0x768] sm:$0xf0] }
 0x42a   :  { %2387 = vmatpush.bf16.msra.mxu1 %v4378_v40  ;;  %v4474_v40 = vor.u32 %v5133_v30, %v4471_v35  ;;  %v5123_v30 = vld [vmem:[#allocation2 + $0x704] sm:$0xf]  ;;  %v5149_v35 = vld [vmem:[#allocation2 + $0x7d4] sm:$0xf] }
 0x42d   :  { %2374 = vmatpush.bf16.msra.mxu0 %v4306_v37 }
 0x42e   :  { %2388 = vmatpush.bf16.msra.mxu1 %v4370_v47 }
 0x46d   :  { %v1900_v23 = vpop.f32.mrf.mxu0 }
 0x46e   :  { %v1901_v28 = vadd.f32 %v1900_v23, %v1727_v13  ;;  %v1914_v29 = vpop.f32.mrf.mxu1 }
 0x470   :  { %v1915_v36 = vadd.f32 %v1914_v29, %v1901_v28 }
 0x472   :  { %vm1947_vm14 = vcmp.gt.f32.partialorder %v1915_v36, 0.0  ;;  %v1951_v39 = vmul.f32 0.01, %v1915_v36 }
 0x474   :  { %v1955_v46 = vsel %vm1947_vm14, %v1915_v36, %v1951_v39  ;;  %v4462_v36 = vor.u32 %v5132_v27, %v4461_v25 }
 0x475   :  { %v1928_v43 = vpop.f32.mrf.mxu2  ;;  %v1902_v24 = vpop.f32.mrf.mxu0  ;;  %v1959_v50 = vadd.f32 %v1955_v46, %v5673_v58  ;;  %v4453_v46 = vld [vmem:[#allocation2 + $0x730] sm:$0xf] }
 0x476   :  { %v1929_v15 = vadd.f32 %v1928_v43, %v1728_v38  ;;  %v1942_v26 = vpop.f32.mrf.mxu3  ;;  %v1903_v31 = vadd.f32 %v1902_v24, %v1727_v13  ;;  %v1916_v49 = vpop.f32.mrf.mxu1  ;;  %v5134_v13 = vld [vmem:[#allocation2 + $0x754] sm:$0xf0]  ;;  %v5131_v43 = vld [vmem:[#allocation2 + $0x744] sm:$0xf] }
 0x477   :  { %v1967_v34 = vmul.f32 0.01, %v1959_v50  ;;  %vm1963_vm1 = vcmp.gt.f32.partialorder %v1959_v50, 0.0  ;;  %v4470_v22 = vor.u32 %v5134_v13, %v4469_v10  ;;  %v5130_v24 = vld [vmem:[#allocation2 + $0x734] sm:$0xf0] }
 0x478   :  { %v1943_v48 = vadd.f32 %v1942_v26, %v1929_v15  ;;  %v1917_v51 = vadd.f32 %v1916_v49, %v1903_v31  ;;  %v2175_v15 = vperm.slane %v5706_v45, 0  ;;  %v5129_v31 = vld [vmem:[#allocation2 + $0x734] sm:$0xf]  ;;  %v4454_v47 = vor.u32 %v5130_v24, %v4453_v46  ;;  %v4439_v13 = vld [vmem:[#allocation2 + $0x718] sm:$0xf0] }
 0x479   :  { %v1971_v16 = vsel %vm1963_vm1, %v1959_v50, %v1967_v34  ;;  %2611 = vmatpush.bf16.msra.mxu2 %v4470_v22  ;;  %v4550_v34 = vor.u32 %v5154_v55, %v4549_v54  ;;  %v5124_v22 = vld [vmem:[#allocation2 + $0x704] sm:$0xf0]  ;;  %v5147_v46 = vld [vmem:[#allocation2 + $0x7c4] sm:$0xf]  ;;  %v4517_v24 = vld [vmem:[#allocation2 + $0x7b0] sm:$0xf] }
 0x47a   :  { %v1952_v52 = vmul.f32 0.01, %v1943_v48  ;;  %vm1948_vm15 = vcmp.gt.f32.partialorder %v1943_v48, 0.0  ;;  %vm1949_vm0 = vcmp.gt.f32.partialorder %v1917_v51, 0.0  ;;  %v1953_v53 = vmul.f32 0.01, %v1917_v51 }
 0x47b   :  { %2623 = vmatpush.bf16.msra.mxu3 %v4550_v34  ;;  %v4511_v54 = vld [vmem:[#allocation2 + $0x7a8] sm:$0xf0]  ;;  %v4501_v55 = vld [vmem:[#allocation2 + $0x790] sm:$0xf] }
 0x47c   :  { %v1957_v56 = vsel %vm1949_vm0, %v1917_v51, %v1953_v53  ;;  %v1956_v4 = vsel %vm1948_vm15, %v1943_v48, %v1952_v52  ;;  %v4455_v48 = vld [vmem:[#allocation2 + $0x738] sm:$0xf0]  ;;  %v4445_v53 = vld [vmem:[#allocation2 + $0x720] sm:$0xf] }
 0x47d   :  { %v1930_v41 = vpop.f32.mrf.mxu2  ;;  %v1961_v5 = vadd.f32 %v1957_v56, %v5675_v60  ;;  %v1960_v14 = vadd.f32 %v1956_v4, %v5680_v2  ;;  %v4482_v2 = vor.u32 %v5135_v20, %v4479_v21  ;;  %2612 = vmatpush.bf16.msra.mxu2 %v4462_v36  ;;  %v4458_v51 = vor.u32 %v5129_v31, %v4455_v48  ;;  %v5127_v56 = vld [vmem:[#allocation2 + $0x724] sm:$0xf]  ;;  %v4551_v4 = vld [vmem:[#allocation2 + $0x7f8] sm:$0xf0]  ;;  %v4429_v21 = vld [vmem:[#allocation2 + $0x700] sm:$0xf] }
 0x47e   :  { %v1931_v6 = vadd.f32 %v1930_v41, %v1728_v38  ;;  %v1944_v58 = vpop.f32.mrf.mxu3  ;;  %v4447_v41 = vld [vmem:[#allocation2 + $0x728] sm:$0xf0]  ;;  %v5146_v31 = vld [vmem:[#allocation2 + $0x7b4] sm:$0xf0] }
 0x47f   :  { %vm1965_vm2 = vcmp.gt.f32.partialorder %v1961_v5, 0.0  ;;  %v1969_v12 = vmul.f32 0.01, %v1961_v5  ;;  %v1968_v29 = vmul.f32 0.01, %v1960_v14  ;;  %vm1964_vm4 = vcmp.gt.f32.partialorder %v1960_v14, 0.0 }
 0x480   :  { %v1945_v11 = vadd.f32 %v1944_v58, %v1931_v6  ;;  %v4450_v42 = vor.u32 %v5127_v56, %v4447_v41  ;;  %v4437_v58 = vld [vmem:[#allocation2 + $0x710] sm:$0xf]  ;;  %v4518_v48 = vor.u32 %v5146_v31, %v4517_v24  ;;  %v5142_v56 = vld [vmem:[#allocation2 + $0x794] sm:$0xf0]  ;;  %v5141_v41 = vld [vmem:[#allocation2 + $0x794] sm:$0xf] }
 0x481   :  { %v1973_v18 = vsel %vm1965_vm2, %v1961_v5, %v1969_v12  ;;  %v1972_v37 = vsel %vm1964_vm4, %v1960_v14, %v1968_v29  ;;  %2613 = vmatpush.bf16.msra.mxu2 %v4454_v47  ;;  %v4554_v5 = vor.u32 %v5153_v0, %v4551_v4  ;;  %v4438_v10 = vor.u32 %v5126_v7, %v4437_v58  ;;  %v5125_v12 = vld [vmem:[#allocation2 + $0x714] sm:$0xf]  ;;  %v5150_v29 = vld [vmem:[#allocation2 + $0x7d4] sm:$0xf0]  ;;  %v5251_v4 = vld [vmem:[#allocation12] ss:$0 sm:$0xff] }
 0x482   :  { %vm1950_vm3 = vcmp.gt.f32.partialorder %v1945_v11, 0.0  ;;  %v1954_v17 = vmul.f32 0.01, %v1945_v11  ;;  %v1975_v60 = vpack.c.bf16 %v1973_v18, %v1971_v16  ;;  %v5151_v18 = vld [vmem:[#allocation2 + $0x7e4] sm:$0xf]  ;;  %v4502_v34 = vor.u32 %v5142_v56, %v4501_v55 }
 0x483   :  { %v5145_v47 = vld [vmem:[#allocation2 + $0x7b4] sm:$0xf]  ;;  %v5139_v58 = vld [vmem:[#allocation2 + $0x784] sm:$0xf]  ;;  %v5168_v55 = vld [vmem:[#allocation2 + $0x864] sm:$0xf0] }
 0x484   :  { %v1958_v23 = vsel %vm1950_vm3, %v1945_v11, %v1954_v17  ;;  %2117 = vmatmul.bf16.vlgmr.msrb.gmra.mxu0 %v1975_v60  ;;  %v5152_v11 = vld [vmem:[#allocation2 + $0x7e4] sm:$0xf0]  ;;  %v4442_v17 = vor.u32 %v5125_v12, %v4439_v13  ;;  %v5167_v56 = vld [vmem:[#allocation2 + $0x864] sm:$0xf] }
 0x485   :  { %v1962_v28 = vadd.f32 %v1958_v23, %v5682_v3  ;;  %2637 = vmatpush.bf16.msrb.mxu0 %v4490_v19  ;;  %v4466_v3 = vor.u32 %v5131_v43, %v4463_v44  ;;  %v4542_v16 = vor.u32 %v5152_v11, %v4541_v8  ;;  %v4543_v19 = vld [vmem:[#allocation2 + $0x7e8] sm:$0xf0]  ;;  %v4533_v23 = vld [vmem:[#allocation2 + $0x7d0] sm:$0xf]  ;;  %v4525_v43 = vld [vmem:[#allocation2 + $0x7c0] sm:$0xf] }
 0x486   :  { %v4546_v20 = vor.u32 %v5151_v18, %v4543_v19  ;;  %v5148_v44 = vld [vmem:[#allocation2 + $0x7c4] sm:$0xf0]  ;;  %v4495_v8 = vld [vmem:[#allocation2 + $0x788] sm:$0xf0]  ;;  %v2176_v19 = vperm.slane %v5706_v45, 1 }
 0x487   :  { %vm1966_vm5 = vcmp.gt.f32.partialorder %v1962_v28, 0.0  ;;  %v1970_v32 = vmul.f32 0.01, %v1962_v28  ;;  %2624 = vmatpush.bf16.msra.mxu3 %v4542_v16 }
 0x489   :  { %v1974_v38 = vsel %vm1966_vm5, %v1962_v28, %v1970_v32  ;;  %2638 = vmatpush.bf16.msrb.mxu0 %v4482_v2  ;;  %v4430_v28 = vor.u32 %v5124_v22, %v4429_v21  ;;  %v4534_v2 = vor.u32 %v5150_v29, %v4533_v23  ;;  %v4431_v32 = vld [vmem:[#allocation2 + $0x708] sm:$0xf0] }
 0x48a   :  { %v1976_v39 = vpack.c.bf16 %v1974_v38, %v1972_v37  ;;  %v4434_v37 = vor.u32 %v5123_v30, %v4431_v32  ;;  %v4535_v38 = vld [vmem:[#allocation2 + $0x7d8] sm:$0xf0] }
 0x48b   :  { %2625 = vmatpush.bf16.msra.mxu3 %v4534_v2 }
 0x48c   :  { %2131 = vmatmul.bf16.vlgmr.msrb.gmra.mxu1 %v1976_v39 }
 0x48d   :  { %2639 = vmatpush.bf16.msrb.mxu0 %v4474_v40  ;;  %2651 = vmatpush.bf16.msrb.mxu1 %v4554_v5  ;;  %v4538_v40 = vor.u32 %v5149_v35, %v4535_v38  ;;  %v4493_v5 = vld [vmem:[#allocation2 + $0x780] sm:$0xf]  ;;  %v4677_v35 = vld [vmem:[#allocation2 + $0x8f0] sm:$0xf]  ;;  %v4679_v38 = vld [vmem:[#allocation2 + $0x8f8] sm:$0xf0] }
 0x491   :  { %2640 = vmatpush.bf16.msrb.mxu0 %v4466_v3  ;;  %2652 = vmatpush.bf16.msrb.mxu1 %v4546_v20  ;;  %v4526_v3 = vor.u32 %v5148_v44, %v4525_v43  ;;  %v5184_v43 = vld [vmem:[#allocation2 + $0x8e4] sm:$0xf0]  ;;  %v5183_v44 = vld [vmem:[#allocation2 + $0x8e4] sm:$0xf] }
 0x493   :  { %2626 = vmatpush.bf16.msra.mxu3 %v4526_v3 }
 0x494   :  { %2375 = vmatmul.bf16.vlgmr.msra.gmra.mxu0 %v5655_v59  ;;  %v5128_v59 = vld [vmem:[#allocation2 + $0x724] sm:$0xf0] }
 0x495   :  { %v2348_v26 = vpop.f32.mrf.mxu2  ;;  %2641 = vmatpush.bf16.msrb.mxu0 %v4458_v51  ;;  %2653 = vmatpush.bf16.msrb.mxu1 %v4538_v40  ;;  %v4509_v51 = vld [vmem:[#allocation2 + $0x7a0] sm:$0xf] }
 0x496   :  { %v2349_v49 = vadd.f32 %v2348_v26, %v2175_v15  ;;  %v2362_v50 = vpop.f32.mrf.mxu3  ;;  %v4669_v40 = vld [vmem:[#allocation2 + $0x8e0] sm:$0xf] }
 0x497   :  { %2627 = vmatpush.bf16.msra.mxu3 %v4518_v48  ;;  %v4670_v3 = vor.u32 %v5184_v43, %v4669_v40  ;;  %v4615_v48 = vld [vmem:[#allocation2 + $0x878] sm:$0xf0]  ;;  %v4629_v40 = vld [vmem:[#allocation2 + $0x890] sm:$0xf]  ;;  %v5174_v43 = vld [vmem:[#allocation2 + $0x894] sm:$0xf0] }
 0x498   :  { %v2363_v52 = vadd.f32 %v2362_v50, %v2349_v49  ;;  %v4519_v49 = vld [vmem:[#allocation2 + $0x7b8] sm:$0xf0] }
 0x499   :  { %2642 = vmatpush.bf16.msrb.mxu0 %v4450_v42  ;;  %v4522_v50 = vor.u32 %v5145_v47, %v4519_v49  ;;  %v4503_v42 = vld [vmem:[#allocation2 + $0x798] sm:$0xf0]  ;;  %v5169_v47 = vld [vmem:[#allocation2 + $0x874] sm:$0xf]  ;;  %v4661_v49 = vld [vmem:[#allocation2 + $0x8d0] sm:$0xf] }
 0x49a   :  { %v2399_v1 = vmul.f32 0.01, %v2363_v52  ;;  %vm2395_vm6 = vcmp.gt.f32.partialorder %v2363_v52, 0.0 }
 0x49c   :  { %2389 = vmatmul.bf16.vlgmr.msra.gmra.mxu1 %v5666_v63  ;;  %v4446_v63 = vor.u32 %v5128_v59, %v4445_v53  ;;  %v2403_v25 = vsel %vm2395_vm6, %v2363_v52, %v2399_v1  ;;  %v5144_v52 = vld [vmem:[#allocation2 + $0x7a4] sm:$0xf0]  ;;  %v5143_v53 = vld [vmem:[#allocation2 + $0x7a4] sm:$0xf]  ;;  %v4506_v1 = vor.u32 %v5141_v41, %v4503_v42 }
 0x49d   :  { %v2350_v6 = vpop.f32.mrf.mxu2  ;;  %2643 = vmatpush.bf16.msrb.mxu0 %v4442_v17  ;;  %v4510_v59 = vor.u32 %v5144_v52, %v4509_v51  ;;  %v5182_v51 = vld [vmem:[#allocation2 + $0x8d4] sm:$0xf0]  ;;  %v5181_v52 = vld [vmem:[#allocation2 + $0x8d4] sm:$0xf] }
 0x49e   :  { %2614 = vmatpush.bf16.msra.mxu2 %v4446_v63  ;;  %v2351_v9 = vadd.f32 %v2350_v6, %v2175_v15  ;;  %v2364_v14 = vpop.f32.mrf.mxu3  ;;  %v4527_v15 = vld [vmem:[#allocation2 + $0x7c8] sm:$0xf0]  ;;  %v4514_v63 = vor.u32 %v5143_v53, %v4511_v54  ;;  %v5140_v6 = vld [vmem:[#allocation2 + $0x784] sm:$0xf0]  ;;  %v4663_v53 = vld [vmem:[#allocation2 + $0x8d8] sm:$0xf0] }
 0x49f   :  { %v4530_v26 = vor.u32 %v5147_v46, %v4527_v15  ;;  %2628 = vmatpush.bf16.msra.mxu3 %v4510_v59  ;;  %v4494_v7 = vor.u32 %v5140_v6, %v4493_v5  ;;  %v4671_v46 = vld [vmem:[#allocation2 + $0x8e8] sm:$0xf0]  ;;  %v4613_v15 = vld [vmem:[#allocation2 + $0x870] sm:$0xf]  ;;  %v4662_v59 = vor.u32 %v5182_v51, %v4661_v49  ;;  %v4666_v54 = vor.u32 %v5181_v52, %v4663_v53  ;;  %v5172_v51 = vld [vmem:[#allocation2 + $0x884] sm:$0xf0] }
 0x4a0   :  { %v2365_v60 = vadd.f32 %v2364_v14, %v2351_v9  ;;  %v4498_v9 = vor.u32 %v5139_v58, %v4495_v8  ;;  %v4674_v24 = vor.u32 %v5183_v44, %v4671_v46  ;;  %v4655_v6 = vld [vmem:[#allocation2 + $0x8c8] sm:$0xf0]  ;;  %v5166_v8 = vld [vmem:[#allocation2 + $0x854] sm:$0xf0]  ;;  %v5173_v44 = vld [vmem:[#allocation2 + $0x894] sm:$0xf] }
 0x4a1   :  { %2644 = vmatpush.bf16.msrb.mxu0 %v4434_v37  ;;  %2654 = vmatpush.bf16.msrb.mxu1 %v4530_v26  ;;  %v5185_v37 = vld [vmem:[#allocation2 + $0x8f4] sm:$0xf]  ;;  %v5170_v26 = vld [vmem:[#allocation2 + $0x874] sm:$0xf0]  ;;  %v4631_v46 = vld [vmem:[#allocation2 + $0x898] sm:$0xf0] }
 0x4a2   :  { %2615 = vmatpush.bf16.msra.mxu2 %v4438_v10  ;;  %vm2397_vm7 = vcmp.gt.f32.partialorder %v2365_v60, 0.0  ;;  %v2401_v27 = vmul.f32 0.01, %v2365_v60  ;;  %v4614_v31 = vor.u32 %v5170_v26, %v4613_v15  ;;  %v4634_v15 = vor.u32 %v5173_v44, %v4631_v46  ;;  %v4573_v26 = vld [vmem:[#allocation2 + $0x820] sm:$0xf] }
 0x4a3   :  { %2629 = vmatpush.bf16.msra.mxu3 %v4502_v34  ;;  %v4607_v34 = vld [vmem:[#allocation2 + $0x868] sm:$0xf0]  ;;  %v5171_v52 = vld [vmem:[#allocation2 + $0x884] sm:$0xf] }
 0x4a4   :  { %v2405_v36 = vsel %vm2397_vm7, %v2365_v60, %v2401_v27  ;;  %v4610_v42 = vor.u32 %v5167_v56, %v4607_v34  ;;  %v5157_v56 = vld [vmem:[#allocation2 + $0x814] sm:$0xf]  ;;  %v4567_v34 = vld [vmem:[#allocation2 + $0x818] sm:$0xf0] }
 0x4a5   :  { %v2407_v39 = vpack.c.bf16 %v2405_v36, %v2403_v25  ;;  %2655 = vmatpush.bf16.msrb.mxu1 %v4522_v50  ;;  %v5186_v36 = vld [vmem:[#allocation2 + $0x8f4] sm:$0xf0]  ;;  %v4618_v50 = vor.u32 %v5169_v47, %v4615_v48  ;;  %v4575_v48 = vld [vmem:[#allocation2 + $0x828] sm:$0xf0] }
 0x4a6   :  { %2616 = vmatpush.bf16.msra.mxu2 %v4430_v28  ;;  %v4678_v45 = vor.u32 %v5186_v36, %v4677_v35  ;;  %v4581_v35 = vld [vmem:[#allocation2 + $0x830] sm:$0xf]  ;;  %v5162_v36 = vld [vmem:[#allocation2 + $0x834] sm:$0xf0] }
 0x4a7   :  { %2645 = vmatmul.bf16.vlgmr.msrb.gmra.mxu0 %v2407_v39  ;;  %2630 = vmatpush.bf16.msra.mxu3 %v4494_v7  ;;  %v4597_v7 = vld [vmem:[#allocation2 + $0x850] sm:$0xf] }
 0x4a8   :  { %2923 = vmatpush.bf16.msra.mxu0 %v4618_v50  ;;  %v4621_v50 = vld [vmem:[#allocation2 + $0x880] sm:$0xf] }
 0x4a9   :  { %2617 = vmatmul.bf16.vlgmr.msra.gmra.mxu2 %v2407_v39  ;;  %2656 = vmatpush.bf16.msrb.mxu1 %v4514_v63  ;;  %v4682_v39 = vor.u32 %v5185_v37, %v4679_v38  ;;  %v4605_v63 = vld [vmem:[#allocation2 + $0x860] sm:$0xf]  ;;  %v5161_v37 = vld [vmem:[#allocation2 + $0x834] sm:$0xf]  ;;  %v4583_v38 = vld [vmem:[#allocation2 + $0x838] sm:$0xf0]  ;;  %v4622_v53 = vor.u32 %v5172_v51, %v4621_v50 }
 0x4aa   :  { %2895 = vmatpush.bf16.msrb.mxu2 %v4614_v31  ;;  %v4606_v41 = vor.u32 %v5168_v55, %v4605_v63  ;;  %v5159_v31 = vld [vmem:[#allocation2 + $0x824] sm:$0xf]  ;;  %v4565_v63 = vld [vmem:[#allocation2 + $0x810] sm:$0xf]  ;;  %v5158_v55 = vld [vmem:[#allocation2 + $0x814] sm:$0xf0] }
 0x4ab   :  { %2909 = vmatpush.bf16.msrb.mxu3 %v4678_v45  ;;  %v4582_v45 = vor.u32 %v5162_v36, %v4581_v35  ;;  %v4578_v49 = vor.u32 %v5159_v31, %v4575_v48 }
 0x4ac   :  { %2924 = vmatpush.bf16.msra.mxu0 %v4610_v42  ;;  %v4570_v42 = vor.u32 %v5157_v56, %v4567_v34 }
 0x4ad   :  { %2657 = vmatpush.bf16.msrb.mxu1 %v4506_v1  ;;  %v5180_v1 = vld [vmem:[#allocation2 + $0x8c4] sm:$0xf0] }
 0x4ae   :  { %2896 = vmatpush.bf16.msrb.mxu2 %v4606_v41  ;;  %v4566_v41 = vor.u32 %v5158_v55, %v4565_v63 }
 0x4af   :  { %2910 = vmatpush.bf16.msrb.mxu3 %v4670_v3  ;;  %v4630_v3 = vor.u32 %v5174_v43, %v4629_v40 }
 0x4b1   :  { %2658 = vmatpush.bf16.msrb.mxu1 %v4498_v9  ;;  %v5165_v9 = vld [vmem:[#allocation2 + $0x854] sm:$0xf] }
 0x4b3   :  { %2911 = vmatpush.bf16.msrb.mxu3 %v4662_v59  ;;  %v4623_v59 = vld [vmem:[#allocation2 + $0x888] sm:$0xf0] }
 0x4b5   :  { %2937 = vmatpush.bf16.msra.mxu1 %v4682_v39  ;;  %v4586_v39 = vor.u32 %v5161_v37, %v4583_v38 }
 0x4b9   :  { %2938 = vmatpush.bf16.msra.mxu1 %v4674_v24  ;;  %v5160_v24 = vld [vmem:[#allocation2 + $0x824] sm:$0xf0] }
 0x4ba   :  { %v4574_v47 = vor.u32 %v5160_v24, %v4573_v26 }
 0x4bd   :  { %2939 = vmatpush.bf16.msra.mxu1 %v4666_v54  ;;  %v4626_v54 = vor.u32 %v5171_v52, %v4623_v59 }
 0x501   :  { %v2118_v0 = vpop.f32.mrf.mxu0 }
 0x502   :  { %v2119_v10 = vadd.f32 %v5251_v4, %v2118_v0  ;;  %v4653_v0 = vld [vmem:[#allocation2 + $0x8c0] sm:$0xf] }
 0x503   :  { %v4654_v5 = vor.u32 %v5180_v1, %v4653_v0  ;;  %v4557_v0 = vld [vmem:[#allocation2 + $0x800] sm:$0xf]  ;;  %v5156_v1 = vld [vmem:[#allocation2 + $0x804] sm:$0xf0] }
 0x505   :  { %2912 = vmatpush.bf16.msrb.mxu3 %v4654_v5  ;;  %v2443_v5 = vld [vmem:[#allocation9 + $0x7] ss:$8 sm:$0x3] }
 0x506   :  { %v2445_v35 = vperm.slane %v2443_v5, 0 }
 0x509   :  { %v2132_v11 = vpop.f32.mrf.mxu1  ;;  %v2120_v13 = vpop.f32.mrf.mxu0 }
 0x50a   :  { %v2133_v12 = vadd.f32 %v2132_v11, %v2119_v10  ;;  %v2121_v14 = vadd.f32 %v5251_v4, %v2120_v13  ;;  %v5179_v4 = vld [vmem:[#allocation2 + $0x8c4] sm:$0xf]  ;;  %v4598_v10 = vor.u32 %v5166_v8, %v4597_v7  ;;  %v4599_v11 = vld [vmem:[#allocation2 + $0x858] sm:$0xf0]  ;;  %v4645_v13 = vld [vmem:[#allocation2 + $0x8b0] sm:$0xf] }
 0x50b   :  { %v4658_v58 = vor.u32 %v5179_v4, %v4655_v6  ;;  %v5155_v4 = vld [vmem:[#allocation2 + $0x804] sm:$0xf]  ;;  %v4558_v6 = vor.u32 %v5156_v1, %v4557_v0  ;;  %v2446_v8 = vperm.slane %v2443_v5, 1  ;;  %v5214_v5 = vld [vmem:[#allocation2 + $0x9d4] sm:$0xf0] }
 0x50c   :  { %2137 = vst [vmem:[%s5753_s11] sm:$0xff] %v2133_v12  ;;  %v4602_v12 = vor.u32 %v5165_v9, %v4599_v11  ;;  %2897 = vmatpush.bf16.msrb.mxu2 %v4598_v10  ;;  %v4805_v10 = vld [vmem:[#allocation2 + $0x9f0] sm:$0xf]  ;;  %v5218_v11 = vld [vmem:[#allocation2 + $0x9f4] sm:$0xf0] }
 0x50d   :  { %2940 = vmatpush.bf16.msra.mxu1 %v4658_v58  ;;  %v4559_v58 = vld [vmem:[#allocation2 + $0x808] sm:$0xf0] }
 0x50e   :  { %2925 = vmatpush.bf16.msra.mxu0 %v4602_v12  ;;  %v4562_v7 = vor.u32 %v5155_v4, %v4559_v58  ;;  %v5217_v12 = vld [vmem:[#allocation2 + $0x9f4] sm:$0xf]  ;;  %v4789_v4 = vld [vmem:[#allocation2 + $0x9d0] sm:$0xf] }
 0x50f   :  { %v4790_v58 = vor.u32 %v5214_v5, %v4789_v4  ;;  %v4749_v4 = vld [vmem:[#allocation2 + $0x980] sm:$0xf]  ;;  %v5204_v5 = vld [vmem:[#allocation2 + $0x984] sm:$0xf0] }
 0x511   :  { %v2134_v16 = vpop.f32.mrf.mxu1  ;;  %v2376_v18 = vpop.f32.mrf.mxu0 }
 0x512   :  { %v2135_v17 = vadd.f32 %v2134_v16, %v2121_v14  ;;  %v2377_v20 = vadd.f32 %v2376_v18, %v2176_v19  ;;  %v5178_v14 = vld [vmem:[#allocation2 + $0x8b4] sm:$0xf0]  ;;  %v5177_v16 = vld [vmem:[#allocation2 + $0x8b4] sm:$0xf]  ;;  %v4647_v18 = vld [vmem:[#allocation2 + $0x8b8] sm:$0xf0] }
 0x514   :  { %2138 = vst [vmem:[%s5753_s11 + $0x8] sm:$0xff] %v2135_v17  ;;  %v4646_v17 = vor.u32 %v5178_v14, %v4645_v13  ;;  %v4806_v13 = vor.u32 %v5218_v11, %v4805_v10  ;;  %v4807_v14 = vld [vmem:[#allocation2 + $0x9f8] sm:$0xf0]  ;;  %v5199_v11 = vld [vmem:[#allocation2 + $0x964] sm:$0xf] }
 0x516   :  { %2913 = vmatpush.bf16.msrb.mxu3 %v4646_v17  ;;  %v5216_v17 = vld [vmem:[#allocation2 + $0x9e4] sm:$0xf0] }
 0x519   :  { %v2390_v60 = vpop.f32.mrf.mxu1  ;;  %v2378_v21 = vpop.f32.mrf.mxu0 }
 0x51a   :  { %v2391_v22 = vadd.f32 %v2390_v60, %v2377_v20  ;;  %v2379_v23 = vadd.f32 %v2378_v21, %v2176_v19  ;;  %v4650_v19 = vor.u32 %v5177_v16, %v4647_v18  ;;  %v4589_v60 = vld [vmem:[#allocation2 + $0x840] sm:$0xf]  ;;  %v5164_v20 = vld [vmem:[#allocation2 + $0x844] sm:$0xf0]  ;;  %v5163_v21 = vld [vmem:[#allocation2 + $0x844] sm:$0xf]  ;;  %v4810_v18 = vor.u32 %v5217_v12, %v4807_v14 }
 0x51b   :  { %v4797_v16 = vld [vmem:[#allocation2 + $0x9e0] sm:$0xf]  ;;  %v4735_v12 = vld [vmem:[#allocation2 + $0x968] sm:$0xf0] }
 0x51c   :  { %v2400_v27 = vmul.f32 0.01, %v2391_v22  ;;  %vm2396_vm8 = vcmp.gt.f32.partialorder %v2391_v22, 0.0  ;;  %2941 = vmatpush.bf16.msra.mxu1 %v4650_v19  ;;  %v5215_v19 = vld [vmem:[#allocation2 + $0x9e4] sm:$0xf]  ;;  %v4738_v14 = vor.u32 %v5199_v11, %v4735_v12 }
 0x51d   :  { %v4695_v12 = vld [vmem:[#allocation2 + $0x918] sm:$0xf0] }
 0x51e   :  { %v2404_v2 = vsel %vm2396_vm8, %v2391_v22, %v2400_v27  ;;  %v4590_v22 = vor.u32 %v5164_v20, %v4589_v60  ;;  %v4637_v27 = vld [vmem:[#allocation2 + $0x8a0] sm:$0xf]  ;;  %v4799_v60 = vld [vmem:[#allocation2 + $0x9e8] sm:$0xf0]  ;;  %v4741_v20 = vld [vmem:[#allocation2 + $0x970] sm:$0xf] }
 0x520   :  { %2898 = vmatpush.bf16.msrb.mxu2 %v4590_v22  ;;  %v5202_v22 = vld [vmem:[#allocation2 + $0x974] sm:$0xf0] }
 0x521   :  { %v2392_v25 = vpop.f32.mrf.mxu1 }
 0x522   :  { %v2393_v28 = vadd.f32 %v2392_v25, %v2379_v23  ;;  %v4591_v23 = vld [vmem:[#allocation2 + $0x848] sm:$0xf0] }
 0x523   :  { %v4594_v25 = vor.u32 %v5163_v21, %v4591_v23  ;;  %v4798_v21 = vor.u32 %v5216_v17, %v4797_v16  ;;  %v5201_v23 = vld [vmem:[#allocation2 + $0x974] sm:$0xf]  ;;  %v5212_v16 = vld [vmem:[#allocation2 + $0x9c4] sm:$0xf0]  ;;  %v5211_v17 = vld [vmem:[#allocation2 + $0x9c4] sm:$0xf] }
 0x524   :  { %vm2398_vm9 = vcmp.gt.f32.partialorder %v2393_v28, 0.0  ;;  %v2402_v29 = vmul.f32 0.01, %v2393_v28  ;;  %2899 = vmatpush.bf16.msrb.mxu2 %v4582_v45  ;;  %v2646_v9 = vpop.f32.mrf.mxu0 }
 0x525   :  { %2926 = vmatpush.bf16.msra.mxu0 %v4594_v25  ;;  %v4743_v25 = vld [vmem:[#allocation2 + $0x978] sm:$0xf0] }
 0x526   :  { %v2406_v30 = vsel %vm2398_vm9, %v2393_v28, %v2402_v29  ;;  %v5176_v28 = vld [vmem:[#allocation2 + $0x8a4] sm:$0xf0]  ;;  %v5175_v29 = vld [vmem:[#allocation2 + $0x8a4] sm:$0xf] }
 0x527   :  { %v2408_v32 = vpack.c.bf16 %v2406_v30, %v2404_v2  ;;  %v4638_v2 = vor.u32 %v5176_v28, %v4637_v27  ;;  %v4639_v30 = vld [vmem:[#allocation2 + $0x8a8] sm:$0xf0]  ;;  %v2647_v27 = vadd.f32 %v2646_v9, %v2446_v8  ;;  %v4802_v28 = vor.u32 %v5215_v19, %v4799_v60 }
 0x528   :  { %2900 = vmatpush.bf16.msrb.mxu2 %v4574_v47 }
 0x529   :  { %2631 = vmatmul.bf16.vlgmr.msra.gmra.mxu3 %v2408_v32  ;;  %2659 = vmatmul.bf16.vlgmr.msrb.gmra.mxu1 %v2408_v32  ;;  %v4642_v32 = vor.u32 %v5175_v29, %v4639_v30  ;;  %v4742_v29 = vor.u32 %v5202_v22, %v4741_v20  ;;  %v4725_v20 = vld [vmem:[#allocation2 + $0x950] sm:$0xf]  ;;  %v5197_v22 = vld [vmem:[#allocation2 + $0x954] sm:$0xf] }
 0x52a   :  { %2914 = vmatpush.bf16.msrb.mxu3 %v4638_v2  ;;  %2927 = vmatpush.bf16.msra.mxu0 %v4586_v39  ;;  %v4746_v2 = vor.u32 %v5201_v23, %v4743_v25  ;;  %v4727_v25 = vld [vmem:[#allocation2 + $0x958] sm:$0xf0] }
 0x52b   :  { %2942 = vmatpush.bf16.msra.mxu1 %v4642_v32 }
 0x52c   :  { %2901 = vmatpush.bf16.msrb.mxu2 %v4566_v41  ;;  %v2618_v30 = vpop.f32.mrf.mxu2  ;;  %v2648_v45 = vpop.f32.mrf.mxu0 }
 0x52d   :  { %v2619_v38 = vadd.f32 %v2618_v30, %v2445_v35  ;;  %v2649_v40 = vadd.f32 %v2648_v45, %v2446_v8  ;;  %v5200_v8 = vld [vmem:[#allocation2 + $0x964] sm:$0xf0]  ;;  %v5209_v30 = vld [vmem:[#allocation2 + $0x9b4] sm:$0xf]  ;;  %v5195_v45 = vld [vmem:[#allocation2 + $0x944] sm:$0xf] }
 0x52e   :  { %2915 = vmatpush.bf16.msrb.mxu3 %v4630_v3  ;;  %2928 = vmatpush.bf16.msra.mxu0 %v4578_v49 }
 0x52f   :  { %2943 = vmatpush.bf16.msra.mxu1 %v4634_v15 }
 0x530   :  { %2902 = vmatpush.bf16.msrb.mxu2 %v4558_v6  ;;  %v5213_v6 = vld [vmem:[#allocation2 + $0x9d4] sm:$0xf] }
 0x532   :  { %2916 = vmatpush.bf16.msrb.mxu3 %v4622_v53  ;;  %2929 = vmatpush.bf16.msra.mxu0 %v4570_v42 }
 0x533   :  { %2944 = vmatpush.bf16.msra.mxu1 %v4626_v54 }
 0x534   :  { %3165 = vmatpush.bf16.msra.mxu2 %v4742_v29  ;;  %v2620_v26 = vpop.f32.mrf.mxu2  ;;  %v4730_v29 = vor.u32 %v5197_v22, %v4727_v25 }
 0x535   :  { %v2621_v47 = vadd.f32 %v2620_v26, %v2445_v35 }
 0x536   :  { %2930 = vmatpush.bf16.msra.mxu0 %v4562_v7  ;;  %3179 = vmatpush.bf16.msra.mxu3 %v4806_v13  ;;  %v4791_v7 = vld [vmem:[#allocation2 + $0x9d8] sm:$0xf0]  ;;  %v4781_v13 = vld [vmem:[#allocation2 + $0x9c0] sm:$0xf] }
 0x537   :  { %3207 = vmatpush.bf16.msrb.mxu1 %v4810_v18  ;;  %v4794_v9 = vor.u32 %v5213_v6, %v4791_v7  ;;  %v4783_v18 = vld [vmem:[#allocation2 + $0x9c8] sm:$0xf0]  ;;  %v4782_v19 = vor.u32 %v5212_v16, %v4781_v13  ;;  %v5203_v6 = vld [vmem:[#allocation2 + $0x984] sm:$0xf]  ;;  %v5188_v16 = vld [vmem:[#allocation2 + $0x904] sm:$0xf0] }
 0x538   :  { %v4786_v60 = vor.u32 %v5211_v17, %v4783_v18  ;;  %v4751_v7 = vld [vmem:[#allocation2 + $0x988] sm:$0xf0]  ;;  %v5187_v17 = vld [vmem:[#allocation2 + $0x904] sm:$0xf] }
 0x53a   :  { %3193 = vmatpush.bf16.msrb.mxu0 %v4746_v2  ;;  %3180 = vmatpush.bf16.msra.mxu3 %v4798_v21  ;;  %v5198_v21 = vld [vmem:[#allocation2 + $0x954] sm:$0xf0] }
 0x53b   :  { %3208 = vmatpush.bf16.msrb.mxu1 %v4802_v28  ;;  %v4726_v23 = vor.u32 %v5198_v21, %v4725_v20  ;;  %v5210_v28 = vld [vmem:[#allocation2 + $0x9b4] sm:$0xf0]  ;;  %v5234_v20 = vld [vmem:[#allocation14 + $0x78] sm:$0xff]  ;;  %v2729_v21 = vld [vmem:[#allocation9 + $0x10] ss:$8 sm:$0x3] }
 0x53c   :  { %v2732_v22 = vperm.slane %v2729_v21, 1 }
 0x53e   :  { %3181 = vmatpush.bf16.msra.mxu3 %v4790_v58  ;;  %3194 = vmatpush.bf16.msrb.mxu0 %v4738_v14  ;;  %v4750_v58 = vor.u32 %v5204_v5, %v4749_v4  ;;  %v4685_v14 = vld [vmem:[#allocation2 + $0x900] sm:$0xf]  ;;  %v5227_v4 = vld [vmem:[#allocation14 + $0x40] sm:$0xff] }
 0x53f   :  { %3209 = vmatpush.bf16.msrb.mxu1 %v4794_v9  ;;  %v5190_v9 = vld [vmem:[#allocation2 + $0x914] sm:$0xf0]  ;;  %v4686_v18 = vor.u32 %v5188_v16, %v4685_v14  ;;  %v5220_v5 = vld [vmem:[#allocation14 + $0x8] sm:$0xff] }
 0x542   :  { %3182 = vmatpush.bf16.msra.mxu3 %v4782_v19  ;;  %3195 = vmatpush.bf16.msrb.mxu0 %v4730_v29  ;;  %v4687_v19 = vld [vmem:[#allocation2 + $0x908] sm:$0xf0] }
 0x543   :  { %3210 = vmatpush.bf16.msrb.mxu1 %v4786_v60  ;;  %v4690_v60 = vor.u32 %v5187_v17, %v4687_v19 }
 0x5a6   :  { %v2660_v32 = vpop.f32.mrf.mxu1 }
 0x5a7   :  { %v2661_v36 = vadd.f32 %v2660_v32, %v2647_v27  ;;  %v4773_v27 = vld [vmem:[#allocation2 + $0x9b0] sm:$0xf]  ;;  %v4775_v32 = vld [vmem:[#allocation2 + $0x9b8] sm:$0xf0] }
 0x5a8   :  { %v4774_v2 = vor.u32 %v5210_v28, %v4773_v27  ;;  %v4778_v35 = vor.u32 %v5209_v30, %v4775_v32  ;;  %v2731_v28 = vperm.slane %v2729_v21, 0 }
 0x5a9   :  { %v2670_v37 = vmul.f32 0.01, %v2661_v36  ;;  %vm2666_vm10 = vcmp.gt.f32.partialorder %v2661_v36, 0.0 }
 0x5aa   :  { %3183 = vmatpush.bf16.msra.mxu3 %v4774_v2  ;;  %3211 = vmatpush.bf16.msrb.mxu1 %v4778_v35 }
 0x5ab   :  { %v2674_v43 = vsel %vm2666_vm10, %v2661_v36, %v2670_v37  ;;  %v4717_v36 = vld [vmem:[#allocation2 + $0x940] sm:$0xf]  ;;  %v5196_v37 = vld [vmem:[#allocation2 + $0x944] sm:$0xf0] }
 0x5ac   :  { %v2632_v39 = vpop.f32.mrf.mxu3  ;;  %v2678_v24 = vadd.f32 %v2674_v43, %v5660_v61  ;;  %v4765_v43 = vld [vmem:[#allocation2 + $0x9a0] sm:$0xf] }
 0x5ad   :  { %v2633_v44 = vadd.f32 %v2632_v39, %v2619_v38  ;;  %v4718_v38 = vor.u32 %v5196_v37, %v4717_v36  ;;  %v4719_v39 = vld [vmem:[#allocation2 + $0x948] sm:$0xf0] }
 0x5ae   :  { %v2662_v3 = vpop.f32.mrf.mxu1  ;;  %v2686_v50 = vmul.f32 0.01, %v2678_v24  ;;  %vm2682_vm13 = vcmp.gt.f32.partialorder %v2678_v24, 0.0 }
 0x5af   :  { %v2669_v46 = vmul.f32 0.01, %v2633_v44  ;;  %v2663_v15 = vadd.f32 %v2662_v3, %v2649_v40  ;;  %vm2665_vm11 = vcmp.gt.f32.partialorder %v2633_v44, 0.0  ;;  %v4722_v40 = vor.u32 %v5195_v45, %v4719_v39  ;;  %v5207_v3 = vld [vmem:[#allocation2 + $0x9a4] sm:$0xf] }
 0x5b0   :  { %v5719_v55 = vsel %vm2682_vm13, %v2678_v24, %v2686_v50  ;;  %v4709_v24 = vld [vmem:[#allocation2 + $0x930] sm:$0xf] }
 0x5b1   :  { %vm2668_vm12 = vcmp.gt.f32.partialorder %v2663_v15, 0.0  ;;  %v2672_v31 = vmul.f32 0.01, %v2663_v15  ;;  %v2673_v48 = vsel %vm2665_vm11, %v2633_v44, %v2669_v46  ;;  %v5208_v44 = vld [vmem:[#allocation2 + $0x9a4] sm:$0xf0]  ;;  %3196 = vmatpush.bf16.msrb.mxu0 %v4722_v40 }
 0x5b2   :  { %v2677_v59 = vadd.f32 %v2673_v48, %v5649_v33  ;;  %v4766_v46 = vor.u32 %v5208_v44, %v4765_v43 }
 0x5b3   :  { %v2676_v49 = vsel %vm2668_vm12, %v2663_v15, %v2672_v31  ;;  %v4767_v15 = vld [vmem:[#allocation2 + $0x9a8] sm:$0xf0]  ;;  %v5194_v31 = vld [vmem:[#allocation2 + $0x934] sm:$0xf0] }
 0x5b4   :  { %v2680_v51 = vadd.f32 %v2676_v49, %v5662_v62  ;;  %v2634_v52 = vpop.f32.mrf.mxu3  ;;  %v2685_v34 = vmul.f32 0.01, %v2677_v59  ;;  %vm2681_vm0 = vcmp.gt.f32.partialorder %v2677_v59, 0.0  ;;  %v4770_v26 = vor.u32 %v5207_v3, %v4767_v15  ;;  %3184 = vmatpush.bf16.msra.mxu3 %v4766_v46  ;;  %v4711_v49 = vld [vmem:[#allocation2 + $0x938] sm:$0xf0] }
 0x5b5   :  { %v2635_v53 = vadd.f32 %v2634_v52, %v2621_v47  ;;  %v5193_v47 = vld [vmem:[#allocation2 + $0x934] sm:$0xf]  ;;  %v4710_v48 = vor.u32 %v5194_v31, %v4709_v24  ;;  %v5206_v52 = vld [vmem:[#allocation2 + $0x994] sm:$0xf0] }
 0x5b6   :  { %vm2684_vm14 = vcmp.gt.f32.partialorder %v2680_v51, 0.0  ;;  %v2688_v54 = vmul.f32 0.01, %v2680_v51  ;;  %v5726_v42 = vsel %vm2681_vm0, %v2677_v59, %v2685_v34  ;;  %3212 = vmatpush.bf16.msrb.mxu1 %v4770_v26  ;;  %v4714_v50 = vor.u32 %v5193_v47, %v4711_v49  ;;  %v5191_v34 = vld [vmem:[#allocation2 + $0x924] sm:$0xf] }
 0x5b7   :  { %vm2667_vm15 = vcmp.gt.f32.partialorder %v2635_v53, 0.0  ;;  %v2671_v63 = vmul.f32 0.01, %v2635_v53 }
 0x5b8   :  { %v5721_v61 = vsel %vm2684_vm14, %v2680_v51, %v2688_v54  ;;  %v4757_v51 = vld [vmem:[#allocation2 + $0x990] sm:$0xf]  ;;  %v4759_v54 = vld [vmem:[#allocation2 + $0x998] sm:$0xf0]  ;;  %3197 = vmatpush.bf16.msrb.mxu0 %v4714_v50 }
 0x5b9   :  { %v2675_v56 = vsel %vm2667_vm15, %v2635_v53, %v2671_v63  ;;  %v2694_v41 = vpack.c.bf16 %v5721_v61, %v5719_v55  ;;  %v5205_v53 = vld [vmem:[#allocation2 + $0x994] sm:$0xf]  ;;  %v4758_v59 = vor.u32 %v5206_v52, %v4757_v51  ;;  %v5233_v51 = vld [vmem:[#allocation14 + $0x70] sm:$0xff]  ;;  %v5226_v52 = vld [vmem:[#allocation14 + $0x38] sm:$0xff] }
 0x5ba   :  { %v2679_v62 = vadd.f32 %v2675_v56, %v5651_v57  ;;  %v4733_v57 = vld [vmem:[#allocation2 + $0x960] sm:$0xf]  ;;  %v4762_v63 = vor.u32 %v5205_v53, %v4759_v54  ;;  %v5231_v54 = vld [vmem:[#allocation14 + $0x60] sm:$0xff] }
 0x5bb   :  { %2917 = vmatmul.bf16.vlgmr.msrb.gmra.mxu3 %v2694_v41  ;;  %2945 = vmatmul.bf16.vlgmr.msra.gmra.mxu1 %v2694_v41  ;;  %v4734_v10 = vor.u32 %v5200_v8, %v4733_v57  ;;  %v4701_v56 = vld [vmem:[#allocation2 + $0x920] sm:$0xf]  ;;  %v5192_v41 = vld [vmem:[#allocation2 + $0x924] sm:$0xf0]  ;;  %v4754_v57 = vor.u32 %v5203_v6, %v4751_v7  ;;  %v4693_v8 = vld [vmem:[#allocation2 + $0x910] sm:$0xf] }
 0x5bc   :  { %vm2683_vm1 = vcmp.gt.f32.partialorder %v2679_v62, 0.0  ;;  %v2687_v33 = vmul.f32 0.01, %v2679_v62  ;;  %3185 = vmatpush.bf16.msra.mxu3 %v4758_v59  ;;  %3213 = vmatpush.bf16.msrb.mxu1 %v4762_v63  ;;  %v4694_v11 = vor.u32 %v5190_v9, %v4693_v8  ;;  %v5232_v53 = vld [vmem:[#allocation14 + $0x68] sm:$0xff]  ;;  %v5225_v59 = vld [vmem:[#allocation14 + $0x30] sm:$0xff]  ;;  %v5219_v6 = vld [vmem:[#allocation14] sm:$0xff] }
 0x5bd   :  { %3166 = vmatpush.bf16.msra.mxu2 %v4734_v10  ;;  %v5189_v10 = vld [vmem:[#allocation2 + $0x914] sm:$0xf]  ;;  %v5224_v63 = vld [vmem:[#allocation14 + $0x28] sm:$0xff] }
 0x5be   :  { %v5728_v0 = vsel %vm2683_vm1, %v2679_v62, %v2687_v33  ;;  %v4702_v62 = vor.u32 %v5192_v41, %v4701_v56  ;;  %v4703_v33 = vld [vmem:[#allocation2 + $0x928] sm:$0xf0]  ;;  %v4698_v13 = vor.u32 %v5189_v10, %v4695_v12  ;;  %v5223_v41 = vld [vmem:[#allocation14 + $0x20] sm:$0xff] }
 0x5bf   :  { %v2693_v1 = vpack.c.bf16 %v5728_v0, %v5726_v42  ;;  %v5230_v56 = vld [vmem:[#allocation14 + $0x58] sm:$0xff] }
 0x5c0   :  { %3186 = vmatpush.bf16.msra.mxu3 %v4750_v58  ;;  %3214 = vmatpush.bf16.msrb.mxu1 %v4754_v57  ;;  %v2999_v58 = vld [vmem:[#allocation9 + $0x11] ss:$8 sm:$0x3] }
 0x5c1   :  { %2903 = vmatmul.bf16.vlgmr.msrb.gmra.mxu2 %v2693_v1  ;;  %2931 = vmatmul.bf16.vlgmr.msra.gmra.mxu0 %v2693_v1  ;;  %v4706_v1 = vor.u32 %v5191_v34, %v4703_v33  ;;  %v5229_v34 = vld [vmem:[#allocation14 + $0x50] sm:$0xff]  ;;  %v5228_v33 = vld [vmem:[#allocation14 + $0x48] sm:$0xff]  ;;  %v3002_v7 = vperm.slane %v2999_v58, 1 }
 0x5c2   :  { %3167 = vmatpush.bf16.msra.mxu2 %v4726_v23 }
 0x5c3   :  { %3198 = vmatpush.bf16.msrb.mxu0 %v4706_v1  ;;  %v5221_v1 = vld [vmem:[#allocation14 + $0x10] sm:$0xff] }
 0x5c4   :  { %3397 = vmatpush.bf16.msrb.mxu3 %v5234_v20 }
 0x5c6   :  { %3168 = vmatpush.bf16.msra.mxu2 %v4718_v38 }
 0x5c7   :  { %3199 = vmatpush.bf16.msrb.mxu0 %v4698_v13 }
 0x5c8   :  { %3398 = vmatpush.bf16.msrb.mxu3 %v5233_v51 }
 0x5ca   :  { %3169 = vmatpush.bf16.msra.mxu2 %v4710_v48 }
 0x5cb   :  { %3200 = vmatpush.bf16.msrb.mxu0 %v4690_v60 }
 0x5cc   :  { %3399 = vmatpush.bf16.msrb.mxu3 %v5232_v53 }
 0x5ce   :  { %3170 = vmatpush.bf16.msra.mxu2 %v4702_v62  ;;  %v5222_v62 = vld [vmem:[#allocation14 + $0x18] sm:$0xff] }
 0x5d0   :  { %3400 = vmatpush.bf16.msrb.mxu3 %v5231_v54 }
 0x5d2   :  { %3171 = vmatpush.bf16.msra.mxu2 %v4694_v11  ;;  %v3001_v11 = vperm.slane %v2999_v58, 0 }
 0x5d4   :  { %3401 = vmatpush.bf16.msrb.mxu3 %v5230_v56 }
 0x5d6   :  { %3172 = vmatpush.bf16.msra.mxu2 %v4686_v18 }
 0x5d8   :  { %3402 = vmatpush.bf16.msrb.mxu3 %v5229_v34 }
 0x5da   :  { %3383 = vmatpush.bf16.msrb.mxu2 %v5226_v52 }
 0x5dc   :  { %3403 = vmatpush.bf16.msrb.mxu3 %v5228_v33 }
 0x5de   :  { %3384 = vmatpush.bf16.msrb.mxu2 %v5225_v59 }
 0x5e0   :  { %3404 = vmatpush.bf16.msrb.mxu3 %v5227_v4 }
 0x5e2   :  { %3385 = vmatpush.bf16.msrb.mxu2 %v5224_v63 }
 0x5e6   :  { %3386 = vmatpush.bf16.msrb.mxu2 %v5223_v41 }
 0x5ea   :  { %3387 = vmatpush.bf16.msrb.mxu2 %v5222_v62 }
 0x5ee   :  { %3388 = vmatpush.bf16.msrb.mxu2 %v5221_v1 }
 0x5f2   :  { %3389 = vmatpush.bf16.msrb.mxu2 %v5220_v5 }
 0x5f6   :  { %3390 = vmatpush.bf16.msrb.mxu2 %v5219_v6 }
 0x638   :  { %v2946_v23 = vpop.f32.mrf.mxu1 }
 0x63e   :  { %v2932_v25 = vpop.f32.mrf.mxu0  ;;  %v2918_v29 = vpop.f32.mrf.mxu3 }
 0x63f   :  { %v2933_v27 = vadd.f32 %v2932_v25, %v2732_v22 }
 0x640   :  { %v2948_v37 = vpop.f32.mrf.mxu1 }
 0x641   :  { %v2947_v30 = vadd.f32 %v2946_v23, %v2933_v27 }
 0x643   :  { %v2956_v45 = vmul.f32 0.01, %v2947_v30  ;;  %vm2952_vm2 = vcmp.gt.f32.partialorder %v2947_v30, 0.0 }
 0x644   :  { %v2904_v2 = vpop.f32.mrf.mxu2 }
 0x645   :  { %v2905_v35 = vadd.f32 %v2904_v2, %v2731_v28  ;;  %v2960_v44 = vsel %vm2952_vm2, %v2947_v30, %v2956_v45 }
 0x646   :  { %v2934_v32 = vpop.f32.mrf.mxu0  ;;  %v2920_v15 = vpop.f32.mrf.mxu3 }
 0x647   :  { %v2935_v36 = vadd.f32 %v2934_v32, %v2732_v22  ;;  %v2919_v39 = vadd.f32 %v2918_v29, %v2905_v35 }
 0x649   :  { %v2949_v38 = vadd.f32 %v2948_v37, %v2935_v36  ;;  %v2955_v24 = vmul.f32 0.01, %v2919_v39  ;;  %vm2951_vm4 = vcmp.gt.f32.partialorder %v2919_v39, 0.0 }
 0x64b   :  { %vm2954_vm3 = vcmp.gt.f32.partialorder %v2949_v38, 0.0  ;;  %v2958_v40 = vmul.f32 0.01, %v2949_v38  ;;  %v2959_v48 = vsel %vm2951_vm4, %v2919_v39, %v2955_v24 }
 0x64c   :  { %v2906_v43 = vpop.f32.mrf.mxu2 }
 0x64d   :  { %v2962_v3 = vsel %vm2954_vm3, %v2949_v38, %v2958_v40  ;;  %v2907_v46 = vadd.f32 %v2906_v43, %v2731_v28 }
 0x64e   :  { %v2964_v26 = vpack.c.bf16 %v2962_v3, %v2960_v44 }
 0x64f   :  { %v2921_v31 = vadd.f32 %v2920_v15, %v2907_v46 }
 0x650   :  { %3187 = vmatmul.bf16.vlgmr.msra.gmra.mxu3 %v2964_v26  ;;  %3215 = vmatmul.bf16.vlgmr.msrb.gmra.mxu1 %v2964_v26 }
 0x651   :  { %vm2953_vm5 = vcmp.gt.f32.partialorder %v2921_v31, 0.0  ;;  %v2957_v47 = vmul.f32 0.01, %v2921_v31 }
 0x653   :  { %v2961_v49 = vsel %vm2953_vm5, %v2921_v31, %v2957_v47 }
 0x654   :  { %v2963_v50 = vpack.c.bf16 %v2961_v49, %v2959_v48 }
 0x656   :  { %3173 = vmatmul.bf16.vlgmr.msra.gmra.mxu2 %v2963_v50  ;;  %3201 = vmatmul.bf16.vlgmr.msrb.gmra.mxu0 %v2963_v50 }
 0x6cd   :  { %v3216_v57 = vpop.f32.mrf.mxu1 }
 0x6d3   :  { %v3202_v8 = vpop.f32.mrf.mxu0  ;;  %v3188_v13 = vpop.f32.mrf.mxu3 }
 0x6d4   :  { %v3203_v9 = vadd.f32 %v3202_v8, %v3002_v7 }
 0x6d5   :  { %v3218_v20 = vpop.f32.mrf.mxu1 }
 0x6d6   :  { %v3217_v10 = vadd.f32 %v3216_v57, %v3203_v9 }
 0x6d8   :  { %v3226_v12 = vmul.f32 0.01, %v3217_v10  ;;  %vm3222_vm6 = vcmp.gt.f32.partialorder %v3217_v10, 0.0 }
 0x6d9   :  { %v3174_v14 = vpop.f32.mrf.mxu2 }
 0x6da   :  { %v3175_v16 = vadd.f32 %v3174_v14, %v3001_v11  ;;  %v3230_v18 = vsel %vm3222_vm6, %v3217_v10, %v3226_v12 }
 0x6db   :  { %v3204_v17 = vpop.f32.mrf.mxu0  ;;  %v3234_v23 = vadd.f32 %v3230_v18, %v5719_v55  ;;  %v3190_v32 = vpop.f32.mrf.mxu3 }
 0x6dc   :  { %v3189_v19 = vadd.f32 %v3188_v13, %v3175_v16  ;;  %v3205_v60 = vadd.f32 %v3204_v17, %v3002_v7 }
 0x6dd   :  { %v3242_v30 = vmul.f32 0.01, %v3234_v23  ;;  %vm3238_vm9 = vcmp.gt.f32.partialorder %v3234_v23, 0.0 }
 0x6de   :  { %v3225_v21 = vmul.f32 0.01, %v3189_v19  ;;  %v3219_v22 = vadd.f32 %v3218_v20, %v3205_v60  ;;  %vm3221_vm7 = vcmp.gt.f32.partialorder %v3189_v19, 0.0 }
 0x6df   :  { %v3246_v55 = vsel %vm3238_vm9, %v3234_v23, %v3242_v30 }
 0x6e0   :  { %vm3224_vm8 = vcmp.gt.f32.partialorder %v3219_v22, 0.0  ;;  %v3228_v25 = vmul.f32 0.01, %v3219_v22  ;;  %v3229_v28 = vsel %vm3221_vm7, %v3189_v19, %v3225_v21 }
 0x6e1   :  { %v3176_v27 = vpop.f32.mrf.mxu2  ;;  %v3233_v37 = vadd.f32 %v3229_v28, %v5726_v42  ;;  %v5252_v42 = vld [vmem:[#allocation15] ss:$0 sm:$0xff] }
 0x6e2   :  { %v3232_v29 = vsel %vm3224_vm8, %v3219_v22, %v3228_v25  ;;  %v3177_v2 = vadd.f32 %v3176_v27, %v3001_v11 }
 0x6e3   :  { %v3236_v35 = vadd.f32 %v3232_v29, %v5721_v61  ;;  %v3241_v44 = vmul.f32 0.01, %v3233_v37  ;;  %vm3237_vm12 = vcmp.gt.f32.partialorder %v3233_v37, 0.0 }
 0x6e4   :  { %v3191_v36 = vadd.f32 %v3190_v32, %v3177_v2 }
 0x6e5   :  { %v3244_v45 = vmul.f32 0.01, %v3236_v35  ;;  %vm3240_vm10 = vcmp.gt.f32.partialorder %v3236_v35, 0.0  ;;  %v3245_v61 = vsel %vm3237_vm12, %v3233_v37, %v3241_v44 }
 0x6e6   :  { %vm3223_vm11 = vcmp.gt.f32.partialorder %v3191_v36, 0.0  ;;  %v3227_v38 = vmul.f32 0.01, %v3191_v36 }
 0x6e7   :  { %v3248_v39 = vsel %vm3240_vm10, %v3236_v35, %v3244_v45 }
 0x6e8   :  { %v3231_v40 = vsel %vm3223_vm11, %v3191_v36, %v3227_v38  ;;  %v3250_v43 = vpack.c.bf16 %v3248_v39, %v3246_v55 }
 0x6e9   :  { %v3235_v3 = vadd.f32 %v3231_v40, %v5728_v0 }
 0x6ea   :  { %3405 = vmatmul.bf16.vlgmr.msrb.gmra.mxu3 %v3250_v43 }
 0x6eb   :  { %v3243_v46 = vmul.f32 0.01, %v3235_v3  ;;  %vm3239_vm13 = vcmp.gt.f32.partialorder %v3235_v3, 0.0 }
 0x6ed   :  { %v3247_v15 = vsel %vm3239_vm13, %v3235_v3, %v3243_v46 }
 0x6ee   :  { %v3249_v26 = vpack.c.bf16 %v3247_v15, %v3245_v61 }
 0x6f0   :  { %3391 = vmatmul.bf16.vlgmr.msrb.gmra.mxu2 %v3249_v26 }
 0x76d   :  { %v3406_v24 = vpop.f32.mrf.mxu3 }
 0x773   :  { %v3392_v31 = vpop.f32.mrf.mxu2 }
 0x774   :  { %v3393_v47 = vadd.f32 %v5252_v42, %v3392_v31 }
 0x775   :  { %v3408_v0 = vpop.f32.mrf.mxu3 }
 0x776   :  { %v3407_v48 = vadd.f32 %v3406_v24, %v3393_v47 }
 0x778   :  { %3411 = vst [vmem:[%s5754_s12] sm:$0xff] %v3407_v48 }
 0x77b   :  { %v3394_v49 = vpop.f32.mrf.mxu2 }
 0x77c   :  { %v3395_v50 = vadd.f32 %v5252_v42, %v3394_v49 }
 0x77e   :  { %v3409_v51 = vadd.f32 %v3408_v0, %v3395_v50 }
 0x780   :  { %3412 = vst [vmem:[%s5754_s12 + $0x8] sm:$0xff] %v3409_v51 }
 0x781   :  { %3421 = vsyncpa [#allocation5], 1 }
 0x782   :  { %3422 = vsyncpa [#allocation7], 1 }
 0x783   :  { %3423 = vsyncpa [#allocation10], 1 }
 0x784   :  { %3424 = vsyncpa [#allocation13], 1 }
 0x785   :  { %3425 = vsyncpa [#allocation16], 1 }
 0x786   :  { %3426 = vsyncmov [#allocation3] }
 0x789   :  { %s3427_s21 = vpop.sfrf %3426 }
 0x78a   :  { %p4875_p0 = scmp.ne.s32.totalorder %s3427_s21, 0 }
 0x78c   :  { %3431 = shalt.err (%p4875_p0)  }
 0x78d   :  { %3433 = vsyncmov [#allocation3 + $0x1] }
 0x790   :  { %s3434_s6 = vpop.sfrf %3433 }
 0x791   :  { %p4876_p1 = scmp.ne.s32.totalorder %s3434_s6, 0 }
 0x793   :  { %3438 = shalt.err (%p4876_p1)  }

</bundles_post_ra>
